<compile_context>
chip_gen: v6e
topology: v6e:2x2x1
jax: 0.10.0
libtpu: 0.0.40
codegen_flags: <defaults>
</compile_context>

<pallas_src>
import functools
import math

import jax
import jax.numpy as jnp
from jax.experimental import pallas as pl
from jax.experimental.pallas import tpu as pltpu

_NEG_INF = -1e30  # additive key-padding mask value (activations stay f32)


# ----------------------------------------------------------------------------
# Deterministic buffers / parameters
# ----------------------------------------------------------------------------
def build_positional_encoding_table(max_len, d_model, dtype=jnp.float32):
    position = jnp.arange(max_len, dtype=jnp.float32)[:, None]           # [L, 1]
    div_term = jnp.exp(
        jnp.arange(0, d_model, 2, dtype=jnp.float32)
        * (-math.log(10000.0) / d_model)
    )                                                                    # [D/2]
    angles = position * div_term                                         # [L, D/2]
    pe = jnp.zeros((max_len, d_model), jnp.float32)
    pe = pe.at[:, 0::2].set(jnp.sin(angles))
    pe = pe.at[:, 1::2].set(jnp.cos(angles))
    return pe.astype(dtype)                                              # [L, D]


def init_params(key, njoints, nfeats, latent_dim, ff_size, num_layers,
                max_len=5000):
    f_in = njoints * nfeats
    d = latent_dim
    keys = iter(jax.random.split(key, 4 + 6 * num_layers))
    s = 0.02
    params = {
        "pe": build_positional_encoding_table(max_len, d),
        "muQuery": jax.random.normal(next(keys), (1, d), jnp.float32),
        "sigmaQuery": jax.random.normal(next(keys), (1, d), jnp.float32),
        # weights stored pre-transposed: y = x @ W_t + b
        "skel_wt": s * jax.random.normal(next(keys), (f_in, d), jnp.float32),
        "skel_b": s * jax.random.normal(next(keys), (1, d), jnp.float32),
        "layers": [],
    }
    for _ in range(num_layers):
        params["layers"].append({
            "wqkv_t": s * jax.random.normal(next(keys), (d, 3 * d), jnp.float32),
            "bqkv": jnp.zeros((1, 3 * d), jnp.float32),
            "wo_t": s * jax.random.normal(next(keys), (d, d), jnp.float32),
            "bo": jnp.zeros((1, d), jnp.float32),
            "ln1_g": jnp.ones((1, d), jnp.float32),
            "ln1_b": jnp.zeros((1, d), jnp.float32),
            "w1_t": s * jax.random.normal(next(keys), (d, ff_size), jnp.float32),
            "b1": jnp.zeros((1, ff_size), jnp.float32),
            "w2_t": s * jax.random.normal(next(keys), (ff_size, d), jnp.float32),
            "b2": jnp.zeros((1, d), jnp.float32),
            "ln2_g": jnp.ones((1, d), jnp.float32),
            "ln2_b": jnp.zeros((1, d), jnp.float32),
        })
    return params


# ----------------------------------------------------------------------------
# Shared math helpers (pure jnp -> usable inside kernels and in the reference)
# ----------------------------------------------------------------------------
def _layernorm(x, g, b, eps=1e-5):
    mean = jnp.mean(x, axis=-1, keepdims=True)
    xc = x - mean
    var = jnp.mean(xc * xc, axis=-1, keepdims=True)
    return xc * jax.lax.rsqrt(var + eps) * g + b


def _gelu(x):
    c = math.sqrt(2.0 / math.pi)
    return 0.5 * x * (1.0 + jnp.tanh(c * (x + 0.044715 * x * x * x)))


# ----------------------------------------------------------------------------
# Fused kernel: embedding prologue + all transformer encoder layers
# ----------------------------------------------------------------------------
def _fused_encoder_kernel(x_ref, neg_ref, init_ref, skelw_ref,
                          wqkv_ref, bqkv_ref, wo_ref, bo_ref,
                          g1_ref, be1_ref, w1_ref, bf1_ref,
                          w2_ref, bf2_ref, g2_ref, be2_ref,
                          mu_ref,
                          h_scr, ctx_scr, *, num_heads):
    layer = pl.program_id(1)
    b_tile, s_pad, d = h_scr.shape
    hd = d // num_heads
    rows = b_tile * s_pad

    # ---- layer-0 prologue: skelEmbedding + tokens + positional encoding ----
    # x_ref rows 0,1 and the padding rows are zero, so one batch-merged matmul
    # plus the precomputed init_add covers tokens, bias and PE in one shot.
    @pl.when(layer == 0)
    def _():
        x = x_ref[...]                                           # [B, S, F]
        xm = x.reshape(rows, x.shape[-1])
        emb = jnp.dot(xm, skelw_ref[...],
                      preferred_element_type=jnp.float32)        # [B*S, D]
        h_scr[...] = emb.reshape(b_tile, s_pad, d) + init_ref[...][None]

    hm = h_scr[...].reshape(rows, d)                             # [B*S, D]

    # ---- self-attention: batch-merged QKV projection (M = B*S) ----
    # 1/sqrt(hd) is already folded into the Q columns of wqkv / bqkv.
    qkv = jnp.dot(hm, wqkv_ref[0],
                  preferred_element_type=jnp.float32) + bqkv_ref[0]

    for b in range(b_tile):                                      # static unroll
        rs = slice(b * s_pad, (b + 1) * s_pad)
        qb = qkv[rs, 0:d]
        kb = qkv[rs, d:2 * d]
        vb = qkv[rs, 2 * d:3 * d]
        # key-padding mask broadcast hoisted out of the head loop
        negb = jnp.broadcast_to(neg_ref[b], (s_pad, s_pad))      # [S, S]
        for hh in range(num_heads):                              # static unroll
            cs = slice(hh * hd, (hh + 1) * hd)
            sc = jax.lax.dot_general(qb[:, cs], kb[:, cs],
                                     (((1,), (1,)), ((), ())),
                                     preferred_element_type=jnp.float32)
            sc = sc + negb
            sc = sc - jnp.max(sc, axis=-1, keepdims=True)
            p = jnp.exp(sc)
            p = p * pl.reciprocal(jnp.sum(p, axis=-1, keepdims=True),
                                  approx=True)
            # per-head context -> aligned head-major VMEM scratch (no concat)
            ctx_scr[hh, b] = jnp.dot(p, vb[:, cs],
                                     preferred_element_type=jnp.float32)

    # ---- output projection: M = B*S, per-head sublane-aligned weight rows ----
    wo_full = wo_ref[0]                                          # [D, D]
    attn = jnp.dot(ctx_scr[0].reshape(rows, hd), wo_full[0:hd, :],
                   preferred_element_type=jnp.float32)
    for hh in range(1, num_heads):
        attn = attn + jnp.dot(ctx_scr[hh].reshape(rows, hd),
                              wo_full[hh * hd:(hh + 1) * hd, :],
                              preferred_element_type=jnp.float32)
    attn = attn + bo_ref[0]

    x1 = _layernorm(hm + attn, g1_ref[0], be1_ref[0])

    # ---- feed-forward (batch-merged M = B*S) ----
    mid = _gelu(jnp.dot(x1, w1_ref[0],
                        preferred_element_type=jnp.float32) + bf1_ref[0])
    ffo = jnp.dot(mid, w2_ref[0],
                  preferred_element_type=jnp.float32) + bf2_ref[0]
    x2 = _layernorm(x1 + ffo, g2_ref[0], be2_ref[0])

    h_scr[...] = x2.reshape(b_tile, s_pad, d)

    @pl.when(layer == pl.num_programs(1) - 1)
    def _():
        mu_ref[...] = h_scr[:, 0:1, :]                           # [B, 1, D]


# ----------------------------------------------------------------------------
# Full Encoder_TRANSFORMER forward (eval mode)
# ----------------------------------------------------------------------------
def encoder_transformer_forward(params, x, y, mask, *, num_heads):
    """x: [bs, njoints, nfeats, nframes]; mask: [bs, nframes] bool (True=valid).
    Returns {'mu': [bs, latent_dim]}.  `y` is unused (module zeroes it)."""
    del y  # y - y == 0 in the reference module -> muQuery[0]/sigmaQuery[0]
    bs, njoints, nfeats, nframes = x.shape
    f_in = njoints * nfeats
    d = params["skel_wt"].shape[1]
    ff = params["layers"][0]["w1_t"].shape[1]
    n_layers = len(params["layers"])
    assert d % num_heads == 0
    hd = d // num_heads

    s_real = nframes + 2
    s_pad = ((s_real + 7) // 8) * 8          # pad S to a multiple of 8

    # ---- tiny host-side preprocessing ----
    x_bf = jnp.transpose(x, (0, 3, 1, 2)).reshape(bs, nframes, f_in)
    x_pad = jnp.zeros((bs, s_pad, f_in), jnp.float32)
    x_pad = x_pad.at[:, 2:2 + nframes, :].set(x_bf.astype(jnp.float32))

    pe = params["pe"]
    init_add = jnp.zeros((s_pad, d), jnp.float32)
    init_add = init_add.at[0].set(params["muQuery"][0] + pe[0])
    init_add = init_add.at[1].set(params["sigmaQuery"][0] + pe[1])
    init_add = init_add.at[2:2 + nframes].set(params["skel_b"]
                                              + pe[2:2 + nframes])

    maskseq = jnp.concatenate(
        [jnp.ones((bs, 2), bool), mask.astype(bool),
         jnp.zeros((bs, s_pad - s_real), bool)], axis=1)          # [bs, S_pad]
    neg = jnp.where(maskseq, 0.0, _NEG_INF).astype(jnp.float32)[:, None, :]

    # ---- stack per-layer weights along a leading layer axis ----
    def stk(name):
        return jnp.stack([lyr[name] for lyr in params["layers"]], axis=0)

    wqkv = stk("wqkv_t")
    bqkv = stk("bqkv")
    scale = 1.0 / math.sqrt(hd)              # fold attention scale into Q proj
    wqkv = wqkv.at[:, :, :d].multiply(scale)
    bqkv = bqkv.at[:, :, :d].multiply(scale)
    wo, bo = stk("wo_t"), stk("bo")
    g1, b1 = stk("ln1_g"), stk("ln1_b")
    w1, bf1 = stk("w1_t"), stk("b1")
    w2, bf2 = stk("w2_t"), stk("b2")
    g2, b2 = stk("ln2_g"), stk("ln2_b")

    # ---- batch tiling: merge batch rows into the matmul M dimension ----
    target_rows = 512
    b_target = max(1, min(bs, target_rows // s_pad))
    b_tile = max(dv for dv in range(1, b_target + 1) if bs % dv == 0)
    n_btiles = bs // b_tile

    kernel = functools.partial(_fused_encoder_kernel, num_heads=num_heads)

    out = pl.pallas_call(
        kernel,
        out_shape=jax.ShapeDtypeStruct((bs, 1, d), jnp.float32),
        grid=(n_btiles, n_layers),
        in_specs=[
            pl.BlockSpec((b_tile, s_pad, f_in), lambda b, l: (b, 0, 0)),  # x_pad
            pl.BlockSpec((b_tile, 1, s_pad), lambda b, l: (b, 0, 0)),     # neg
            pl.BlockSpec((s_pad, d), lambda b, l: (0, 0)),                # init_add
            pl.BlockSpec((f_in, d), lambda b, l: (0, 0)),                 # skel_wt
            pl.BlockSpec((1, d, 3 * d), lambda b, l: (l, 0, 0)),          # wqkv
            pl.BlockSpec((1, 1, 3 * d), lambda b, l: (l, 0, 0)),          # bqkv
            pl.BlockSpec((1, d, d), lambda b, l: (l, 0, 0)),              # wo
            pl.BlockSpec((1, 1, d), lambda b, l: (l, 0, 0)),              # bo
            pl.BlockSpec((1, 1, d), lambda b, l: (l, 0, 0)),              # ln1_g
            pl.BlockSpec((1, 1, d), lambda b, l: (l, 0, 0)),              # ln1_b
            pl.BlockSpec((1, d, ff), lambda b, l: (l, 0, 0)),             # w1
            pl.BlockSpec((1, 1, ff), lambda b, l: (l, 0, 0)),             # b1
            pl.BlockSpec((1, ff, d), lambda b, l: (l, 0, 0)),             # w2
            pl.BlockSpec((1, 1, d), lambda b, l: (l, 0, 0)),              # b2
            pl.BlockSpec((1, 1, d), lambda b, l: (l, 0, 0)),              # ln2_g
            pl.BlockSpec((1, 1, d), lambda b, l: (l, 0, 0)),              # ln2_b
        ],
        out_specs=pl.BlockSpec((b_tile, 1, d), lambda b, l: (b, 0, 0)),
        scratch_shapes=[
            pltpu.VMEM((b_tile, s_pad, d), jnp.float32),                  # resident h
            pltpu.VMEM((num_heads, b_tile, s_pad, hd), jnp.float32),      # per-head ctx
        ],
        compiler_params=pltpu.CompilerParams(
            dimension_semantics=("parallel", "arbitrary"),
            vmem_limit_bytes=64 * 1024 * 1024),
    )(x_pad, neg, init_add, params["skel_wt"],
      wqkv, bqkv, wo, bo, g1, b1, w1, bf1, w2, bf2, g2, b2)

    return {"mu": out[:, 0, :]}


# ----------------------------------------------------------------------------
# Pure-JAX reference (same math, no Pallas, no padding) for correctness check
# ----------------------------------------------------------------------------
def reference_forward(params, x, mask, *, num_heads):
    bs, njoints, nfeats, nframes = x.shape
    f_in = njoints * nfeats
    d = params["skel_wt"].shape[1]
    hd = d // num_heads
    pe = params["pe"]

    xf = jnp.transpose(x, (0, 3, 1, 2)).reshape(bs, nframes, f_in)
    emb = xf @ params["skel_wt"] + params["skel_b"] + pe[2:2 + nframes][None]
    mu_tok = params["muQuery"][0] + pe[0]
    sig_tok = params["sigmaQuery"][0] + pe[1]
    tok = jnp.broadcast_to(jnp.stack([mu_tok, sig_tok], 0)[None], (bs, 2, d))
    h = jnp.concatenate([tok, emb], axis=1)
    s_len = nframes + 2

    maskseq = jnp.concatenate([jnp.ones((bs, 2), bool), mask.astype(bool)], 1)
    neg = jnp.where(maskseq, 0.0, _NEG_INF)[:, None, None, :]    # [bs,1,1,S]

    for layer in params["layers"]:
        qkv = h @ layer["wqkv_t"] + layer["bqkv"]
        q, k, v = jnp.split(qkv, 3, axis=-1)
        q = q.reshape(bs, s_len, num_heads, hd).transpose(0, 2, 1, 3)
        k = k.reshape(bs, s_len, num_heads, hd).transpose(0, 2, 1, 3)
        v = v.reshape(bs, s_len, num_heads, hd).transpose(0, 2, 1, 3)
        sc = jnp.einsum("bhqd,bhkd->bhqk", q, k) / math.sqrt(hd) + neg
        p = jax.nn.softmax(sc, axis=-1)
        ctx = jnp.einsum("bhqk,bhkd->bhqd", p, v)
        ctx = ctx.transpose(0, 2, 1, 3).reshape(bs, s_len, d)
        attn = ctx @ layer["wo_t"] + layer["bo"]
        h = _layernorm(h + attn, layer["ln1_g"], layer["ln1_b"])
        mid = _gelu(h @ layer["w1_t"] + layer["b1"])
        ffo = mid @ layer["w2_t"] + layer["b2"]
        h = _layernorm(h + ffo, layer["ln2_g"], layer["ln2_b"])
    return h[:, 0, :]


# ----------------------------------------------------------------------------
# Demo / self-check
# ----------------------------------------------------------------------------
if __name__ == "__main__":
    bs, njoints, nfeats, nframes = 2, 6, 4, 8
    latent_dim, ff_size, num_layers, num_heads = 128, 256, 2, 4

    key = jax.random.PRNGKey(0)
    kx, kp = jax.random.split(key)
    params = init_params(kp, njoints, nfeats, latent_dim, ff_size, num_layers)

    x = jax.random.normal(kx, (bs, njoints, nfeats, nframes), jnp.float32)
    y = jnp.zeros((bs,), jnp.int32)
    lengths = jnp.array([nframes, nframes - 3], jnp.int32)
    mask = jnp.arange(nframes)[None, :] < lengths[:, None]        # [bs, nframes]

    out = encoder_transformer_forward(params, x, y, mask, num_heads=num_heads)
    mu = jax.block_until_ready(out["mu"])

    mu_ref = reference_forward(params, x, mask, num_heads=num_heads)
    assert mu.shape == (bs, latent_dim) and mu.dtype == jnp.float32
    assert bool(jnp.all(jnp.isfinite(mu)))
    max_err = float(jnp.max(jnp.abs(mu - mu_ref)))
    assert jnp.allclose(mu, mu_ref, atol=1e-2, rtol=1e-2), f"mismatch {max_err}"

    print("KERNEL_OK")
</pallas_src>

<mosaic_0001>
module attributes {stable_mosaic.version = 11 : i64} {
  func.func @_fused_encoder_kernel(%arg0: i32, %arg1: i32, %arg2: memref<2x16x24xf32, #tpu.memory_space<vmem>>, %arg3: memref<2x1x16xf32, #tpu.memory_space<vmem>>, %arg4: memref<16x128xf32, #tpu.memory_space<vmem>>, %arg5: memref<24x128xf32, #tpu.memory_space<vmem>>, %arg6: memref<1x128x384xf32, #tpu.memory_space<vmem>>, %arg7: memref<1x1x384xf32, #tpu.memory_space<vmem>>, %arg8: memref<1x128x128xf32, #tpu.memory_space<vmem>>, %arg9: memref<1x1x128xf32, #tpu.memory_space<vmem>>, %arg10: memref<1x1x128xf32, #tpu.memory_space<vmem>>, %arg11: memref<1x1x128xf32, #tpu.memory_space<vmem>>, %arg12: memref<1x128x256xf32, #tpu.memory_space<vmem>>, %arg13: memref<1x1x256xf32, #tpu.memory_space<vmem>>, %arg14: memref<1x256x128xf32, #tpu.memory_space<vmem>>, %arg15: memref<1x1x128xf32, #tpu.memory_space<vmem>>, %arg16: memref<1x1x128xf32, #tpu.memory_space<vmem>>, %arg17: memref<1x1x128xf32, #tpu.memory_space<vmem>>, %arg18: memref<2x1x128xf32, #tpu.memory_space<vmem>>, %arg19: memref<2x16x128xf32, #tpu.memory_space<vmem>>, %arg20: memref<4x2x16x32xf32, #tpu.memory_space<vmem>>) attributes {dimension_semantics = [#tpu.dimension_semantics<parallel>, #tpu.dimension_semantics<arbitrary>], iteration_bounds = array<i64: 1, 2>, scalar_prefetch = 0 : i64, scratch_operands = 2 : i64, tpu.core_type = #tpu.core_type<tc>, window_params = [{transform_indices = @transform_0, window_bounds = array<i64: 2, 16, 24>}, {transform_indices = @transform_1, window_bounds = array<i64: 2, 1, 16>}, {pipeline_mode = #tpu.pipeline_mode<synchronous>, transform_indices = @transform_2, window_bounds = array<i64: 16, 128>}, {pipeline_mode = #tpu.pipeline_mode<synchronous>, transform_indices = @transform_3, window_bounds = array<i64: 24, 128>}, {transform_indices = @transform_4, window_bounds = array<i64: 1, 128, 384>}, {transform_indices = @transform_5, window_bounds = array<i64: 1, 1, 384>}, {transform_indices = @transform_6, window_bounds = array<i64: 1, 128, 128>}, {transform_indices = @transform_7, window_bounds = array<i64: 1, 1, 128>}, {transform_indices = @transform_8, window_bounds = array<i64: 1, 1, 128>}, {transform_indices = @transform_9, window_bounds = array<i64: 1, 1, 128>}, {transform_indices = @transform_10, window_bounds = array<i64: 1, 128, 256>}, {transform_indices = @transform_11, window_bounds = array<i64: 1, 1, 256>}, {transform_indices = @transform_12, window_bounds = array<i64: 1, 256, 128>}, {transform_indices = @transform_13, window_bounds = array<i64: 1, 1, 128>}, {transform_indices = @transform_14, window_bounds = array<i64: 1, 1, 128>}, {transform_indices = @transform_15, window_bounds = array<i64: 1, 1, 128>}, {transform_indices = @transform_16, window_bounds = array<i64: 2, 1, 128>}]} {
    %c0_i32 = arith.constant 0 : i32
    %0 = arith.cmpi eq, %arg1, %c0_i32 : i32
    %1 = arith.extui %0 : i1 to i32
    %c0_i32_0 = arith.constant 0 : i32
    %2 = arith.cmpi ne, %1, %c0_i32_0 : i32
    scf.if %2 {
      %c0_146 = arith.constant 0 : index
      %c0_147 = arith.constant 0 : index
      %c0_148 = arith.constant 0 : index
      %289 = vector.load %arg2[%c0_146, %c0_147, %c0_148] : memref<2x16x24xf32, #tpu.memory_space<vmem>>, vector<2x16x24xf32>
      %290 = vector.shape_cast %289 : vector<2x16x24xf32> to vector<32x24xf32>
      %c0_149 = arith.constant 0 : index
      %c0_150 = arith.constant 0 : index
      %291 = vector.load %arg5[%c0_149, %c0_150] : memref<24x128xf32, #tpu.memory_space<vmem>>, vector<24x128xf32>
      %cst_151 = arith.constant dense<0.000000e+00> : vector<32x128xf32>
      %292 = tpu.matmul %290, %291, %cst_151 {dimension_numbers = #tpu.dot_dimension_numbers<[1], [0], [0], [1], [0, 0, 1, 1], [], []>} : vector<32x24xf32>, vector<24x128xf32>, vector<32x128xf32> -> vector<32x128xf32>
      %293 = vector.shape_cast %292 : vector<32x128xf32> to vector<2x16x128xf32>
      %c0_152 = arith.constant 0 : index
      %c0_153 = arith.constant 0 : index
      %294 = vector.load %arg4[%c0_152, %c0_153] : memref<16x128xf32, #tpu.memory_space<vmem>>, vector<16x128xf32>
      %295 = vector.shape_cast %294 : vector<16x128xf32> to vector<1x16x128xf32>
      %296 = vector.broadcast %295 : vector<1x16x128xf32> to vector<2x16x128xf32>
      %297 = arith.addf %293, %296 : vector<2x16x128xf32>
      %c0_154 = arith.constant 0 : index
      %c0_155 = arith.constant 0 : index
      %c0_156 = arith.constant 0 : index
      %298 = vector.load %arg19[%c0_154, %c0_155, %c0_156] : memref<2x16x128xf32, #tpu.memory_space<vmem>>, vector<2x16x128xf32>
      tpu.vector_store %arg19[%c0_154, %c0_155, %c0_156], %297 {strides = array<i32>} : memref<2x16x128xf32, #tpu.memory_space<vmem>>, vector<2x16x128xf32>,
    } else {
    }
    %c0 = arith.constant 0 : index
    %c0_1 = arith.constant 0 : index
    %c0_2 = arith.constant 0 : index
    %3 = vector.load %arg19[%c0, %c0_1, %c0_2] : memref<2x16x128xf32, #tpu.memory_space<vmem>>, vector<2x16x128xf32>
    %4 = vector.shape_cast %3 : vector<2x16x128xf32> to vector<32x128xf32>
    %c0_3 = arith.constant 0 : index
    %c0_4 = arith.constant 0 : index
    %c0_5 = arith.constant 0 : index
    %5 = vector.load %arg6[%c0_3, %c0_4, %c0_5] : memref<1x128x384xf32, #tpu.memory_space<vmem>>, vector<1x128x384xf32>
    %6 = vector.shape_cast %5 : vector<1x128x384xf32> to vector<128x384xf32>
    %cst = arith.constant dense<0.000000e+00> : vector<32x384xf32>
    %7 = tpu.matmul %4, %6, %cst {dimension_numbers = #tpu.dot_dimension_numbers<[1], [0], [0], [1], [0, 0, 1, 1], [], []>} : vector<32x128xf32>, vector<128x384xf32>, vector<32x384xf32> -> vector<32x384xf32>
    %c0_6 = arith.constant 0 : index
    %c0_7 = arith.constant 0 : index
    %c0_8 = arith.constant 0 : index
    %8 = vector.load %arg7[%c0_6, %c0_7, %c0_8] : memref<1x1x384xf32, #tpu.memory_space<vmem>>, vector<1x1x384xf32>
    %9 = vector.shape_cast %8 : vector<1x1x384xf32> to vector<1x384xf32>
    %10 = vector.broadcast %9 : vector<1x384xf32> to vector<32x384xf32>
    %11 = arith.addf %7, %10 : vector<32x384xf32>
    %12 = vector.extract_strided_slice %11 {offsets = [0, 0], sizes = [16, 128], strides = [1, 1]} : vector<32x384xf32> to vector<16x128xf32>
    %13 = vector.extract_strided_slice %11 {offsets = [0, 128], sizes = [16, 128], strides = [1, 1]} : vector<32x384xf32> to vector<16x128xf32>
    %14 = vector.extract_strided_slice %11 {offsets = [0, 256], sizes = [16, 128], strides = [1, 1]} : vector<32x384xf32> to vector<16x128xf32>
    %c0_9 = arith.constant 0 : index
    %c0_10 = arith.constant 0 : index
    %c0_11 = arith.constant 0 : index
    %15 = vector.load %arg3[%c0_9, %c0_10, %c0_11] : memref<2x1x16xf32, #tpu.memory_space<vmem>>, vector<1x1x16xf32>
    %16 = vector.shape_cast %15 : vector<1x1x16xf32> to vector<1x16xf32>
    %17 = vector.shape_cast %16 : vector<1x16xf32> to vector<1x16xf32>
    %18 = vector.broadcast %17 : vector<1x16xf32> to vector<16x16xf32>
    %19 = vector.extract_strided_slice %12 {offsets = [0, 0], sizes = [16, 32], strides = [1, 1]} : vector<16x128xf32> to vector<16x32xf32>
    %20 = vector.extract_strided_slice %13 {offsets = [0, 0], sizes = [16, 32], strides = [1, 1]} : vector<16x128xf32> to vector<16x32xf32>
    %cst_12 = arith.constant dense<0.000000e+00> : vector<16x16xf32>
    %21 = tpu.matmul %19, %20, %cst_12 {dimension_numbers = #tpu.dot_dimension_numbers<[1], [1], [0], [0], [0, 0, 1, 0], [], []>} : vector<16x32xf32>, vector<16x32xf32>, vector<16x16xf32> -> vector<16x16xf32>
    %22 = arith.addf %21, %18 : vector<16x16xf32>
    %cst_13 = arith.constant dense<0xFF800000> : vector<16xf32>
    %23 = vector.multi_reduction <maximumf>, %22, %cst_13 [1] : vector<16x16xf32> to vector<16xf32>
    %24 = vector.shape_cast %23 : vector<16xf32> to vector<16x1xf32>
    %25 = vector.broadcast %24 : vector<16x1xf32> to vector<16x16xf32>
    %26 = arith.subf %22, %25 : vector<16x16xf32>
    %27 = math.exp %26 : vector<16x16xf32>
    %cst_14 = arith.constant dense<0.000000e+00> : vector<16xf32>
    %28 = vector.multi_reduction <add>, %27, %cst_14 [1] : vector<16x16xf32> to vector<16xf32>
    %29 = vector.shape_cast %28 : vector<16xf32> to vector<16x1xf32>
    %30 = tpu.reciprocal %29 {approx = true} : vector<16x1xf32> -> vector<16x1xf32>
    %31 = vector.broadcast %30 : vector<16x1xf32> to vector<16x16xf32>
    %32 = arith.mulf %27, %31 : vector<16x16xf32>
    %33 = vector.extract_strided_slice %14 {offsets = [0, 0], sizes = [16, 32], strides = [1, 1]} : vector<16x128xf32> to vector<16x32xf32>
    %cst_15 = arith.constant dense<0.000000e+00> : vector<16x32xf32>
    %34 = tpu.matmul %32, %33, %cst_15 {dimension_numbers = #tpu.dot_dimension_numbers<[1], [0], [0], [1], [0, 0, 1, 1], [], []>} : vector<16x16xf32>, vector<16x32xf32>, vector<16x32xf32> -> vector<16x32xf32>
    %c0_16 = arith.constant 0 : index
    %c0_17 = arith.constant 0 : index
    %c0_18 = arith.constant 0 : index
    %c0_19 = arith.constant 0 : index
    %35 = vector.load %arg20[%c0_16, %c0_17, %c0_18, %c0_19] : memref<4x2x16x32xf32, #tpu.memory_space<vmem>>, vector<1x1x16x32xf32>
    %36 = vector.shape_cast %35 : vector<1x1x16x32xf32> to vector<16x32xf32>
    %37 = vector.shape_cast %34 : vector<16x32xf32> to vector<1x1x16x32xf32>
    tpu.vector_store %arg20[%c0_16, %c0_17, %c0_18, %c0_19], %37 {strides = array<i32>} : memref<4x2x16x32xf32, #tpu.memory_space<vmem>>, vector<1x1x16x32xf32>,
    %38 = vector.extract_strided_slice %12 {offsets = [0, 32], sizes = [16, 32], strides = [1, 1]} : vector<16x128xf32> to vector<16x32xf32>
    %39 = vector.extract_strided_slice %13 {offsets = [0, 32], sizes = [16, 32], strides = [1, 1]} : vector<16x128xf32> to vector<16x32xf32>
    %cst_20 = arith.constant dense<0.000000e+00> : vector<16x16xf32>
    %40 = tpu.matmul %38, %39, %cst_20 {dimension_numbers = #tpu.dot_dimension_numbers<[1], [1], [0], [0], [0, 0, 1, 0], [], []>} : vector<16x32xf32>, vector<16x32xf32>, vector<16x16xf32> -> vector<16x16xf32>
    %41 = arith.addf %40, %18 : vector<16x16xf32>
    %cst_21 = arith.constant dense<0xFF800000> : vector<16xf32>
    %42 = vector.multi_reduction <maximumf>, %41, %cst_21 [1] : vector<16x16xf32> to vector<16xf32>
    %43 = vector.shape_cast %42 : vector<16xf32> to vector<16x1xf32>
    %44 = vector.broadcast %43 : vector<16x1xf32> to vector<16x16xf32>
    %45 = arith.subf %41, %44 : vector<16x16xf32>
    %46 = math.exp %45 : vector<16x16xf32>
    %cst_22 = arith.constant dense<0.000000e+00> : vector<16xf32>
    %47 = vector.multi_reduction <add>, %46, %cst_22 [1] : vector<16x16xf32> to vector<16xf32>
    %48 = vector.shape_cast %47 : vector<16xf32> to vector<16x1xf32>
    %49 = tpu.reciprocal %48 {approx = true} : vector<16x1xf32> -> vector<16x1xf32>
    %50 = vector.broadcast %49 : vector<16x1xf32> to vector<16x16xf32>
    %51 = arith.mulf %46, %50 : vector<16x16xf32>
    %52 = vector.extract_strided_slice %14 {offsets = [0, 32], sizes = [16, 32], strides = [1, 1]} : vector<16x128xf32> to vector<16x32xf32>
    %cst_23 = arith.constant dense<0.000000e+00> : vector<16x32xf32>
    %53 = tpu.matmul %51, %52, %cst_23 {dimension_numbers = #tpu.dot_dimension_numbers<[1], [0], [0], [1], [0, 0, 1, 1], [], []>} : vector<16x16xf32>, vector<16x32xf32>, vector<16x32xf32> -> vector<16x32xf32>
    %c1 = arith.constant 1 : index
    %c0_24 = arith.constant 0 : index
    %c0_25 = arith.constant 0 : index
    %c0_26 = arith.constant 0 : index
    %54 = vector.load %arg20[%c1, %c0_24, %c0_25, %c0_26] : memref<4x2x16x32xf32, #tpu.memory_space<vmem>>, vector<1x1x16x32xf32>
    %55 = vector.shape_cast %54 : vector<1x1x16x32xf32> to vector<16x32xf32>
    %56 = vector.shape_cast %53 : vector<16x32xf32> to vector<1x1x16x32xf32>
    tpu.vector_store %arg20[%c1, %c0_24, %c0_25, %c0_26], %56 {strides = array<i32>} : memref<4x2x16x32xf32, #tpu.memory_space<vmem>>, vector<1x1x16x32xf32>,
    %57 = vector.extract_strided_slice %12 {offsets = [0, 64], sizes = [16, 32], strides = [1, 1]} : vector<16x128xf32> to vector<16x32xf32>
    %58 = vector.extract_strided_slice %13 {offsets = [0, 64], sizes = [16, 32], strides = [1, 1]} : vector<16x128xf32> to vector<16x32xf32>
    %cst_27 = arith.constant dense<0.000000e+00> : vector<16x16xf32>
    %59 = tpu.matmul %57, %58, %cst_27 {dimension_numbers = #tpu.dot_dimension_numbers<[1], [1], [0], [0], [0, 0, 1, 0], [], []>} : vector<16x32xf32>, vector<16x32xf32>, vector<16x16xf32> -> vector<16x16xf32>
    %60 = arith.addf %59, %18 : vector<16x16xf32>
    %cst_28 = arith.constant dense<0xFF800000> : vector<16xf32>
    %61 = vector.multi_reduction <maximumf>, %60, %cst_28 [1] : vector<16x16xf32> to vector<16xf32>
    %62 = vector.shape_cast %61 : vector<16xf32> to vector<16x1xf32>
    %63 = vector.broadcast %62 : vector<16x1xf32> to vector<16x16xf32>
    %64 = arith.subf %60, %63 : vector<16x16xf32>
    %65 = math.exp %64 : vector<16x16xf32>
    %cst_29 = arith.constant dense<0.000000e+00> : vector<16xf32>
    %66 = vector.multi_reduction <add>, %65, %cst_29 [1] : vector<16x16xf32> to vector<16xf32>
    %67 = vector.shape_cast %66 : vector<16xf32> to vector<16x1xf32>
    %68 = tpu.reciprocal %67 {approx = true} : vector<16x1xf32> -> vector<16x1xf32>
    %69 = vector.broadcast %68 : vector<16x1xf32> to vector<16x16xf32>
    %70 = arith.mulf %65, %69 : vector<16x16xf32>
    %71 = vector.extract_strided_slice %14 {offsets = [0, 64], sizes = [16, 32], strides = [1, 1]} : vector<16x128xf32> to vector<16x32xf32>
    %cst_30 = arith.constant dense<0.000000e+00> : vector<16x32xf32>
    %72 = tpu.matmul %70, %71, %cst_30 {dimension_numbers = #tpu.dot_dimension_numbers<[1], [0], [0], [1], [0, 0, 1, 1], [], []>} : vector<16x16xf32>, vector<16x32xf32>, vector<16x32xf32> -> vector<16x32xf32>
    %c2 = arith.constant 2 : index
    %c0_31 = arith.constant 0 : index
    %c0_32 = arith.constant 0 : index
    %c0_33 = arith.constant 0 : index
    %73 = vector.load %arg20[%c2, %c0_31, %c0_32, %c0_33] : memref<4x2x16x32xf32, #tpu.memory_space<vmem>>, vector<1x1x16x32xf32>
    %74 = vector.shape_cast %73 : vector<1x1x16x32xf32> to vector<16x32xf32>
    %75 = vector.shape_cast %72 : vector<16x32xf32> to vector<1x1x16x32xf32>
    tpu.vector_store %arg20[%c2, %c0_31, %c0_32, %c0_33], %75 {strides = array<i32>} : memref<4x2x16x32xf32, #tpu.memory_space<vmem>>, vector<1x1x16x32xf32>,
    %76 = vector.extract_strided_slice %12 {offsets = [0, 96], sizes = [16, 32], strides = [1, 1]} : vector<16x128xf32> to vector<16x32xf32>
    %77 = vector.extract_strided_slice %13 {offsets = [0, 96], sizes = [16, 32], strides = [1, 1]} : vector<16x128xf32> to vector<16x32xf32>
    %cst_34 = arith.constant dense<0.000000e+00> : vector<16x16xf32>
    %78 = tpu.matmul %76, %77, %cst_34 {dimension_numbers = #tpu.dot_dimension_numbers<[1], [1], [0], [0], [0, 0, 1, 0], [], []>} : vector<16x32xf32>, vector<16x32xf32>, vector<16x16xf32> -> vector<16x16xf32>
    %79 = arith.addf %78, %18 : vector<16x16xf32>
    %cst_35 = arith.constant dense<0xFF800000> : vector<16xf32>
    %80 = vector.multi_reduction <maximumf>, %79, %cst_35 [1] : vector<16x16xf32> to vector<16xf32>
    %81 = vector.shape_cast %80 : vector<16xf32> to vector<16x1xf32>
    %82 = vector.broadcast %81 : vector<16x1xf32> to vector<16x16xf32>
    %83 = arith.subf %79, %82 : vector<16x16xf32>
    %84 = math.exp %83 : vector<16x16xf32>
    %cst_36 = arith.constant dense<0.000000e+00> : vector<16xf32>
    %85 = vector.multi_reduction <add>, %84, %cst_36 [1] : vector<16x16xf32> to vector<16xf32>
    %86 = vector.shape_cast %85 : vector<16xf32> to vector<16x1xf32>
    %87 = tpu.reciprocal %86 {approx = true} : vector<16x1xf32> -> vector<16x1xf32>
    %88 = vector.broadcast %87 : vector<16x1xf32> to vector<16x16xf32>
    %89 = arith.mulf %84, %88 : vector<16x16xf32>
    %90 = vector.extract_strided_slice %14 {offsets = [0, 96], sizes = [16, 32], strides = [1, 1]} : vector<16x128xf32> to vector<16x32xf32>
    %cst_37 = arith.constant dense<0.000000e+00> : vector<16x32xf32>
    %91 = tpu.matmul %89, %90, %cst_37 {dimension_numbers = #tpu.dot_dimension_numbers<[1], [0], [0], [1], [0, 0, 1, 1], [], []>} : vector<16x16xf32>, vector<16x32xf32>, vector<16x32xf32> -> vector<16x32xf32>
    %c3 = arith.constant 3 : index
    %c0_38 = arith.constant 0 : index
    %c0_39 = arith.constant 0 : index
    %c0_40 = arith.constant 0 : index
    %92 = vector.load %arg20[%c3, %c0_38, %c0_39, %c0_40] : memref<4x2x16x32xf32, #tpu.memory_space<vmem>>, vector<1x1x16x32xf32>
    %93 = vector.shape_cast %92 : vector<1x1x16x32xf32> to vector<16x32xf32>
    %94 = vector.shape_cast %91 : vector<16x32xf32> to vector<1x1x16x32xf32>
    tpu.vector_store %arg20[%c3, %c0_38, %c0_39, %c0_40], %94 {strides = array<i32>} : memref<4x2x16x32xf32, #tpu.memory_space<vmem>>, vector<1x1x16x32xf32>,
    %95 = vector.extract_strided_slice %11 {offsets = [16, 0], sizes = [16, 128], strides = [1, 1]} : vector<32x384xf32> to vector<16x128xf32>
    %96 = vector.extract_strided_slice %11 {offsets = [16, 128], sizes = [16, 128], strides = [1, 1]} : vector<32x384xf32> to vector<16x128xf32>
    %97 = vector.extract_strided_slice %11 {offsets = [16, 256], sizes = [16, 128], strides = [1, 1]} : vector<32x384xf32> to vector<16x128xf32>
    %c1_41 = arith.constant 1 : index
    %c0_42 = arith.constant 0 : index
    %c0_43 = arith.constant 0 : index
    %98 = vector.load %arg3[%c1_41, %c0_42, %c0_43] : memref<2x1x16xf32, #tpu.memory_space<vmem>>, vector<1x1x16xf32>
    %99 = vector.shape_cast %98 : vector<1x1x16xf32> to vector<1x16xf32>
    %100 = vector.shape_cast %99 : vector<1x16xf32> to vector<1x16xf32>
    %101 = vector.broadcast %100 : vector<1x16xf32> to vector<16x16xf32>
    %102 = vector.extract_strided_slice %95 {offsets = [0, 0], sizes = [16, 32], strides = [1, 1]} : vector<16x128xf32> to vector<16x32xf32>
    %103 = vector.extract_strided_slice %96 {offsets = [0, 0], sizes = [16, 32], strides = [1, 1]} : vector<16x128xf32> to vector<16x32xf32>
    %cst_44 = arith.constant dense<0.000000e+00> : vector<16x16xf32>
    %104 = tpu.matmul %102, %103, %cst_44 {dimension_numbers = #tpu.dot_dimension_numbers<[1], [1], [0], [0], [0, 0, 1, 0], [], []>} : vector<16x32xf32>, vector<16x32xf32>, vector<16x16xf32> -> vector<16x16xf32>
    %105 = arith.addf %104, %101 : vector<16x16xf32>
    %cst_45 = arith.constant dense<0xFF800000> : vector<16xf32>
    %106 = vector.multi_reduction <maximumf>, %105, %cst_45 [1] : vector<16x16xf32> to vector<16xf32>
    %107 = vector.shape_cast %106 : vector<16xf32> to vector<16x1xf32>
    %108 = vector.broadcast %107 : vector<16x1xf32> to vector<16x16xf32>
    %109 = arith.subf %105, %108 : vector<16x16xf32>
    %110 = math.exp %109 : vector<16x16xf32>
    %cst_46 = arith.constant dense<0.000000e+00> : vector<16xf32>
    %111 = vector.multi_reduction <add>, %110, %cst_46 [1] : vector<16x16xf32> to vector<16xf32>
    %112 = vector.shape_cast %111 : vector<16xf32> to vector<16x1xf32>
    %113 = tpu.reciprocal %112 {approx = true} : vector<16x1xf32> -> vector<16x1xf32>
    %114 = vector.broadcast %113 : vector<16x1xf32> to vector<16x16xf32>
    %115 = arith.mulf %110, %114 : vector<16x16xf32>
    %116 = vector.extract_strided_slice %97 {offsets = [0, 0], sizes = [16, 32], strides = [1, 1]} : vector<16x128xf32> to vector<16x32xf32>
    %cst_47 = arith.constant dense<0.000000e+00> : vector<16x32xf32>
    %117 = tpu.matmul %115, %116, %cst_47 {dimension_numbers = #tpu.dot_dimension_numbers<[1], [0], [0], [1], [0, 0, 1, 1], [], []>} : vector<16x16xf32>, vector<16x32xf32>, vector<16x32xf32> -> vector<16x32xf32>
    %c0_48 = arith.constant 0 : index
    %c1_49 = arith.constant 1 : index
    %c0_50 = arith.constant 0 : index
    %c0_51 = arith.constant 0 : index
    %118 = vector.load %arg20[%c0_48, %c1_49, %c0_50, %c0_51] : memref<4x2x16x32xf32, #tpu.memory_space<vmem>>, vector<1x1x16x32xf32>
    %119 = vector.shape_cast %118 : vector<1x1x16x32xf32> to vector<16x32xf32>
    %120 = vector.shape_cast %117 : vector<16x32xf32> to vector<1x1x16x32xf32>
    tpu.vector_store %arg20[%c0_48, %c1_49, %c0_50, %c0_51], %120 {strides = array<i32>} : memref<4x2x16x32xf32, #tpu.memory_space<vmem>>, vector<1x1x16x32xf32>,
    %121 = vector.extract_strided_slice %95 {offsets = [0, 32], sizes = [16, 32], strides = [1, 1]} : vector<16x128xf32> to vector<16x32xf32>
    %122 = vector.extract_strided_slice %96 {offsets = [0, 32], sizes = [16, 32], strides = [1, 1]} : vector<16x128xf32> to vector<16x32xf32>
    %cst_52 = arith.constant dense<0.000000e+00> : vector<16x16xf32>
    %123 = tpu.matmul %121, %122, %cst_52 {dimension_numbers = #tpu.dot_dimension_numbers<[1], [1], [0], [0], [0, 0, 1, 0], [], []>} : vector<16x32xf32>, vector<16x32xf32>, vector<16x16xf32> -> vector<16x16xf32>
    %124 = arith.addf %123, %101 : vector<16x16xf32>
    %cst_53 = arith.constant dense<0xFF800000> : vector<16xf32>
    %125 = vector.multi_reduction <maximumf>, %124, %cst_53 [1] : vector<16x16xf32> to vector<16xf32>
    %126 = vector.shape_cast %125 : vector<16xf32> to vector<16x1xf32>
    %127 = vector.broadcast %126 : vector<16x1xf32> to vector<16x16xf32>
    %128 = arith.subf %124, %127 : vector<16x16xf32>
    %129 = math.exp %128 : vector<16x16xf32>
    %cst_54 = arith.constant dense<0.000000e+00> : vector<16xf32>
    %130 = vector.multi_reduction <add>, %129, %cst_54 [1] : vector<16x16xf32> to vector<16xf32>
    %131 = vector.shape_cast %130 : vector<16xf32> to vector<16x1xf32>
    %132 = tpu.reciprocal %131 {approx = true} : vector<16x1xf32> -> vector<16x1xf32>
    %133 = vector.broadcast %132 : vector<16x1xf32> to vector<16x16xf32>
    %134 = arith.mulf %129, %133 : vector<16x16xf32>
    %135 = vector.extract_strided_slice %97 {offsets = [0, 32], sizes = [16, 32], strides = [1, 1]} : vector<16x128xf32> to vector<16x32xf32>
    %cst_55 = arith.constant dense<0.000000e+00> : vector<16x32xf32>
    %136 = tpu.matmul %134, %135, %cst_55 {dimension_numbers = #tpu.dot_dimension_numbers<[1], [0], [0], [1], [0, 0, 1, 1], [], []>} : vector<16x16xf32>, vector<16x32xf32>, vector<16x32xf32> -> vector<16x32xf32>
    %c1_56 = arith.constant 1 : index
    %c1_57 = arith.constant 1 : index
    %c0_58 = arith.constant 0 : index
    %c0_59 = arith.constant 0 : index
    %137 = vector.load %arg20[%c1_56, %c1_57, %c0_58, %c0_59] : memref<4x2x16x32xf32, #tpu.memory_space<vmem>>, vector<1x1x16x32xf32>
    %138 = vector.shape_cast %137 : vector<1x1x16x32xf32> to vector<16x32xf32>
    %139 = vector.shape_cast %136 : vector<16x32xf32> to vector<1x1x16x32xf32>
    tpu.vector_store %arg20[%c1_56, %c1_57, %c0_58, %c0_59], %139 {strides = array<i32>} : memref<4x2x16x32xf32, #tpu.memory_space<vmem>>, vector<1x1x16x32xf32>,
    %140 = vector.extract_strided_slice %95 {offsets = [0, 64], sizes = [16, 32], strides = [1, 1]} : vector<16x128xf32> to vector<16x32xf32>
    %141 = vector.extract_strided_slice %96 {offsets = [0, 64], sizes = [16, 32], strides = [1, 1]} : vector<16x128xf32> to vector<16x32xf32>
    %cst_60 = arith.constant dense<0.000000e+00> : vector<16x16xf32>
    %142 = tpu.matmul %140, %141, %cst_60 {dimension_numbers = #tpu.dot_dimension_numbers<[1], [1], [0], [0], [0, 0, 1, 0], [], []>} : vector<16x32xf32>, vector<16x32xf32>, vector<16x16xf32> -> vector<16x16xf32>
    %143 = arith.addf %142, %101 : vector<16x16xf32>
    %cst_61 = arith.constant dense<0xFF800000> : vector<16xf32>
    %144 = vector.multi_reduction <maximumf>, %143, %cst_61 [1] : vector<16x16xf32> to vector<16xf32>
    %145 = vector.shape_cast %144 : vector<16xf32> to vector<16x1xf32>
    %146 = vector.broadcast %145 : vector<16x1xf32> to vector<16x16xf32>
    %147 = arith.subf %143, %146 : vector<16x16xf32>
    %148 = math.exp %147 : vector<16x16xf32>
    %cst_62 = arith.constant dense<0.000000e+00> : vector<16xf32>
    %149 = vector.multi_reduction <add>, %148, %cst_62 [1] : vector<16x16xf32> to vector<16xf32>
    %150 = vector.shape_cast %149 : vector<16xf32> to vector<16x1xf32>
    %151 = tpu.reciprocal %150 {approx = true} : vector<16x1xf32> -> vector<16x1xf32>
    %152 = vector.broadcast %151 : vector<16x1xf32> to vector<16x16xf32>
    %153 = arith.mulf %148, %152 : vector<16x16xf32>
    %154 = vector.extract_strided_slice %97 {offsets = [0, 64], sizes = [16, 32], strides = [1, 1]} : vector<16x128xf32> to vector<16x32xf32>
    %cst_63 = arith.constant dense<0.000000e+00> : vector<16x32xf32>
    %155 = tpu.matmul %153, %154, %cst_63 {dimension_numbers = #tpu.dot_dimension_numbers<[1], [0], [0], [1], [0, 0, 1, 1], [], []>} : vector<16x16xf32>, vector<16x32xf32>, vector<16x32xf32> -> vector<16x32xf32>
    %c2_64 = arith.constant 2 : index
    %c1_65 = arith.constant 1 : index
    %c0_66 = arith.constant 0 : index
    %c0_67 = arith.constant 0 : index
    %156 = vector.load %arg20[%c2_64, %c1_65, %c0_66, %c0_67] : memref<4x2x16x32xf32, #tpu.memory_space<vmem>>, vector<1x1x16x32xf32>
    %157 = vector.shape_cast %156 : vector<1x1x16x32xf32> to vector<16x32xf32>
    %158 = vector.shape_cast %155 : vector<16x32xf32> to vector<1x1x16x32xf32>
    tpu.vector_store %arg20[%c2_64, %c1_65, %c0_66, %c0_67], %158 {strides = array<i32>} : memref<4x2x16x32xf32, #tpu.memory_space<vmem>>, vector<1x1x16x32xf32>,
    %159 = vector.extract_strided_slice %95 {offsets = [0, 96], sizes = [16, 32], strides = [1, 1]} : vector<16x128xf32> to vector<16x32xf32>
    %160 = vector.extract_strided_slice %96 {offsets = [0, 96], sizes = [16, 32], strides = [1, 1]} : vector<16x128xf32> to vector<16x32xf32>
    %cst_68 = arith.constant dense<0.000000e+00> : vector<16x16xf32>
    %161 = tpu.matmul %159, %160, %cst_68 {dimension_numbers = #tpu.dot_dimension_numbers<[1], [1], [0], [0], [0, 0, 1, 0], [], []>} : vector<16x32xf32>, vector<16x32xf32>, vector<16x16xf32> -> vector<16x16xf32>
    %162 = arith.addf %161, %101 : vector<16x16xf32>
    %cst_69 = arith.constant dense<0xFF800000> : vector<16xf32>
    %163 = vector.multi_reduction <maximumf>, %162, %cst_69 [1] : vector<16x16xf32> to vector<16xf32>
    %164 = vector.shape_cast %163 : vector<16xf32> to vector<16x1xf32>
    %165 = vector.broadcast %164 : vector<16x1xf32> to vector<16x16xf32>
    %166 = arith.subf %162, %165 : vector<16x16xf32>
    %167 = math.exp %166 : vector<16x16xf32>
    %cst_70 = arith.constant dense<0.000000e+00> : vector<16xf32>
    %168 = vector.multi_reduction <add>, %167, %cst_70 [1] : vector<16x16xf32> to vector<16xf32>
    %169 = vector.shape_cast %168 : vector<16xf32> to vector<16x1xf32>
    %170 = tpu.reciprocal %169 {approx = true} : vector<16x1xf32> -> vector<16x1xf32>
    %171 = vector.broadcast %170 : vector<16x1xf32> to vector<16x16xf32>
    %172 = arith.mulf %167, %171 : vector<16x16xf32>
    %173 = vector.extract_strided_slice %97 {offsets = [0, 96], sizes = [16, 32], strides = [1, 1]} : vector<16x128xf32> to vector<16x32xf32>
    %cst_71 = arith.constant dense<0.000000e+00> : vector<16x32xf32>
    %174 = tpu.matmul %172, %173, %cst_71 {dimension_numbers = #tpu.dot_dimension_numbers<[1], [0], [0], [1], [0, 0, 1, 1], [], []>} : vector<16x16xf32>, vector<16x32xf32>, vector<16x32xf32> -> vector<16x32xf32>
    %c3_72 = arith.constant 3 : index
    %c1_73 = arith.constant 1 : index
    %c0_74 = arith.constant 0 : index
    %c0_75 = arith.constant 0 : index
    %175 = vector.load %arg20[%c3_72, %c1_73, %c0_74, %c0_75] : memref<4x2x16x32xf32, #tpu.memory_space<vmem>>, vector<1x1x16x32xf32>
    %176 = vector.shape_cast %175 : vector<1x1x16x32xf32> to vector<16x32xf32>
    %177 = vector.shape_cast %174 : vector<16x32xf32> to vector<1x1x16x32xf32>
    tpu.vector_store %arg20[%c3_72, %c1_73, %c0_74, %c0_75], %177 {strides = array<i32>} : memref<4x2x16x32xf32, #tpu.memory_space<vmem>>, vector<1x1x16x32xf32>,
    %c0_76 = arith.constant 0 : index
    %c0_77 = arith.constant 0 : index
    %c0_78 = arith.constant 0 : index
    %178 = vector.load %arg8[%c0_76, %c0_77, %c0_78] : memref<1x128x128xf32, #tpu.memory_space<vmem>>, vector<1x128x128xf32>
    %179 = vector.shape_cast %178 : vector<1x128x128xf32> to vector<128x128xf32>
    %c0_79 = arith.constant 0 : index
    %c0_80 = arith.constant 0 : index
    %c0_81 = arith.constant 0 : index
    %c0_82 = arith.constant 0 : index
    %180 = vector.load %arg20[%c0_79, %c0_80, %c0_81, %c0_82] : memref<4x2x16x32xf32, #tpu.memory_space<vmem>>, vector<1x2x16x32xf32>
    %181 = vector.shape_cast %180 : vector<1x2x16x32xf32> to vector<2x16x32xf32>
    %182 = vector.shape_cast %181 : vector<2x16x32xf32> to vector<32x32xf32>
    %183 = vector.extract_strided_slice %179 {offsets = [0, 0], sizes = [32, 128], strides = [1, 1]} : vector<128x128xf32> to vector<32x128xf32>
    %cst_83 = arith.constant dense<0.000000e+00> : vector<32x128xf32>
    %184 = tpu.matmul %182, %183, %cst_83 {dimension_numbers = #tpu.dot_dimension_numbers<[1], [0], [0], [1], [0, 0, 1, 1], [], []>} : vector<32x32xf32>, vector<32x128xf32>, vector<32x128xf32> -> vector<32x128xf32>
    %c1_84 = arith.constant 1 : index
    %c0_85 = arith.constant 0 : index
    %c0_86 = arith.constant 0 : index
    %c0_87 = arith.constant 0 : index
    %185 = vector.load %arg20[%c1_84, %c0_85, %c0_86, %c0_87] : memref<4x2x16x32xf32, #tpu.memory_space<vmem>>, vector<1x2x16x32xf32>
    %186 = vector.shape_cast %185 : vector<1x2x16x32xf32> to vector<2x16x32xf32>
    %187 = vector.shape_cast %186 : vector<2x16x32xf32> to vector<32x32xf32>
    %188 = vector.extract_strided_slice %179 {offsets = [32, 0], sizes = [32, 128], strides = [1, 1]} : vector<128x128xf32> to vector<32x128xf32>
    %cst_88 = arith.constant dense<0.000000e+00> : vector<32x128xf32>
    %189 = tpu.matmul %187, %188, %cst_88 {dimension_numbers = #tpu.dot_dimension_numbers<[1], [0], [0], [1], [0, 0, 1, 1], [], []>} : vector<32x32xf32>, vector<32x128xf32>, vector<32x128xf32> -> vector<32x128xf32>
    %190 = arith.addf %184, %189 : vector<32x128xf32>
    %c2_89 = arith.constant 2 : index
    %c0_90 = arith.constant 0 : index
    %c0_91 = arith.constant 0 : index
    %c0_92 = arith.constant 0 : index
    %191 = vector.load %arg20[%c2_89, %c0_90, %c0_91, %c0_92] : memref<4x2x16x32xf32, #tpu.memory_space<vmem>>, vector<1x2x16x32xf32>
    %192 = vector.shape_cast %191 : vector<1x2x16x32xf32> to vector<2x16x32xf32>
    %193 = vector.shape_cast %192 : vector<2x16x32xf32> to vector<32x32xf32>
    %194 = vector.extract_strided_slice %179 {offsets = [64, 0], sizes = [32, 128], strides = [1, 1]} : vector<128x128xf32> to vector<32x128xf32>
    %cst_93 = arith.constant dense<0.000000e+00> : vector<32x128xf32>
    %195 = tpu.matmul %193, %194, %cst_93 {dimension_numbers = #tpu.dot_dimension_numbers<[1], [0], [0], [1], [0, 0, 1, 1], [], []>} : vector<32x32xf32>, vector<32x128xf32>, vector<32x128xf32> -> vector<32x128xf32>
    %196 = arith.addf %190, %195 : vector<32x128xf32>
    %c3_94 = arith.constant 3 : index
    %c0_95 = arith.constant 0 : index
    %c0_96 = arith.constant 0 : index
    %c0_97 = arith.constant 0 : index
    %197 = vector.load %arg20[%c3_94, %c0_95, %c0_96, %c0_97] : memref<4x2x16x32xf32, #tpu.memory_space<vmem>>, vector<1x2x16x32xf32>
    %198 = vector.shape_cast %197 : vector<1x2x16x32xf32> to vector<2x16x32xf32>
    %199 = vector.shape_cast %198 : vector<2x16x32xf32> to vector<32x32xf32>
    %200 = vector.extract_strided_slice %179 {offsets = [96, 0], sizes = [32, 128], strides = [1, 1]} : vector<128x128xf32> to vector<32x128xf32>
    %cst_98 = arith.constant dense<0.000000e+00> : vector<32x128xf32>
    %201 = tpu.matmul %199, %200, %cst_98 {dimension_numbers = #tpu.dot_dimension_numbers<[1], [0], [0], [1], [0, 0, 1, 1], [], []>} : vector<32x32xf32>, vector<32x128xf32>, vector<32x128xf32> -> vector<32x128xf32>
    %202 = arith.addf %196, %201 : vector<32x128xf32>
    %c0_99 = arith.constant 0 : index
    %c0_100 = arith.constant 0 : index
    %c0_101 = arith.constant 0 : index
    %203 = vector.load %arg9[%c0_99, %c0_100, %c0_101] : memref<1x1x128xf32, #tpu.memory_space<vmem>>, vector<1x1x128xf32>
    %204 = vector.shape_cast %203 : vector<1x1x128xf32> to vector<1x128xf32>
    %205 = vector.broadcast %204 : vector<1x128xf32> to vector<32x128xf32>
    %206 = arith.addf %202, %205 : vector<32x128xf32>
    %207 = arith.addf %4, %206 : vector<32x128xf32>
    %c0_102 = arith.constant 0 : index
    %c0_103 = arith.constant 0 : index
    %c0_104 = arith.constant 0 : index
    %208 = vector.load %arg10[%c0_102, %c0_103, %c0_104] : memref<1x1x128xf32, #tpu.memory_space<vmem>>, vector<1x1x128xf32>
    %209 = vector.shape_cast %208 : vector<1x1x128xf32> to vector<1x128xf32>
    %c0_105 = arith.constant 0 : index
    %c0_106 = arith.constant 0 : index
    %c0_107 = arith.constant 0 : index
    %210 = vector.load %arg11[%c0_105, %c0_106, %c0_107] : memref<1x1x128xf32, #tpu.memory_space<vmem>>, vector<1x1x128xf32>
    %211 = vector.shape_cast %210 : vector<1x1x128xf32> to vector<1x128xf32>
    %cst_108 = arith.constant dense<0.000000e+00> : vector<32xf32>
    %212 = vector.multi_reduction <add>, %207, %cst_108 [1] : vector<32x128xf32> to vector<32xf32>
    %213 = vector.shape_cast %212 : vector<32xf32> to vector<32x1xf32>
    %cst_109 = arith.constant 1.280000e+02 : f32
    %214 = vector.broadcast %cst_109 : f32 to vector<32x1xf32>
    %215 = arith.divf %213, %214 : vector<32x1xf32>
    %216 = vector.broadcast %215 : vector<32x1xf32> to vector<32x128xf32>
    %217 = arith.subf %207, %216 : vector<32x128xf32>
    %218 = arith.mulf %217, %217 : vector<32x128xf32>
    %cst_110 = arith.constant dense<0.000000e+00> : vector<32xf32>
    %219 = vector.multi_reduction <add>, %218, %cst_110 [1] : vector<32x128xf32> to vector<32xf32>
    %220 = vector.shape_cast %219 : vector<32xf32> to vector<32x1xf32>
    %cst_111 = arith.constant 1.280000e+02 : f32
    %221 = vector.broadcast %cst_111 : f32 to vector<32x1xf32>
    %222 = arith.divf %220, %221 : vector<32x1xf32>
    %cst_112 = arith.constant 9.99999974E-6 : f32
    %223 = vector.broadcast %cst_112 : f32 to vector<32x1xf32>
    %224 = arith.addf %222, %223 : vector<32x1xf32>
    %225 = math.rsqrt %224 : vector<32x1xf32>
    %226 = vector.broadcast %225 : vector<32x1xf32> to vector<32x128xf32>
    %227 = arith.mulf %217, %226 : vector<32x128xf32>
    %228 = vector.broadcast %209 : vector<1x128xf32> to vector<32x128xf32>
    %229 = arith.mulf %227, %228 : vector<32x128xf32>
    %230 = vector.broadcast %211 : vector<1x128xf32> to vector<32x128xf32>
    %231 = arith.addf %229, %230 : vector<32x128xf32>
    %c0_113 = arith.constant 0 : index
    %c0_114 = arith.constant 0 : index
    %c0_115 = arith.constant 0 : index
    %232 = vector.load %arg12[%c0_113, %c0_114, %c0_115] : memref<1x128x256xf32, #tpu.memory_space<vmem>>, vector<1x128x256xf32>
    %233 = vector.shape_cast %232 : vector<1x128x256xf32> to vector<128x256xf32>
    %cst_116 = arith.constant dense<0.000000e+00> : vector<32x256xf32>
    %234 = tpu.matmul %231, %233, %cst_116 {dimension_numbers = #tpu.dot_dimension_numbers<[1], [0], [0], [1], [0, 0, 1, 1], [], []>} : vector<32x128xf32>, vector<128x256xf32>, vector<32x256xf32> -> vector<32x256xf32>
    %c0_117 = arith.constant 0 : index
    %c0_118 = arith.constant 0 : index
    %c0_119 = arith.constant 0 : index
    %235 = vector.load %arg13[%c0_117, %c0_118, %c0_119] : memref<1x1x256xf32, #tpu.memory_space<vmem>>, vector<1x1x256xf32>
    %236 = vector.shape_cast %235 : vector<1x1x256xf32> to vector<1x256xf32>
    %237 = vector.broadcast %236 : vector<1x256xf32> to vector<32x256xf32>
    %238 = arith.addf %234, %237 : vector<32x256xf32>
    %cst_120 = arith.constant 5.000000e-01 : f32
    %239 = vector.broadcast %cst_120 : f32 to vector<32x256xf32>
    %240 = arith.mulf %239, %238 : vector<32x256xf32>
    %cst_121 = arith.constant 4.471500e-02 : f32
    %241 = vector.broadcast %cst_121 : f32 to vector<32x256xf32>
    %242 = arith.mulf %241, %238 : vector<32x256xf32>
    %243 = arith.mulf %242, %238 : vector<32x256xf32>
    %244 = arith.mulf %243, %238 : vector<32x256xf32>
    %245 = arith.addf %238, %244 : vector<32x256xf32>
    %cst_122 = arith.constant 0.797884583 : f32
    %246 = vector.broadcast %cst_122 : f32 to vector<32x256xf32>
    %247 = arith.mulf %246, %245 : vector<32x256xf32>
    %248 = math.tanh %247 : vector<32x256xf32>
    %cst_123 = arith.constant 1.000000e+00 : f32
    %249 = vector.broadcast %cst_123 : f32 to vector<32x256xf32>
    %250 = arith.addf %249, %248 : vector<32x256xf32>
    %251 = arith.mulf %240, %250 : vector<32x256xf32>
    %c0_124 = arith.constant 0 : index
    %c0_125 = arith.constant 0 : index
    %c0_126 = arith.constant 0 : index
    %252 = vector.load %arg14[%c0_124, %c0_125, %c0_126] : memref<1x256x128xf32, #tpu.memory_space<vmem>>, vector<1x256x128xf32>
    %253 = vector.shape_cast %252 : vector<1x256x128xf32> to vector<256x128xf32>
    %cst_127 = arith.constant dense<0.000000e+00> : vector<32x128xf32>
    %254 = tpu.matmul %251, %253, %cst_127 {dimension_numbers = #tpu.dot_dimension_numbers<[1], [0], [0], [1], [0, 0, 1, 1], [], []>} : vector<32x256xf32>, vector<256x128xf32>, vector<32x128xf32> -> vector<32x128xf32>
    %c0_128 = arith.constant 0 : index
    %c0_129 = arith.constant 0 : index
    %c0_130 = arith.constant 0 : index
    %255 = vector.load %arg15[%c0_128, %c0_129, %c0_130] : memref<1x1x128xf32, #tpu.memory_space<vmem>>, vector<1x1x128xf32>
    %256 = vector.shape_cast %255 : vector<1x1x128xf32> to vector<1x128xf32>
    %257 = vector.broadcast %256 : vector<1x128xf32> to vector<32x128xf32>
    %258 = arith.addf %254, %257 : vector<32x128xf32>
    %259 = arith.addf %231, %258 : vector<32x128xf32>
    %c0_131 = arith.constant 0 : index
    %c0_132 = arith.constant 0 : index
    %c0_133 = arith.constant 0 : index
    %260 = vector.load %arg16[%c0_131, %c0_132, %c0_133] : memref<1x1x128xf32, #tpu.memory_space<vmem>>, vector<1x1x128xf32>
    %261 = vector.shape_cast %260 : vector<1x1x128xf32> to vector<1x128xf32>
    %c0_134 = arith.constant 0 : index
    %c0_135 = arith.constant 0 : index
    %c0_136 = arith.constant 0 : index
    %262 = vector.load %arg17[%c0_134, %c0_135, %c0_136] : memref<1x1x128xf32, #tpu.memory_space<vmem>>, vector<1x1x128xf32>
    %263 = vector.shape_cast %262 : vector<1x1x128xf32> to vector<1x128xf32>
    %cst_137 = arith.constant dense<0.000000e+00> : vector<32xf32>
    %264 = vector.multi_reduction <add>, %259, %cst_137 [1] : vector<32x128xf32> to vector<32xf32>
    %265 = vector.shape_cast %264 : vector<32xf32> to vector<32x1xf32>
    %cst_138 = arith.constant 1.280000e+02 : f32
    %266 = vector.broadcast %cst_138 : f32 to vector<32x1xf32>
    %267 = arith.divf %265, %266 : vector<32x1xf32>
    %268 = vector.broadcast %267 : vector<32x1xf32> to vector<32x128xf32>
    %269 = arith.subf %259, %268 : vector<32x128xf32>
    %270 = arith.mulf %269, %269 : vector<32x128xf32>
    %cst_139 = arith.constant dense<0.000000e+00> : vector<32xf32>
    %271 = vector.multi_reduction <add>, %270, %cst_139 [1] : vector<32x128xf32> to vector<32xf32>
    %272 = vector.shape_cast %271 : vector<32xf32> to vector<32x1xf32>
    %cst_140 = arith.constant 1.280000e+02 : f32
    %273 = vector.broadcast %cst_140 : f32 to vector<32x1xf32>
    %274 = arith.divf %272, %273 : vector<32x1xf32>
    %cst_141 = arith.constant 9.99999974E-6 : f32
    %275 = vector.broadcast %cst_141 : f32 to vector<32x1xf32>
    %276 = arith.addf %274, %275 : vector<32x1xf32>
    %277 = math.rsqrt %276 : vector<32x1xf32>
    %278 = vector.broadcast %277 : vector<32x1xf32> to vector<32x128xf32>
    %279 = arith.mulf %269, %278 : vector<32x128xf32>
    %280 = vector.broadcast %261 : vector<1x128xf32> to vector<32x128xf32>
    %281 = arith.mulf %279, %280 : vector<32x128xf32>
    %282 = vector.broadcast %263 : vector<1x128xf32> to vector<32x128xf32>
    %283 = arith.addf %281, %282 : vector<32x128xf32>
    %284 = vector.shape_cast %283 : vector<32x128xf32> to vector<2x16x128xf32>
    %c0_142 = arith.constant 0 : index
    %c0_143 = arith.constant 0 : index
    %c0_144 = arith.constant 0 : index
    %285 = vector.load %arg19[%c0_142, %c0_143, %c0_144] : memref<2x16x128xf32, #tpu.memory_space<vmem>>, vector<2x16x128xf32>
    tpu.vector_store %arg19[%c0_142, %c0_143, %c0_144], %284 {strides = array<i32>} : memref<2x16x128xf32, #tpu.memory_space<vmem>>, vector<2x16x128xf32>,
    %c1_i32 = arith.constant 1 : i32
    %286 = arith.cmpi eq, %arg1, %c1_i32 : i32
    %287 = arith.extui %286 : i1 to i32
    %c0_i32_145 = arith.constant 0 : i32
    %288 = arith.cmpi ne, %287, %c0_i32_145 : i32
    scf.if %288 {
      %c0_146 = arith.constant 0 : index
      %c0_147 = arith.constant 0 : index
      %c0_148 = arith.constant 0 : index
      %289 = vector.load %arg19[%c0_146, %c0_147, %c0_148] : memref<2x16x128xf32, #tpu.memory_space<vmem>>, vector<2x1x128xf32>
      %c0_149 = arith.constant 0 : index
      %c0_150 = arith.constant 0 : index
      %c0_151 = arith.constant 0 : index
      %290 = vector.load %arg18[%c0_149, %c0_150, %c0_151] : memref<2x1x128xf32, #tpu.memory_space<vmem>>, vector<2x1x128xf32>
      tpu.vector_store %arg18[%c0_149, %c0_150, %c0_151], %289 {strides = array<i32>} : memref<2x1x128xf32, #tpu.memory_space<vmem>>, vector<2x1x128xf32>,
    } else {
    }
    return
  }
  func.func @transform_0(%arg0: i32, %arg1: i32) -> (i32, i32, i32) {
    %c0_i32 = arith.constant 0 : i32
    %c0_i32_0 = arith.constant 0 : i32
    %c0_i32_1 = arith.constant 0 : i32
    return %arg0, %c0_i32, %c0_i32_0 : i32, i32, i32
  }
  func.func @transform_1(%arg0: i32, %arg1: i32) -> (i32, i32, i32) {
    %c0_i32 = arith.constant 0 : i32
    %c0_i32_0 = arith.constant 0 : i32
    %c0_i32_1 = arith.constant 0 : i32
    return %arg0, %c0_i32, %c0_i32_0 : i32, i32, i32
  }
  func.func @transform_2(%arg0: i32, %arg1: i32) -> (i32, i32) {
    %c0_i32 = arith.constant 0 : i32
    %c0_i32_0 = arith.constant 0 : i32
    %c0_i32_1 = arith.constant 0 : i32
    return %c0_i32, %c0_i32_0 : i32, i32
  }
  func.func @transform_3(%arg0: i32, %arg1: i32) -> (i32, i32) {
    %c0_i32 = arith.constant 0 : i32
    %c0_i32_0 = arith.constant 0 : i32
    %c0_i32_1 = arith.constant 0 : i32
    return %c0_i32, %c0_i32_0 : i32, i32
  }
  func.func @transform_4(%arg0: i32, %arg1: i32) -> (i32, i32, i32) {
    %c0_i32 = arith.constant 0 : i32
    %c0_i32_0 = arith.constant 0 : i32
    %c0_i32_1 = arith.constant 0 : i32
    return %arg1, %c0_i32, %c0_i32_0 : i32, i32, i32
  }
  func.func @transform_5(%arg0: i32, %arg1: i32) -> (i32, i32, i32) {
    %c0_i32 = arith.constant 0 : i32
    %c0_i32_0 = arith.constant 0 : i32
    %c0_i32_1 = arith.constant 0 : i32
    return %arg1, %c0_i32, %c0_i32_0 : i32, i32, i32
  }
  func.func @transform_6(%arg0: i32, %arg1: i32) -> (i32, i32, i32) {
    %c0_i32 = arith.constant 0 : i32
    %c0_i32_0 = arith.constant 0 : i32
    %c0_i32_1 = arith.constant 0 : i32
    return %arg1, %c0_i32, %c0_i32_0 : i32, i32, i32
  }
  func.func @transform_7(%arg0: i32, %arg1: i32) -> (i32, i32, i32) {
    %c0_i32 = arith.constant 0 : i32
    %c0_i32_0 = arith.constant 0 : i32
    %c0_i32_1 = arith.constant 0 : i32
    return %arg1, %c0_i32, %c0_i32_0 : i32, i32, i32
  }
  func.func @transform_8(%arg0: i32, %arg1: i32) -> (i32, i32, i32) {
    %c0_i32 = arith.constant 0 : i32
    %c0_i32_0 = arith.constant 0 : i32
    %c0_i32_1 = arith.constant 0 : i32
    return %arg1, %c0_i32, %c0_i32_0 : i32, i32, i32
  }
  func.func @transform_9(%arg0: i32, %arg1: i32) -> (i32, i32, i32) {
    %c0_i32 = arith.constant 0 : i32
    %c0_i32_0 = arith.constant 0 : i32
    %c0_i32_1 = arith.constant 0 : i32
    return %arg1, %c0_i32, %c0_i32_0 : i32, i32, i32
  }
  func.func @transform_10(%arg0: i32, %arg1: i32) -> (i32, i32, i32) {
    %c0_i32 = arith.constant 0 : i32
    %c0_i32_0 = arith.constant 0 : i32
    %c0_i32_1 = arith.constant 0 : i32
    return %arg1, %c0_i32, %c0_i32_0 : i32, i32, i32
  }
  func.func @transform_11(%arg0: i32, %arg1: i32) -> (i32, i32, i32) {
    %c0_i32 = arith.constant 0 : i32
    %c0_i32_0 = arith.constant 0 : i32
    %c0_i32_1 = arith.constant 0 : i32
    return %arg1, %c0_i32, %c0_i32_0 : i32, i32, i32
  }
  func.func @transform_12(%arg0: i32, %arg1: i32) -> (i32, i32, i32) {
    %c0_i32 = arith.constant 0 : i32
    %c0_i32_0 = arith.constant 0 : i32
    %c0_i32_1 = arith.constant 0 : i32
    return %arg1, %c0_i32, %c0_i32_0 : i32, i32, i32
  }
  func.func @transform_13(%arg0: i32, %arg1: i32) -> (i32, i32, i32) {
    %c0_i32 = arith.constant 0 : i32
    %c0_i32_0 = arith.constant 0 : i32
    %c0_i32_1 = arith.constant 0 : i32
    return %arg1, %c0_i32, %c0_i32_0 : i32, i32, i32
  }
  func.func @transform_14(%arg0: i32, %arg1: i32) -> (i32, i32, i32) {
    %c0_i32 = arith.constant 0 : i32
    %c0_i32_0 = arith.constant 0 : i32
    %c0_i32_1 = arith.constant 0 : i32
    return %arg1, %c0_i32, %c0_i32_0 : i32, i32, i32
  }
  func.func @transform_15(%arg0: i32, %arg1: i32) -> (i32, i32, i32) {
    %c0_i32 = arith.constant 0 : i32
    %c0_i32_0 = arith.constant 0 : i32
    %c0_i32_1 = arith.constant 0 : i32
    return %arg1, %c0_i32, %c0_i32_0 : i32, i32, i32
  }
  func.func @transform_16(%arg0: i32, %arg1: i32) -> (i32, i32, i32) {
    %c0_i32 = arith.constant 0 : i32
    %c0_i32_0 = arith.constant 0 : i32
    %c0_i32_1 = arith.constant 0 : i32
    return %arg0, %c0_i32, %c0_i32_0 : i32, i32, i32
  }
}

</mosaic_0001>

<bundles_post_ra>
// kernel: tpu_custom_call.1
= control target key start
LH: loop header
LB: loop body
LE: loop exit
PB: predicated region body
PF: predicated region fallthrough
CT: control target
= control target key end

     0   :  { %s5983_s0 = inlined_call_operand.hbm [shape: f32[2,16,24], index: 0, kind: input, shape index: {}]   ;;  %s5984_s1 = inlined_call_operand.hbm [shape: f32[2,1,16], index: 1, kind: input, shape index: {}]   ;;  %s5985_s2 = inlined_call_operand.hbm [shape: f32[16,128], index: 2, kind: input, shape index: {}]   ;;  %s5986_s3 = inlined_call_operand.hbm [shape: f32[24,128], index: 3, kind: input, shape index: {}]   ;;  %s5987_s4 = inlined_call_operand.hbm [shape: f32[2,128,384], index: 4, kind: input, shape index: {}]   ;;  %s5988_s5 = inlined_call_operand.vmem [shape: f32[2,1,384], index: 5, kind: input, shape index: {}]   ;;  %s5989_s6 = inlined_call_operand.hbm [shape: f32[2,128,128], index: 6, kind: input, shape index: {}]   ;;  %s5990_s7 = inlined_call_operand.vmem [shape: f32[2,1,128], index: 7, kind: input, shape index: {}]   ;;  %s5991_s8 = inlined_call_operand.vmem [shape: f32[2,1,128], index: 8, kind: input, shape index: {}]   ;;  %s5992_s9 = inlined_call_operand.vmem [shape: f32[2,1,128], index: 9, kind: input, shape index: {}]   ;;  %s5993_s10 = inlined_call_operand.hbm [shape: f32[2,128,256], index: 10, kind: input, shape index: {}]   ;;  %s5994_s11 = inlined_call_operand.vmem [shape: f32[2,1,256], index: 11, kind: input, shape index: {}]   ;;  %s5995_s12 = inlined_call_operand.hbm [shape: f32[2,256,128], index: 12, kind: input, shape index: {}]   ;;  %s5996_s13 = inlined_call_operand.vmem [shape: f32[2,1,128], index: 13, kind: input, shape index: {}]   ;;  %s5997_s14 = inlined_call_operand.vmem [shape: f32[2,1,128], index: 14, kind: input, shape index: {}]   ;;  %s5998_s15 = inlined_call_operand.vmem [shape: f32[2,1,128], index: 15, kind: input, shape index: {}]   ;;  %s5999_s16 = inlined_call_operand.hbm [shape: f32[2,1,128], index: 16, kind: output, shape index: {}]  }
   0x1   :  { %6009 = sst [smem:[#allocation26_spill]] %s5983_s0 }
   0x2   :  { %6010 = sst [smem:[#allocation27_spill]] %s5984_s1 }
   0x3   :  { %6011 = sst [smem:[#allocation28_spill]] %s5985_s2 }
   0x4   :  { %6012 = sst [smem:[#allocation29_spill]] %s5986_s3 }
   0x5   :  { %6013 = sst [smem:[#allocation30_spill]] %s5987_s4 }
   0x6   :  { %6014 = sst [smem:[#allocation31_spill]] %s5988_s5 }
   0x7   :  { %6015 = sst [smem:[#allocation32_spill]] %s5989_s6 }
   0x8   :  { %6016 = sst [smem:[#allocation33_spill]] %s5990_s7 }
   0x9   :  { %6017 = sst [smem:[#allocation34_spill]] %s5991_s8 }
   0xa   :  { %6018 = sst [smem:[#allocation35_spill]] %s5992_s9 }
   0xb   :  { %6019 = sst [smem:[#allocation36_spill]] %s5993_s10 }
   0xc   :  { %6020 = sst [smem:[#allocation37_spill]] %s5994_s11 }
   0xd   :  { %6021 = sst [smem:[#allocation38_spill]] %s5996_s13 }
   0xe   :  { %6022 = sst [smem:[#allocation39_spill]] %s5997_s14 }
   0xf   :  { %6023 = sst [smem:[#allocation40_spill]] %s5998_s15 }
  0x10   :  { %6024 = sst [smem:[#allocation41_spill]] %s5999_s16 }
  0x11   :  { %21 = vsyncpa [#allocation5], 0 }
  0x12   :  { %22 = vsyncpa [#allocation8], 0 }
  0x13   :  { %23 = vsyncpa [#allocation11], 0 }
  0x14   :  { %24 = vsyncpa [#allocation6], 0  ;;  %s5162_s21 = smov 0   ;;  %s5164_s22 = smov 0  }
  0x15   :  { %s5166_s23 = smov 0   ;;  %s5168_s24 = smov 0  }
  0x16   :  { %s5170_s25 = smov 0   ;;  %s5172_s26 = smov 0  }
  0x17 LB: > { %6025 = sst [smem:[#allocation22_spill]] %s5041_s23  ;;  %s5191_s27 = sadd.s32 4294967295, %s5053_s26   ;;  %s5053_s26 = sphi %s5172_s26, %s30_s26   ;;  %s5049_s25 = sphi %s5170_s25, %s6073_s25   ;;  %s5045_s24 = sphi %s5168_s24, %s6072_s24   ;;  %s5041_s23 = sphi %s5166_s23, %s6068_s23   ;;  %s5037_s22 = sphi %s5164_s22, %s6071_s22   ;;  %s5033_s21 = sphi %s5162_s21, %s6070_s21  }
  0x18   : > { %6026 = sst [smem:[#allocation23_spill]] %s5053_s26  ;;  %p156_p0 = scmp.ne.s32.totalorder %s5037_s22, %s5033_s21 }
  0x19   : > { %p6007_p1 = scmp.eq.s32.totalorder %s5191_s27, 0  ;;  %p4011_p2 = scmp.ge.s32.totalorder %s5053_s26, 1 }
  0x1a   : > { %p479_p3 = scmp.lt.s32.totalorder %s5053_s26, 3  ;;  %s5055_s30 = smov [#allocation4]  }
  0x1b   : > { %p5199_p4 = por %p6007_p1, %p156_p0  ;;  %s495_s0 = sshll.u32 %s5055_s30, 4  ;;  %s496_s0 = int_to_ptr.vmem [resolvable:$true] %s495_s0 }
  0x1c   : > { %p5203_p5 = pnand %p4011_p2, %p479_p3  ;;  %s39_s18 = sadd.s32 1, %s5049_s25 }
  0x1d   : > { %s4758_s19 = scalar_lea.vmem %s496_s0, 512  ;;  %p4766_p12 = scmp.lt.s32.totalorder %s496_s0, %s496_s0 }
  0x1e   : > { %p4544_p6 = pneg %p5203_p5  ;;  %p4759_p9 = scmp.ne.s32.totalorder %s496_s0, %s4758_s19 }
  0x1f   : > { %p4767_p13 = scmp.lt.s32.totalorder %s4758_s19, %s4758_s19 }
  0x20   : > { %p5211_p7 = pnand %p4544_p6, %p6007_p1 }
  0x21   : > { %p4768_p0 = por %p4767_p13, %p4766_p12 }
  0x22   : > { %p4749_p8 = pneg %p5211_p7 }
  0x24   : > { %p4761_p10 = pnand %p4759_p9, %p4749_p8 }
  0x26   : > { %p4762_p11 = pneg %p4761_p10 }
  0x28   : > { %p4769_p2 = pnand %p4768_p0, %p4762_p11 }
  0x2a   : > { %4772 = shalt.err (!%p4769_p2)
}
  0x2b   : > { %s6000_s20 = smov 128   ;;  %s6002_s21 = smov 8  }
  0x2c   : > { %s6030_s16 = sld [smem:[#allocation26_spill]]  ;;  %p40_p3 = scmp.ge.s32.totalorder %s39_s18, 2 }
  0x2d   : > { %s143_s15 = sadd.s32 1, %s5041_s23  ;;  %p150_p6 = scmp.ne.s32.totalorder %s5041_s23, %s5037_s22 }
  0x2e   : > { %p151_p9 = scmp.eq.s32.totalorder %s5053_s26, 0  ;;  %s6075_s18 = smov (%p40_p3, %s39_s18), 0 }
  0x2f   : > { %6031 = sst [smem:[#allocation24_spill]] %s6075_s18  ;;  %p4574_p11 = scmp.lt.s32.totalorder %s5053_s26, 2 }
  0x30   : > { %p152_p10 = por %p151_p9, %p150_p6  ;;  %s140_s14 = ssub.s32 %s5049_s25, %s6075_s18 }
  0x31   : > { %s551_s13 = sand.u32 1, %s5053_s26   ;;  %p141_p12 = scmp.eq.s32.totalorder %s140_s14, 0 }
  0x32   : > { %4547 = dma.hbm_to_vmem [thread:$0]  (!%p5211_p7), %s6030_s16, 512, %s496_s0, [#allocation5], %s6000_s20, %s6000_s20, %s6002_s21  }
  0x33   : > { %s5240_s11 = sand.u32 1, %s5041_s23   ;;  %s4513_s5 = smul.u32 6144, %s5049_s25 }
  0x34   : > { %s5244_s9 = scalar_select %p141_p12, %s5041_s23, %s143_s15  }
  0x35   : > { %s4512_s16 = smul.u32 384, %s5240_s11  ;;  %s6033_s4 = sld [smem:[#allocation30_spill]] }
  0x36   : > { %6032 = sst [smem:[#allocation25_spill]] %s5244_s9  ;;  %p5250_p13 = pnand %p4574_p11, %p152_p10 }
  0x37   : > { %s555_s21 = scalar_lea.vmem [#allocation12], %s4512_s16  ;;  %s4018_s18 = sshll.u32 %s5240_s11, 7 }
  0x38   : > { %s562_s14 = sshll.u32 %s555_s21, 4  ;;  %s5255_s26 = scalar_lea.sflag [#allocation5], %s551_s13  ;;  %s563_s14 = int_to_ptr.vmem [resolvable:$true] %s562_s14 }
  0x39   : > { %p4775_p0 = pneg %p5250_p13  ;;  %s4786_s15 = scalar_lea.vmem %s563_s14, 6144 }
  0x3a   : > { %p4787_p2 = scmp.ne.s32.totalorder %s563_s14, %s4786_s15 }
  0x3b   : > { %s561_s19 = scalar_lea.hbm %s6033_s4, %s4513_s5  ;;  %s5058_s5 = smov [#allocation12]  }
  0x3c   : > { %p4789_p3 = pnand %p4787_p2, %p4775_p0  ;;  %s4791_s0 = sshll.u32 %s5058_s5, 4  ;;  %s4792_s0 = int_to_ptr.vmem [resolvable:$false] %s4791_s0 }
  0x3d   : > { %s4793_s30 = scalar_lea.vmem %s4792_s0, 12288  ;;  %p4794_p9 = scmp.lt.s32.totalorder %s563_s14, %s4792_s0 }
  0x3e   : > { %p4790_p6 = pneg %p4789_p3  ;;  %p4795_p10 = scmp.lt.s32.totalorder %s4793_s30, %s4786_s15 }
  0x40   : > { %p4796_p11 = por %p4795_p10, %p4794_p9 }
  0x42   : > { %p4797_p12 = pnand %p4796_p11, %p4790_p6 }
  0x44   : > { %4800 = shalt.err (!%p4797_p12)
}
  0x45   : > { %s5059_s21 = smov 384   ;;  %s5060_s13 = smov 24  }
  0x46   : > { %4560 = dma.hbm_to_vmem [thread:$0]  (!%p5250_p13), %s561_s19, 6144, %s563_s14, %s5255_s26, %s5059_s21, %s5059_s21, %s5060_s13  }
  0x47   : > { %s4118_s16 = sshll.u32 %s5049_s25, 11  ;;  %s6035_s6 = sld [smem:[#allocation32_spill]] }
  0x48   : > { %s583_s23 = scalar_lea.vmem [#allocation13], %s4018_s18  ;;  %s5061_s0 = smov [#allocation13]  }
  0x49   : > { %s590_s8 = sshll.u32 %s583_s23, 4  ;;  %s4819_s30 = sshll.u32 %s5061_s0, 4  ;;  %s591_s8 = int_to_ptr.vmem [resolvable:$true] %s590_s8  ;;  %s4820_s30 = int_to_ptr.vmem [resolvable:$false] %s4819_s30 }
  0x4a   : > { %s4814_s15 = scalar_lea.vmem %s591_s8, 2048  ;;  %s4821_s7 = scalar_lea.vmem %s4820_s30, 4096 }
  0x4b   : > { %p4815_p2 = scmp.ne.s32.totalorder %s591_s8, %s4814_s15  ;;  %p4822_p9 = scmp.lt.s32.totalorder %s591_s8, %s4820_s30 }
  0x4c   : > { %p4823_p10 = scmp.lt.s32.totalorder %s4821_s7, %s4814_s15 }
  0x4d   : > { %s589_s5 = scalar_lea.hbm %s6035_s6, %s4118_s16  ;;  %p4817_p3 = pnand %p4815_p2, %p4775_p0 }
  0x4e   : > { %p4824_p11 = por %p4823_p10, %p4822_p9 }
  0x4f   : > { %p4818_p6 = pneg %p4817_p3 }
  0x51   : > { %p4825_p12 = pnand %p4824_p11, %p4818_p6 }
  0x53   : > { %4828 = shalt.err (!%p4825_p12)
}
  0x54   : > { %s6036_s4 = smov 8   ;;  %s6037_s9 = smov 128  }
  0x55   : > { %4563 = dma.hbm_to_vmem [thread:$0]  (!%p5250_p13), %s589_s5, 2048, %s591_s8, %s5255_s26, %s6037_s9, %s6037_s9, %s6036_s4  }
  0x56   : > { %s5062_s23 = smov [#allocation7]  }
  0x57   : > { %s511_s18 = sshll.u32 %s5062_s23, 4  ;;  %s512_s18 = int_to_ptr.vmem [resolvable:$true] %s511_s18 }
  0x58   : > { %s4840_s19 = scalar_lea.vmem %s512_s18, 32  ;;  %p4848_p9 = scmp.lt.s32.totalorder %s512_s18, %s512_s18 }
  0x59   : > { %p4841_p2 = scmp.ne.s32.totalorder %s512_s18, %s4840_s19  ;;  %p4849_p6 = scmp.lt.s32.totalorder %s4840_s19, %s4840_s19 }
  0x5b   : > { %p4843_p3 = pnand %p4841_p2, %p4749_p8  ;;  %p4850_p10 = por %p4849_p6, %p4848_p9 }
  0x5d   : > { %p4844_p1 = pneg %p4843_p3 }
  0x5f   : > { %p4851_p11 = pnand %p4850_p10, %p4844_p1 }
  0x61   : > { %4854 = shalt.err (!%p4851_p11)
}
  0x62   : > { %s5063_s7 = smov 16   ;;  %s5064_s8 = smov 1  }
  0x63   : > { %s6038_s1 = sld [smem:[#allocation27_spill]]  ;;  %s6008_s13 = sshll.u32 %s5240_s11, 8 }
  0x64   : > { %s4119_s16 = sshll.u32 %s5049_s25, 12  ;;  %s6039_s10 = sld [smem:[#allocation36_spill]] }
  0x65   : > { %s622_s30 = scalar_lea.vmem [#allocation14], %s6008_s13  ;;  %s5065_s6 = smov [#allocation14]  }
  0x66   : > { %s629_s23 = sshll.u32 %s622_s30, 4  ;;  %s4873_s14 = sshll.u32 %s5065_s6, 4  ;;  %s630_s23 = int_to_ptr.vmem [resolvable:$true] %s629_s23  ;;  %s4874_s14 = int_to_ptr.vmem [resolvable:$false] %s4873_s14 }
  0x67   : > { %s4868_s19 = scalar_lea.vmem %s630_s23, 4096  ;;  %p4876_p3 = scmp.lt.s32.totalorder %s630_s23, %s4874_s14 }
  0x68   : > { %p4869_p1 = scmp.ne.s32.totalorder %s630_s23, %s4868_s19 }
  0x69   : > { %4550 = dma.hbm_to_vmem [thread:$0]  (!%p5211_p7), %s6038_s1, 32, %s512_s18, [#allocation8], %s5063_s7, %s5063_s7, %s5064_s8  }
  0x6a   : > { %s628_s0 = scalar_lea.hbm %s6039_s10, %s4119_s16  ;;  %p4871_p12 = pnand %p4869_p1, %p4775_p0 }
  0x6b   : > { %s4875_s18 = scalar_lea.vmem %s4874_s14, 8192 }
  0x6c   : > { %p4872_p2 = pneg %p4871_p12  ;;  %p4877_p9 = scmp.lt.s32.totalorder %s4875_s18, %s4868_s19 }
  0x6e   : > { %p4878_p6 = por %p4877_p9, %p4876_p3 }
  0x70   : > { %p4879_p10 = pnand %p4878_p6, %p4872_p2 }
  0x72   : > { %4882 = shalt.err (!%p4879_p10)
}
  0x73   : > { %s5066_s8 = smov 256   ;;  %s5067_s21 = smov [#allocation9]  }
  0x74   : > { %4566 = dma.hbm_to_vmem [thread:$0]  (!%p5250_p13), %s628_s0, 4096, %s630_s23, %s5255_s26, %s5066_s8, %s5066_s8, %s5063_s7  }
  0x75   : > { %s524_s5 = sshll.u32 %s5067_s21, 4  ;;  %s5068_s15 = smov [#allocation10]   ;;  %s525_s5 = int_to_ptr.vmem [resolvable:$true] %s524_s5 }
  0x76   : > { %s537_s30 = sshll.u32 %s5068_s15, 4  ;;  %s4894_s13 = scalar_lea.vmem %s525_s5, 256  ;;  %s538_s30 = int_to_ptr.vmem [resolvable:$true] %s537_s30 }
  0x77   : > { %p4895_p11 = scmp.ne.s32.totalorder %s525_s5, %s4894_s13  ;;  %p4902_p3 = scmp.lt.s32.totalorder %s525_s5, %s525_s5 }
  0x78   : > { %p4903_p2 = scmp.lt.s32.totalorder %s4894_s13, %s4894_s13 }
  0x79   : > { %p4897_p1 = pnand %p4895_p11, %p4749_p8 }
  0x7a   : > { %p4904_p9 = por %p4903_p2, %p4902_p3 }
  0x7b   : > { %p4898_p12 = pneg %p4897_p1 }
  0x7d   : > { %p4905_p6 = pnand %p4904_p9, %p4898_p12 }
  0x7f   : > { %4908 = shalt.err (!%p4905_p6)
}
  0x80   : > { %s6040_s2 = sld [smem:[#allocation28_spill]]  ;;  %s4920_s0 = scalar_lea.vmem %s538_s30, 384 }
  0x81   : > { %p4921_p10 = scmp.ne.s32.totalorder %s538_s30, %s4920_s0  ;;  %p4928_p3 = scmp.lt.s32.totalorder %s538_s30, %s538_s30 }
  0x82   : > { %p4929_p12 = scmp.lt.s32.totalorder %s4920_s0, %s4920_s0 }
  0x83   : > { %p4923_p11 = pnand %p4921_p10, %p4749_p8 }
  0x84   : > { %p4930_p2 = por %p4929_p12, %p4928_p3 }
  0x85   : > { %p4924_p1 = pneg %p4923_p11 }
  0x86   : > { %4553 = dma.hbm_to_vmem [thread:$0]  (!%p5211_p7), %s6040_s2, 256, %s525_s5, [#allocation8], %s6037_s9, %s6037_s9, %s6036_s4  }
  0x87   : > { %p4931_p9 = pnand %p4930_p2, %p4924_p1 }
  0x89   : > { %4934 = shalt.err (!%p4931_p9)
}
  0x8a   : > { %s6041_s3 = sld [smem:[#allocation29_spill]]  ;;  %s656_s18 = scalar_lea.hbm %s5995_s12, %s4119_s16 }
  0x8b   : > { %s6042_s8 = sshll.u32 %s5240_s11, 8  ;;  %s5069_s15 = smov [#allocation15]  }
  0x8c   : > { %s650_s21 = scalar_lea.vmem [#allocation15], %s6042_s8  ;;  %s4953_s6 = sshll.u32 %s5069_s15, 4  ;;  %s4954_s6 = int_to_ptr.vmem [resolvable:$false] %s4953_s6 }
  0x8d   : > { %s657_s5 = sshll.u32 %s650_s21, 4  ;;  %s4955_s7 = scalar_lea.vmem %s4954_s6, 8192  ;;  %s658_s5 = int_to_ptr.vmem [resolvable:$true] %s657_s5 }
  0x8e   : > { %s4948_s17 = scalar_lea.vmem %s658_s5, 4096 }
  0x8f   : > { %p4949_p8 = scmp.ne.s32.totalorder %s658_s5, %s4948_s17  ;;  %p4957_p11 = scmp.lt.s32.totalorder %s4955_s7, %s4948_s17 }
  0x90   : > { %4556 = dma.hbm_to_vmem [thread:$0]  (!%p5211_p7), %s6041_s3, 384, %s538_s30, [#allocation11], %s6037_s9, %s6037_s9, %s6036_s4  }
  0x91   : > { %p4951_p6 = pnand %p4949_p8, %p4775_p0  ;;  %p4956_p7 = scmp.lt.s32.totalorder %s658_s5, %s4954_s6 }
  0x93   : > { %p4952_p10 = pneg %p4951_p6  ;;  %p4958_p1 = por %p4957_p11, %p4956_p7 }
  0x95   : > { %p4959_p3 = pnand %p4958_p1, %p4952_p10 }
  0x97   : > { %4962 = shalt.err (!%p4959_p3)
}
  0x98   : > { %4569 = dma.hbm_to_vmem [thread:$0]  (!%p5250_p13), %s656_s18, 4096, %s658_s5, %s5255_s26, %s6037_s9, %s6037_s9, %s6036_s4  }
  0x99   : > { %687 = sbr.rel (%p5203_p5) target bundleno = 5384 (0x1508), region = 84  ;;  %p6043_p0 = scmp.eq.s32.totalorder (!%p5203_p5), %s5191_s27, 0 }
  0x9e   : > { %5012 = dma.done.wait (%p6043_p0), [#allocation5], 512   ;;  %p6044_p12 = pmov %p6043_p0 }
  0x9f   : > { %p6045_p2 = pmov %p6043_p0 }
  0xa0   : > { %5014 = vsyncadd (%p6044_p12), [#allocation5], 4294966784 }
  0xa1   : > { %5016 = dma.done.wait (%p6045_p2), [#allocation8], 288   ;;  %p6046_p9 = pmov %p6043_p0 }
  0xa2   : > { %p6047_p8 = pmov %p6043_p0 }
  0xa3   : > { %5018 = vsyncadd (%p6046_p9), [#allocation8], 4294967008 }
  0xa4   : > { %5020 = dma.done.wait (%p6047_p8), [#allocation11], 384   ;;  %p6048_p13 = pmov %p6043_p0 }
  0xa5   : > { %s705_s11 = sand.u32 1, %s5191_s27   ;;  %s707_s26 = sand.u32 1, %s5037_s22  }
  0xa6   : > { %5022 = vsyncadd (%p6048_p13), [#allocation11], 4294966912  ;;  %s4514_s29 = smul.u32 384, %s707_s26  ;;  %s706_s20 = scalar_lea.sflag [#allocation5], %s705_s11 }
  0xa8   : > { %s5355_s4 = scalar_lea.vmem [#allocation12], %s4514_s29 }
  0xa9   : > { %5024 = dma.done.wait (%p5199_p4), %s706_s20, 16384  }
  0xaa   : > { %5026 = vsyncadd (%p5199_p4), %s706_s20, 4294950912  ;;  %s4032_s9 = sshll.u32 %s707_s26, 7  ;;  %s4033_s16 = sshll.u32 %s707_s26, 8 }
  0xab   : > { %p823_p5 = scmp.lt.s32.totalorder %s5045_s24, 1  ;;  %s6049_s28 = sld [smem:[#allocation33_spill]] }
  0xac   : > { %s6052_s26 = sld [smem:[#allocation31_spill]]  ;;  %s5403_s11 = scalar_lea.vmem [#allocation14], %s4033_s16 }
  0xad   : > { %s5363_s30 = scalar_select %p823_p5, %s5045_s24, 1 }
  0xae   : > { %s6053_s3 = sld [smem:[#allocation37_spill]]  ;;  %p4036_p4 = scmp.ne.s32.totalorder %s5045_s24, 0 }
  0xaf   : > { %s4515_s0 = smul.u32 3, %s5363_s30  ;;  %s4035_s20 = sshll.u32 %s5363_s30, 1 }
  0xb0   : > { %s6055_s21 = sld [smem:[#allocation39_spill]] }
  0xb1   : > { %s829_s19 = scalar_lea.vmem %s6049_s28, %s5363_s30  ;;  %s6054_s28 = sld [smem:[#allocation38_spill]] }
  0xb2   : > { %s5381_s29 = scalar_lea.vmem %s6052_s26, %s4515_s0  ;;  %s6056_s6 = sld [smem:[#allocation40_spill]] }
  0xb3   : > { %s5401_s0 = scalar_lea.vmem [#allocation13], %s4032_s9  ;;  %s5405_s26 = scalar_lea.vmem [#allocation15], %s4033_s16 }
  0xb4   : > { %s5387_s10 = scalar_lea.vmem %s6053_s3, %s4035_s20  ;;  %853 = sbr.rel (%p4036_p4) target bundleno = 391 (0x187), region = 120 }
  0xb6   : > { %s845_s5 = scalar_lea.vmem %s6055_s21, %s5363_s30 }
  0xb7   : > { %s842_s14 = scalar_lea.vmem %s6054_s28, %s5363_s30 }
  0xb8   : > { %s848_s7 = scalar_lea.vmem %s6056_s6, %s5363_s30 }
  0xb9   : > { %v860_v0 = vld [vmem:[#allocation10 + $0x10] sm:$0xff]  ;;  %v859_v1 = vld [vmem:[#allocation10 + $0x8] sm:$0xff]  ;;  %v858_v2 = vld [vmem:[#allocation10] sm:$0xff]  ;;  %vm861_vm0 = vcmask 195584  }
  0xba   : > { %4288 = vmatprep.subr.mxu0 %v860_v0  ;;  %4506 = vmatprep.subr.mxu1 %v860_v0  ;;  %v854_v3 = vld [vmem:[#allocation4] sm:$0xff]  ;;  %v856_v4 = vld [vmem:[#allocation4 + $0x10] sm:$0xff]  ;;  %v855_v5 = vld [vmem:[#allocation4 + $0x8] sm:$0xff] }
  0xbb   : > { %4289 = vmatpush3.msra.mxu0 %v860_v0  ;;  %4509 = vmatpush3.msra.mxu1 %v860_v0  ;;  %v857_v6 = vld [vmem:[#allocation4 + $0x18] sm:$0xff]  ;;  %v960_v7 = vld [vmem:[#allocation9 + $0x8] sm:$0xff]  ;;  %v959_v10 = vld [vmem:[#allocation9] sm:$0xff] }
  0xbc   : > { %4290 = vmatprep.subr.mxu0 %v859_v1  ;;  %4507 = vmatprep.subr.mxu1 %v859_v1 }
  0xbd   : > { %4291 = vmatpush3.msra.mxu0 %v859_v1  ;;  %4510 = vmatpush3.msra.mxu1 %v859_v1 }
  0xbe   : > { %4292 = vmatprep.subr.mxu0 %v858_v2  ;;  %4508 = vmatprep.subr.mxu1 %v858_v2 }
  0xbf   : > { %4293 = vmatpush3.msra.mxu0 %v858_v2  ;;  %4511 = vmatpush3.msra.mxu1 %v858_v2 }
  0xc0   : > { %4294 = vmatprep.mubr.msk.f32.mxu0 %vm861_vm0, %v854_v3  ;;  %4297 = vmatprep.mubr.msk.f32.mxu1 %vm861_vm0, %v856_v4 }
  0xc1   : > { %4295 = vmatmul.mubr.msk.f32.vlgmr.msra.gmra.mxu0 %vm861_vm0, %v855_v5  ;;  %4298 = vmatmul.mubr.msk.f32.vlgmr.msra.gmra.mxu1 %vm861_vm0, %v857_v6 }
 0x181   : > { %v4296_v8 = vpop.f32.mrf.mxu0  ;;  %v4299_v9 = vpop.f32.mrf.mxu1 }
 0x182   : > { %v962_v11 = vadd.f32 %v4296_v8, %v960_v7  ;;  %v964_v12 = vadd.f32 %v4299_v9, %v960_v7 }
 0x183   : > { %v940_v13 = vpop.f32.mrf.mxu0  ;;  %v950_v14 = vpop.f32.mrf.mxu1 }
 0x184   : > { %966 = vst [vmem:[#allocation2] sm:$0xff] %v962_v11  ;;  %968 = vst [vmem:[#allocation2 + $0x8] sm:$0xff] %v964_v12  ;;  %v961_v15 = vadd.f32 %v959_v10, %v940_v13  ;;  %v963_v16 = vadd.f32 %v959_v10, %v950_v14 }
 0x186   : > { %965 = vst [vmem:[#allocation2 + $0x10] sm:$0xff] %v961_v15  ;;  %967 = vst [vmem:[#allocation2 + $0x18] sm:$0xff] %v963_v16 }
 0x187 PF: > { %v1019_v17 = vld [vmem:[%s5355_s4 + $0x170] sm:$0xff]  ;;  %v1018_v18 = vld [vmem:[%s5355_s4 + $0x168] sm:$0xff]  ;;  %v1016_v19 = vld [vmem:[%s5355_s4 + $0x158] sm:$0xff]  ;;  %v5070_v21 = vmov 0.0   ;;  %v1023_v6 = vlaneseq  ;;  %vm1219_vm1 = vcmask 261120   ;;  %s5071_s1 = smov 96  }
 0x188   : > { %1038 = vmatprep.subr.mxu0 %v1019_v17  ;;  %v1015_v20 = vld [vmem:[%s5355_s4 + $0x150] sm:$0xff]  ;;  %1102 = vmatprep.mubr.f32.mxu0 %v5070_v21  ;;  %v1013_v22 = vld [vmem:[%s5355_s4 + $0x140] sm:$0xff]  ;;  %v1012_v23 = vld [vmem:[%s5355_s4 + $0x138] sm:$0xff]  ;;  %s5072_s2 = smov 64   ;;  %vm1307_vm2 = vcmask 130048   ;;  %s5073_s3 = smov 32  }
 0x189   : > { %1039 = vmatpush1.msra.mxu0 %v1018_v18  ;;  %v1010_v24 = vld [vmem:[%s5355_s4 + $0x128] sm:$0xff]  ;;  %v1009_v25 = vld [vmem:[%s5355_s4 + $0x120] sm:$0xff]  ;;  %v1007_v26 = vld [vmem:[%s5355_s4 + $0x110] sm:$0xff]  ;;  %v5464_v7 = vshrl.u32 %v1023_v6, 7  ;;  %s6058_s6 = sld [smem:[#allocation34_spill]]  ;;  %p4113_p6 = scmp.ne.s32.totalorder %s5045_s24, 1 }
 0x18a   : > { %1040 = vmatprep.subr.mxu0 %v1016_v19  ;;  %v1006_v27 = vld [vmem:[%s5355_s4 + $0x108] sm:$0xff]  ;;  %v1004_v28 = vld [vmem:[%s5355_s4 + $0xf8] sm:$0xff]  ;;  %v1003_v29 = vld [vmem:[%s5355_s4 + $0xf0] sm:$0xff]  ;;  %s6060_s23 = sld [smem:[#allocation35_spill]] }
 0x18b   : > { %1041 = vmatpush1.msra.mxu0 %v1015_v20  ;;  %v1001_v30 = vld [vmem:[%s5355_s4 + $0xe0] sm:$0xff]  ;;  %v1000_v32 = vld [vmem:[%s5355_s4 + $0xd8] sm:$0xff]  ;;  %v998_v35 = vld [vmem:[%s5355_s4 + $0xc8] sm:$0xff]  ;;  %v1025_v8 = vsub.s32 0, %v5464_v7  ;;  %v1029_v13 = vsub.s32 1, %v5464_v7  ;;  %v1033_v20 = vsub.s32 2, %v5464_v7 }
 0x18c   : > { %1042 = vmatprep.subr.mxu0 %v1013_v22  ;;  %v1020_v33 = vld [vmem:[%s5355_s4 + $0x178] sm:$0xff]  ;;  %v1017_v34 = vld [vmem:[%s5355_s4 + $0x160] sm:$0xff]  ;;  %v1014_v37 = vld [vmem:[%s5355_s4 + $0x148] sm:$0xff] }
 0x18d   : > { %1043 = vmatpush1.msra.mxu0 %v1012_v23  ;;  %v5422_v31 = vld [vmem:[#allocation2 + $0x10] sm:$0xff]  ;;  %4300 = vmatprep.subr.mxu1 %v1020_v33  ;;  %v995_v38 = vld [vmem:[%s5355_s4 + $0xb0] sm:$0xff]  ;;  %v992_v41 = vld [vmem:[%s5355_s4 + $0x98] sm:$0xff] }
 0x18e   : > { %1044 = vmatprep.subr.mxu0 %v1010_v24  ;;  %4332 = vmatprep.mubr.f32.mxu1 %v5422_v31  ;;  %v997_v36 = vld [vmem:[%s5355_s4 + $0xc0] sm:$0xff]  ;;  %v994_v39 = vld [vmem:[%s5355_s4 + $0xa8] sm:$0xff]  ;;  %v1011_v40 = vld [vmem:[%s5355_s4 + $0x130] sm:$0xff] }
 0x18f   : > { %1045 = vmatpush1.msra.mxu0 %v1009_v25  ;;  %4301 = vmatpush3.msra.mxu1 %v1020_v33  ;;  %v991_v42 = vld [vmem:[%s5355_s4 + $0x90] sm:$0xff]  ;;  %v1008_v43 = vld [vmem:[%s5355_s4 + $0x118] sm:$0xff]  ;;  %v989_v44 = vld [vmem:[%s5355_s4 + $0x80] sm:$0xff] }
 0x190   : > { %1046 = vmatprep.subr.mxu0 %v1007_v26  ;;  %4302 = vmatprep.subr.mxu1 %v1017_v34  ;;  %v988_v45 = vld [vmem:[%s5355_s4 + $0x78] sm:$0xff]  ;;  %v1005_v46 = vld [vmem:[%s5355_s4 + $0x100] sm:$0xff]  ;;  %v986_v47 = vld [vmem:[%s5355_s4 + $0x68] sm:$0xff]  ;;  %s6061_s28 = scalar_lea.vmem %s6060_s23, %s5363_s30 }
 0x191   : > { %1047 = vmatpush1.msra.mxu0 %v1006_v27  ;;  %4303 = vmatpush3.msra.mxu1 %v1017_v34  ;;  %v985_v48 = vld [vmem:[%s5355_s4 + $0x60] sm:$0xff]  ;;  %v1002_v49 = vld [vmem:[%s5355_s4 + $0xe8] sm:$0xff]  ;;  %v983_v50 = vld [vmem:[%s5355_s4 + $0x50] sm:$0xff] }
 0x192   : > { %1048 = vmatprep.subr.mxu0 %v1004_v28  ;;  %4304 = vmatprep.subr.mxu1 %v1014_v37  ;;  %v982_v51 = vld [vmem:[%s5355_s4 + $0x48] sm:$0xff]  ;;  %v999_v52 = vld [vmem:[%s5355_s4 + $0xd0] sm:$0xff]  ;;  %v980_v53 = vld [vmem:[%s5355_s4 + $0x38] sm:$0xff] }
 0x193   : > { %1049 = vmatpush1.msra.mxu0 %v1003_v29  ;;  %4305 = vmatpush3.msra.mxu1 %v1014_v37  ;;  %v979_v54 = vld [vmem:[%s5355_s4 + $0x30] sm:$0xff]  ;;  %v996_v55 = vld [vmem:[%s5355_s4 + $0xb8] sm:$0xff]  ;;  %v977_v56 = vld [vmem:[%s5355_s4 + $0x20] sm:$0xff] }
 0x194   : > { %1050 = vmatprep.subr.mxu0 %v1001_v30  ;;  %4306 = vmatprep.subr.mxu1 %v1011_v40  ;;  %v976_v57 = vld [vmem:[%s5355_s4 + $0x18] sm:$0xff]  ;;  %v993_v58 = vld [vmem:[%s5355_s4 + $0xa0] sm:$0xff]  ;;  %v974_v59 = vld [vmem:[%s5355_s4 + $0x8] sm:$0xff] }
 0x195   : > { %1051 = vmatpush1.msra.mxu0 %v1000_v32  ;;  %4307 = vmatpush3.msra.mxu1 %v1011_v40  ;;  %v973_v60 = vld [vmem:[%s5355_s4] sm:$0xff]  ;;  %v990_v61 = vld [vmem:[%s5355_s4 + $0x88] sm:$0xff]  ;;  %v987_v62 = vld [vmem:[%s5355_s4 + $0x70] sm:$0xff] }
 0x196   : > { %1052 = vmatprep.subr.mxu0 %v998_v35  ;;  %4308 = vmatprep.subr.mxu1 %v1008_v43  ;;  %v984_v63 = vld [vmem:[%s5355_s4 + $0x58] sm:$0xff]  ;;  %v981_v1 = vld [vmem:[%s5355_s4 + $0x40] sm:$0xff]  ;;  %v978_v2 = vld [vmem:[%s5355_s4 + $0x28] sm:$0xff] }
 0x197   : > { %1053 = vmatpush1.msra.mxu0 %v997_v36  ;;  %4309 = vmatpush3.msra.mxu1 %v1008_v43  ;;  %v970_v0 = vld [vmem:[#allocation2] sm:$0xff]  ;;  %v971_v4 = vld [vmem:[#allocation2 + $0x18] sm:$0xff]  ;;  %v972_v5 = vld [vmem:[#allocation2 + $0x8] sm:$0xff] }
 0x198   : > { %1054 = vmatprep.subr.mxu0 %v995_v38  ;;  %4310 = vmatprep.subr.mxu1 %v1005_v46  ;;  %v975_v3 = vld [vmem:[%s5355_s4 + $0x10] sm:$0xff] }
 0x199   : > { %1055 = vmatpush1.msra.mxu0 %v994_v39  ;;  %4311 = vmatpush3.msra.mxu1 %v1005_v46  ;;  %v1021_v9 = vld [vmem:[%s5381_s29] sm:$0x7]  ;;  %s6059_s29 = scalar_lea.vmem %s6058_s6, %s5363_s30 }
 0x19a   : > { %1056 = vmatprep.subr.mxu0 %v992_v41  ;;  %4312 = vmatprep.subr.mxu1 %v1002_v49  ;;  %v5470_v10 = vrot.slane %v1021_v9, %v1025_v8  ;;  %v5482_v16 = vrot.slane %v1021_v9, %v1029_v13  ;;  %v5507_v23 = vrot.slane %v1021_v9, %v1033_v20  ;;  %v5547_v39 = vld [vmem:[#allocation7] ss:$0 sm:$0xff] }
 0x19b   : > { %1057 = vmatpush1.msra.mxu0 %v991_v42  ;;  %4313 = vmatpush3.msra.mxu1 %v1002_v49 }
 0x19c   : > { %1058 = vmatprep.subr.mxu0 %v989_v44  ;;  %4314 = vmatprep.subr.mxu1 %v999_v52 }
 0x19d   : > { %1059 = vmatpush1.msra.mxu0 %v988_v45  ;;  %4315 = vmatpush3.msra.mxu1 %v999_v52 }
 0x19e   : > { %1060 = vmatprep.subr.mxu0 %v986_v47  ;;  %4316 = vmatprep.subr.mxu1 %v996_v55 }
 0x19f   : > { %1061 = vmatpush1.msra.mxu0 %v985_v48  ;;  %4317 = vmatpush3.msra.mxu1 %v996_v55 }
 0x1a0   : > { %1062 = vmatprep.subr.mxu0 %v983_v50  ;;  %4318 = vmatprep.subr.mxu1 %v993_v58 }
 0x1a1   : > { %1063 = vmatpush1.msra.mxu0 %v982_v51  ;;  %4319 = vmatpush3.msra.mxu1 %v993_v58 }
 0x1a2   : > { %1064 = vmatprep.subr.mxu0 %v980_v53  ;;  %4320 = vmatprep.subr.mxu1 %v990_v61 }
 0x1a3   : > { %1065 = vmatpush1.msra.mxu0 %v979_v54  ;;  %4321 = vmatpush3.msra.mxu1 %v990_v61 }
 0x1a4   : > { %1066 = vmatprep.subr.mxu0 %v977_v56  ;;  %4322 = vmatprep.subr.mxu1 %v987_v62 }
 0x1a5   : > { %1067 = vmatpush1.msra.mxu0 %v976_v57  ;;  %4323 = vmatpush3.msra.mxu1 %v987_v62 }
 0x1a6   : > { %1068 = vmatprep.subr.mxu0 %v974_v59  ;;  %4324 = vmatprep.subr.mxu1 %v984_v63 }
 0x1a7   : > { %1069 = vmatpush1.msra.mxu0 %v973_v60  ;;  %4325 = vmatpush3.msra.mxu1 %v984_v63 }
 0x1a8   : > { %1103 = vmatmul.mubr.f32.vlgmr.msra.gmra.mxu0 %v5422_v31  ;;  %4326 = vmatprep.subr.mxu1 %v981_v1 }
 0x1a9   : > { %1108 = vmatprep.mubr.f32.mxu0 %v5070_v21  ;;  %4327 = vmatpush3.msra.mxu1 %v981_v1 }
 0x1aa   : > { %4328 = vmatprep.subr.mxu1 %v978_v2 }
 0x1ab   : > { %4329 = vmatpush3.msra.mxu1 %v978_v2 }
 0x1ac   : > { %1109 = vmatmul.mubr.f32.gmra.mxu0 %v970_v0  ;;  %4330 = vmatprep.subr.mxu1 %v975_v3 }
 0x1ad   : > { %1114 = vmatprep.mubr.f32.mxu0 %v5070_v21  ;;  %4331 = vmatpush3.msra.mxu1 %v975_v3 }
 0x1ae   : > { %4333 = vmatmul.mubr.f32.vlgmr.msra.gmra.mxu1 %v970_v0 }
 0x1af   : > { %4335 = vmatprep.mubr.f32.mxu1 %v971_v4 }
 0x1b0   : > { %1115 = vmatmul.mubr.f32.gmra.mxu0 %v971_v4 }
 0x1b1   : > { %1120 = vmatprep.mubr.f32.mxu0 %v5070_v21 }
 0x1b2   : > { %4336 = vmatmul.mubr.f32.gmra.mxu1 %v972_v5 }
 0x1b4   : > { %1121 = vmatmul.mubr.f32.gmra.mxu0 %v972_v5 }
 0x268   : > { %v1104_v11 = vpop.f32.mrf.mxu0 }
 0x269   : > { %v5473_v12 = vadd.f32 %v1104_v11, %v5470_v10 }
 0x26a   : > { %v1106_v14 = vpop.f32.mrf.mxu0 }
 0x26b   : > { %1413 = vrot.lane.b32.xlu1 %v5473_v12, %s5071_s1  ;;  %4342 = vmatprep.mubr.msk.f32.mxu1 %vm1219_vm1, %v5473_v12  ;;  %v5488_v19 = vadd.f32 %v1106_v14, %v5482_v16 }
 0x26c   : > { %v1110_v15 = vpop.f32.mrf.mxu0 }
 0x26d   : > { %v5510_v24 = vadd.f32 %v1110_v15, %v5470_v10 }
 0x26e   : > { %v1112_v17 = vpop.f32.mrf.mxu0  ;;  %v4334_v22 = vpop.f32.mrf.mxu1 }
 0x26f   : > { %v5485_v18 = vadd.f32 %v1112_v17, %v5482_v16  ;;  %v5513_v26 = vadd.f32 %v4334_v22, %v5507_v23 }
 0x270   : > { %v1193_v25 = vpop.f32.mrf.mxu1  ;;  %v5557_v46 = vpop.f32.mrf.mxu0 }
 0x271   : > { %1419 = vrot.lane.b32.xlu0 %v5485_v18, %s5071_s1  ;;  %4338 = vmatprep.subr.msk.mxu1 %vm1219_vm1, %v5485_v18  ;;  %v5516_v27 = vadd.f32 %v1193_v25, %v5507_v23 }
 0x272   : > { %1624 = vrot.lane.b32.xlu1 %v5485_v18, %s5072_s2  ;;  %4339 = vmatpush3.xpose.msk.msra.mxu1 %vm1219_vm1, %v5485_v18  ;;  %v4337_v28 = vpop.f32.mrf.mxu1  ;;  %v5559_v47 = vpop.f32.mrf.mxu0 }
 0x273   : > { %4340 = vmatprep.subr.msk.mxu1 %vm1219_vm1, %v5488_v19  ;;  %v5531_v29 = vadd.f32 %v4337_v28, %v5507_v23 }
 0x274   : > { %v5545_v38 = vpop.f32.mrf.mxu1  ;;  %v5561_v48 = vpop.f32.mrf.mxu0 }
 0x275   : > { %1417 = vrot.lane.b32.xlu0 %v5488_v19, %s5071_s1 }
 0x276   : > { %1622 = vrot.lane.b32.xlu1 %v5488_v19, %s5072_s2  ;;  %4341 = vmatpush3.xpose.msk.msra.mxu1 %vm1219_vm1, %v5488_v19  ;;  %v5563_v49 = vpop.f32.mrf.mxu0 }
 0x277   : > { %4345 = vmatprep.subr.mxu1 %v5513_v26 }
 0x279   : > { %1415 = vrot.lane.b32.xlu0 %v5510_v24, %s5071_s1  ;;  %4343 = vmatmul.mubr.msk.f32.vlgmr.msra.gmra.mxu1 %vm1219_vm1, %v5510_v24 }
 0x27a   : > { %1620 = vrot.lane.b32.xlu1 %v5510_v24, %s5072_s2  ;;  %4346 = vmatpush3.msra.mxu1 %v5513_v26 }
 0x27b   : > { %4347 = vmatprep.subr.mxu1 %v5516_v27 }
 0x27c   : > { %4348 = vmatpush3.msra.mxu1 %v5516_v27 }
 0x27d   : > { %1618 = vrot.lane.b32.xlu0 %v5473_v12, %s5072_s2 }
 0x2dd   : > { %v1414_v30 = vpop.permute.xlu1 %1413 }
 0x2de   : > { %4356 = vmatprep.mubr.msk.f32.mxu0 %vm1219_vm1, %v1414_v30 }
 0x2e3   : > { %v1420_v31 = vpop.permute.xlu0 %1419 }
 0x2e4   : > { %4352 = vmatprep.subr.msk.mxu0 %vm1219_vm1, %v1420_v31  ;;  %v1625_v32 = vpop.permute.xlu1 %1624 }
 0x2e5   : > { %4353 = vmatpush3.xpose.msk.msra.mxu0 %vm1219_vm1, %v1420_v31 }
 0x2e7   : > { %v1418_v33 = vpop.permute.xlu0 %1417 }
 0x2e8   : > { %4354 = vmatprep.subr.msk.mxu0 %vm1219_vm1, %v1418_v33  ;;  %v1623_v35 = vpop.permute.xlu1 %1622 }
 0x2e9   : > { %4355 = vmatpush3.xpose.msk.msra.mxu0 %vm1219_vm1, %v1418_v33 }
 0x2ea   : > { %4366 = vmatprep.subr.msk.mxu0 %vm1219_vm1, %v1625_v32 }
 0x2eb   : > { %v1416_v34 = vpop.permute.xlu0 %1415 }
 0x2ec   : > { %4357 = vmatmul.mubr.msk.f32.vlgmr.msra.gmra.mxu0 %vm1219_vm1, %v1416_v34  ;;  %v1621_v37 = vpop.permute.xlu1 %1620 }
 0x2ed   : > { %4367 = vmatpush3.xpose.msk.msra.mxu0 %vm1219_vm1, %v1625_v32 }
 0x2ee   : > { %4368 = vmatprep.subr.msk.mxu0 %vm1219_vm1, %v1623_v35 }
 0x2ef   : > { %v1619_v36 = vpop.permute.xlu0 %1618 }
 0x2f0   : > { %4370 = vmatprep.mubr.msk.f32.mxu0 %vm1219_vm1, %v1619_v36 }
 0x2f1   : > { %4369 = vmatpush3.xpose.msk.msra.mxu0 %vm1219_vm1, %v1623_v35 }
 0x2f4   : > { %4371 = vmatmul.mubr.msk.f32.vlgmr.msra.gmra.mxu0 %vm1219_vm1, %v1621_v37 }
 0x339   : > { %v4344_v40 = vpop.f32.mrf.mxu1 }
 0x33a   : > { %v1304_v41 = vadd.f32 %v4344_v40, %v5547_v39 }
 0x33b   : > { %v1298_v42 = vpop.f32.mrf.mxu1 }
 0x33c   : > { %v1299_v43 = vadd.f32 %v5547_v39, %v1298_v42  ;;  %v1311_v44 = vsel %vm1307_vm2, %v1304_v41, -inf }
 0x33d   : > { %1312 = vmax.xlane.f32.xlu1 %v1311_v44 }
 0x33e   : > { %v1308_v45 = vsel %vm1307_vm2, %v1299_v43, -inf }
 0x33f   : > { %1309 = vmax.xlane.f32.xlu0 %v1308_v45 }
 0x34e   : > { %1530 = vrot.lane.b32.xlu1 %v5513_v26, %s5071_s1 }
 0x352   : > { %1733 = vrot.lane.b32.xlu1 %v5513_v26, %s5072_s2 }
 0x3ac   : > { %v4358_v50 = vpop.f32.mrf.mxu0 }
 0x3ad   : > { %v1501_v53 = vadd.f32 %v4358_v50, %v5547_v39 }
 0x3ae   : > { %v1495_v51 = vpop.f32.mrf.mxu0 }
 0x3af   : > { %v1496_v52 = vadd.f32 %v5547_v39, %v1495_v51  ;;  %v1507_v57 = vsel %vm1307_vm2, %v1501_v53, -inf }
 0x3b1   : > { %v1504_v54 = vsel %vm1307_vm2, %v1496_v52, -inf }
 0x3b2   : > { %1505 = vmax.xlane.f32.xlu0 %v1504_v54 }
 0x3b4   : > { %v4372_v55 = vpop.f32.mrf.mxu0 }
 0x3b5   : > { %v1706_v56 = vadd.f32 %v4372_v55, %v5547_v39 }
 0x3b6   : > { %v1700_v58 = vpop.f32.mrf.mxu0  ;;  %1508 = vmax.xlane.f32.xlu0 %v1507_v57 }
 0x3b7   : > { %v1701_v59 = vadd.f32 %v5547_v39, %v1700_v58  ;;  %v1712_v61 = vsel %vm1307_vm2, %v1706_v56, -inf }
 0x3b9   : > { %v1709_v60 = vsel %vm1307_vm2, %v1701_v59, -inf }
 0x3ba   : > { %1710 = vmax.xlane.f32.xlu1 %v1709_v60  ;;  %1713 = vmax.xlane.f32.xlu0 %v1712_v61 }
 0x3c6   : > { %v1313_v62 = vpop.xlane.xlu1 %1312 }
 0x3c7   : > { %v1315_v1 = vsub.f32 %v1304_v41, %v1313_v62 }
 0x3c8   : > { %v1310_v0 = vpop.xlane.xlu0 %1309 }
 0x3c9   : > { %v1314_v2 = vsub.f32 %v1299_v43, %v1310_v0  ;;  %v1318_v3 = vmul.f32 1.442695, %v1315_v1 }
 0x3ca   : > { %v1531_v63 = vpop.permute.xlu1 %1530 }
 0x3cb   : > { %1731 = vrot.lane.b32.xlu1 %v5516_v27, %s5072_s2  ;;  %4359 = vmatprep.subr.mxu1 %v1531_v63  ;;  %v1316_v4 = vmul.f32 1.442695, %v1314_v2  ;;  %4647 = vpow2.f32 %v1318_v3 }
 0x3cd   : > { %4649 = vpow2.f32 %v1316_v4 }
 0x3ce   : > { %v1734_v40 = vpop.permute.xlu1 %1733 }
 0x3d0   : > { %1528 = vrot.lane.b32.xlu0 %v5516_v27, %s5071_s1 }
 0x3d8   : > { %v4648_v5 = vpop.eup %4647 }
 0x3d9   : > { %v1323_v9 = vsel %vm1307_vm2, %v4648_v5, 0.0 }
 0x3da   : > { %v4650_v6 = vpop.eup %4649 }
 0x3db   : > { %v1320_v11 = vsel %vm1307_vm2, %v4650_v6, 0.0 }
 0x3ef   : > { %1324 = vadd.xlane.f32.xlu0 %v1323_v9  ;;  %1321 = vadd.xlane.f32.xlu1 %v1320_v11 }
 0x43b   : > { %v1506_v14 = vpop.xlane.xlu0 %1505 }
 0x43c   : > { %v1510_v15 = vsub.f32 %v1496_v52, %v1506_v14 }
 0x43e   : > { %v1512_v17 = vmul.f32 1.442695, %v1510_v15 }
 0x43f   : > { %v1509_v20 = vpop.xlane.xlu0 %1508 }
 0x440   : > { %4651 = vpow2.f32 %v1512_v17  ;;  %v1511_v22 = vsub.f32 %v1501_v53, %v1509_v20 }
 0x442   : > { %v1514_v25 = vmul.f32 1.442695, %v1511_v22 }
 0x443   : > { %v1714_v28 = vpop.xlane.xlu0 %1713  ;;  %v1711_v41 = vpop.xlane.xlu1 %1710 }
 0x444   : > { %4653 = vpow2.f32 %v1514_v25  ;;  %v1716_v30 = vsub.f32 %v1706_v56, %v1714_v28  ;;  %v1715_v42 = vsub.f32 %v1701_v59, %v1711_v41 }
 0x446   : > { %v1719_v31 = vmul.f32 1.442695, %v1716_v30  ;;  %v1717_v43 = vmul.f32 1.442695, %v1715_v42 }
 0x447   : > { %v1732_v44 = vpop.permute.xlu1 %1731  ;;  %v1529_v45 = vpop.permute.xlu0 %1528 }
 0x448   : > { %4655 = vpow2.f32 %v1719_v31 }
 0x449   : > { %4657 = vpow2.f32 %v1717_v43 }
 0x44d   : > { %v4652_v32 = vpop.eup %4651 }
 0x44e   : > { %v1516_v33 = vsel %vm1307_vm2, %v4652_v32, 0.0 }
 0x44f   : > { %1517 = vadd.xlane.f32.xlu1 %v1516_v33 }
 0x451   : > { %v4654_v34 = vpop.eup %4653 }
 0x452   : > { %v1519_v35 = vsel %vm1307_vm2, %v4654_v34, 0.0 }
 0x453   : > { %1520 = vadd.xlane.f32.xlu0 %v1519_v35 }
 0x455   : > { %v4656_v36 = vpop.eup %4655 }
 0x456   : > { %v1724_v37 = vsel %vm1307_vm2, %v4656_v36, 0.0  ;;  %v4658_v52 = vpop.eup %4657 }
 0x457   : > { %1725 = vadd.xlane.f32.xlu0 %v1724_v37 }
 0x460   : > { %1825 = vrot.lane.b32.xlu1 %v5488_v19, %s5073_s3  ;;  %v1721_v19 = vsel %vm1307_vm2, %v4658_v52, 0.0 }
 0x46d   : > { %1827 = vrot.lane.b32.xlu0 %v5485_v18, %s5073_s3 }
 0x471   : > { %1821 = vrot.lane.b32.xlu0 %v5473_v12, %s5073_s3 }
 0x478   : > { %v1322_v50 = vpop.xlane.xlu1 %1321  ;;  %v1325_v51 = vpop.xlane.xlu0 %1324 }
 0x479   : > { %4659 = vrcp.f32 %v1322_v50 }
 0x47a   : > { %4661 = vrcp.f32 %v1325_v51 }
 0x484   : > { %1722 = vadd.xlane.f32.xlu1 %v1721_v19 }
 0x486   : > { %v4660_v53 = vpop.eup %4659 }
 0x487   : > { %v4662_v54 = vpop.eup %4661  ;;  %v1328_v55 = vmul.f32 %v4660_v53, %v4650_v6  ;;  %v5605_v6 = vadd.f32 %v5545_v38, %v5507_v23  ;;  %v5640_v53 = vadd.f32 %v5559_v47, %v5482_v16 }
 0x488   : > { %v1329_v56 = vmul.f32 %v4662_v54, %v4648_v5 }
 0x489   : > { %4349 = vmatprep.mubr.msk.f32.mxu1 %vm1307_vm2, %v1328_v55 }
 0x48a   : > { %4350 = vmatmul.mubr.msk.f32.vlgmr.msra.gmra.mxu1 %vm1307_vm2, %v1329_v56 }
 0x48b   : > { %4360 = vmatpush3.msra.mxu1 %v1531_v63 }
 0x48c   : > { %4361 = vmatprep.subr.mxu1 %v1529_v45 }
 0x48d   : > { %4362 = vmatpush3.msra.mxu1 %v1529_v45  ;;  %v5629_v45 = vadd.f32 %v5563_v49, %v5482_v16  ;;  %v5659_v49 = vld [vmem:[#allocation7 + $0x1] ss:$0 sm:$0xff] }
 0x48e   : > { %4373 = vmatprep.subr.mxu1 %v1734_v40 }
 0x495   : > { %1823 = vrot.lane.b32.xlu1 %v5510_v24, %s5073_s3 }
 0x4d8   : > { %v1518_v12 = vpop.xlane.xlu1 %1517 }
 0x4d9   : > { %4663 = vrcp.f32 %v1518_v12 }
 0x4dc   : > { %v1521_v18 = vpop.xlane.xlu0 %1520  ;;  %v1826_v24 = vpop.permute.xlu1 %1825 }
 0x4dd   : > { %4665 = vrcp.f32 %v1521_v18 }
 0x4e0   : > { %v1726_v60 = vpop.xlane.xlu0 %1725 }
 0x4e1   : > { %4667 = vrcp.f32 %v1726_v60 }
 0x4e4   : > { %v1828_v62 = vpop.permute.xlu0 %1827 }
 0x4e6   : > { %v4664_v57 = vpop.eup %4663 }
 0x4e7   : > { %v1524_v58 = vmul.f32 %v4664_v57, %v4652_v32 }
 0x4e8   : > { %v1822_v4 = vpop.permute.xlu0 %1821 }
 0x4e9   : > { %4363 = vmatprep.mubr.msk.f32.mxu1 %vm1307_vm2, %v1524_v58 }
 0x4ea   : > { %v4666_v59 = vpop.eup %4665 }
 0x4eb   : > { %v1525_v61 = vmul.f32 %v4666_v59, %v4654_v34 }
 0x4ed   : > { %4364 = vmatmul.mubr.msk.f32.vlgmr.msra.gmra.mxu1 %vm1307_vm2, %v1525_v61 }
 0x4ee   : > { %4374 = vmatpush3.msra.mxu1 %v1734_v40  ;;  %v4668_v0 = vpop.eup %4667 }
 0x4ef   : > { %4375 = vmatprep.subr.mxu1 %v1732_v44  ;;  %v1730_v3 = vmul.f32 %v4668_v0, %v4656_v36 }
 0x4f0   : > { %4376 = vmatpush3.msra.mxu1 %v1732_v44 }
 0x4f1   : > { %4380 = vmatprep.subr.msk.mxu1 %vm1219_vm1, %v1828_v62 }
 0x50d   : > { %v1723_v63 = vpop.xlane.xlu1 %1722 }
 0x50e   : > { %4669 = vrcp.f32 %v1723_v63 }
 0x511   : > { %v1824_v5 = vpop.permute.xlu1 %1823 }
 0x51b   : > { %v4670_v1 = vpop.eup %4669 }
 0x51c   : > { %v1729_v2 = vmul.f32 %v4670_v1, %v4658_v52 }
 0x51e   : > { %4377 = vmatprep.mubr.msk.f32.mxu1 %vm1307_vm2, %v1729_v2 }
 0x51f   : > { %4378 = vmatmul.mubr.msk.f32.vlgmr.msra.gmra.mxu1 %vm1307_vm2, %v1730_v3 }
 0x520   : > { %4381 = vmatpush3.xpose.msk.msra.mxu1 %vm1219_vm1, %v1828_v62  ;;  %4384 = vmatprep.mubr.msk.f32.mxu1 %vm1219_vm1, %v1822_v4 }
 0x521   : > { %4382 = vmatprep.subr.msk.mxu1 %vm1219_vm1, %v1826_v24 }
 0x524   : > { %4383 = vmatpush3.xpose.msk.msra.mxu1 %vm1219_vm1, %v1826_v24 }
 0x525   : > { %4401 = vmatprep.subr.mxu1 %v5531_v29 }
 0x527   : > { %4385 = vmatmul.mubr.msk.f32.vlgmr.msra.gmra.mxu1 %vm1219_vm1, %v1824_v5 }
 0x528   : > { %4402 = vmatpush3.msra.mxu1 %v5531_v29 }
 0x529   : > { %4403 = vmatprep.subr.mxu1 %v5605_v6 }
 0x52a   : > { %4404 = vmatpush3.msra.mxu1 %v5605_v6 }
 0x54a   : > { %v4351_v9 = vpop.f32.mrf.mxu1 }
 0x54b   : > { %1412 = vst.msk [vmem:[#allocation3 + $0x8] sm:$0xff] %vm1219_vm1, %v4351_v9 }
 0x54c   : > { %v1402_v11 = vpop.f32.mrf.mxu1 }
 0x54d   : > { %1411 = vst.msk [vmem:[#allocation3] sm:$0xff] %vm1219_vm1, %v1402_v11 }
 0x5ad   : > { %v4365_v14 = vpop.f32.mrf.mxu1 }
 0x5ae   : > { %1617 = vst.msk [vmem:[#allocation3 + $0x28] sm:$0xff] %vm1219_vm1, %v4365_v14 }
 0x5af   : > { %v1606_v15 = vpop.f32.mrf.mxu1 }
 0x5b0   : > { %1616 = vst.msk [vmem:[#allocation3 + $0x20] sm:$0xff] %vm1219_vm1, %v1606_v15 }
 0x5df   : > { %v4379_v23 = vpop.f32.mrf.mxu1 }
 0x5e0   : > { %1820 = vst.msk [vmem:[#allocation3 + $0x48] sm:$0xff] %vm1219_vm1, %v4379_v23 }
 0x5e1   : > { %v1809_v38 = vpop.f32.mrf.mxu1 }
 0x5e2   : > { %1819 = vst.msk [vmem:[#allocation3 + $0x40] sm:$0xff] %vm1219_vm1, %v1809_v38 }
 0x5e7   : > { %v4386_v17 = vpop.f32.mrf.mxu1 }
 0x5e8   : > { %v1909_v20 = vadd.f32 %v4386_v17, %v5547_v39 }
 0x5e9   : > { %v1903_v22 = vpop.f32.mrf.mxu1 }
 0x5ea   : > { %v1904_v25 = vadd.f32 %v5547_v39, %v1903_v22  ;;  %v1915_v28 = vsel %vm1307_vm2, %v1909_v20, -inf }
 0x5eb   : > { %1916 = vmax.xlane.f32.xlu1 %v1915_v28 }
 0x5ec   : > { %v1912_v30 = vsel %vm1307_vm2, %v1904_v25, -inf }
 0x5ed   : > { %1913 = vmax.xlane.f32.xlu0 %v1912_v30 }
 0x5fc   : > { %1936 = vrot.lane.b32.xlu1 %v5513_v26, %s5073_s3 }
 0x674   : > { %v1917_v31 = vpop.xlane.xlu1 %1916 }
 0x675   : > { %v1919_v32 = vsub.f32 %v1909_v20, %v1917_v31 }
 0x676   : > { %v1914_v33 = vpop.xlane.xlu0 %1913 }
 0x677   : > { %v1922_v34 = vmul.f32 1.442695, %v1919_v32  ;;  %v1918_v35 = vsub.f32 %v1904_v25, %v1914_v33 }
 0x678   : > { %v1937_v36 = vpop.permute.xlu1 %1936 }
 0x679   : > { %4671 = vpow2.f32 %v1922_v34  ;;  %v1920_v37 = vmul.f32 1.442695, %v1918_v35  ;;  %4387 = vmatprep.subr.mxu0 %v1937_v36 }
 0x67a   : > { %4388 = vmatpush3.msra.mxu0 %v1937_v36 }
 0x67b   : > { %4673 = vpow2.f32 %v1920_v37 }
 0x686   : > { %v4672_v39 = vpop.eup %4671 }
 0x687   : > { %v1927_v40 = vsel %vm1307_vm2, %v4672_v39, 0.0 }
 0x688   : > { %v4674_v41 = vpop.eup %4673  ;;  %1928 = vadd.xlane.f32.xlu0 %v1927_v40 }
 0x689   : > { %v1924_v42 = vsel %vm1307_vm2, %v4674_v41, 0.0 }
 0x68c   : > { %1925 = vadd.xlane.f32.xlu0 %v1924_v42 }
 0x6a2   : > { %1934 = vrot.lane.b32.xlu0 %v5516_v27, %s5073_s3  ;;  %v5635_v27 = vadd.f32 %v5557_v46, %v5470_v10  ;;  %v5653_v46 = vadd.f32 %v5561_v48, %v5470_v10 }
 0x711   : > { %v1929_v26 = vpop.xlane.xlu0 %1928 }
 0x712   : > { %4675 = vrcp.f32 %v1929_v26 }
 0x715   : > { %v1926_v43 = vpop.xlane.xlu0 %1925 }
 0x716   : > { %4677 = vrcp.f32 %v1926_v43 }
 0x719   : > { %v1935_v44 = vpop.permute.xlu0 %1934 }
 0x71a   : > { %4389 = vmatprep.subr.mxu0 %v1935_v44 }
 0x71b   : > { %4390 = vmatpush3.msra.mxu0 %v1935_v44 }
 0x71c   : > { %4394 = vmatprep.subr.msk.mxu0 %vm1219_vm1, %v5629_v45 }
 0x71f   : > { %v4676_v50 = vpop.eup %4675 }
 0x720   : > { %v1933_v19 = vmul.f32 %v4676_v50, %v4672_v39 }
 0x723   : > { %v4678_v51 = vpop.eup %4677 }
 0x724   : > { %v1932_v52 = vmul.f32 %v4678_v51, %v4674_v41 }
 0x726   : > { %4391 = vmatprep.mubr.msk.f32.mxu0 %vm1307_vm2, %v1932_v52 }
 0x727   : > { %4392 = vmatmul.mubr.msk.f32.vlgmr.msra.gmra.mxu0 %vm1307_vm2, %v1933_v19 }
 0x728   : > { %4395 = vmatpush3.xpose.msk.msra.mxu0 %vm1219_vm1, %v5629_v45  ;;  %4398 = vmatprep.mubr.msk.f32.mxu0 %vm1219_vm1, %v5635_v27 }
 0x729   : > { %4396 = vmatprep.subr.msk.mxu0 %vm1219_vm1, %v5640_v53 }
 0x72c   : > { %4397 = vmatpush3.xpose.msk.msra.mxu0 %vm1219_vm1, %v5640_v53 }
 0x72f   : > { %4399 = vmatmul.mubr.msk.f32.vlgmr.msra.gmra.mxu0 %vm1219_vm1, %v5653_v46 }
 0x7e7   : > { %v4393_v16 = vpop.f32.mrf.mxu0 }
 0x7e8   : > { %2023 = vst.msk [vmem:[#allocation3 + $0x68] sm:$0xff] %vm1219_vm1, %v4393_v16 }
 0x7e9   : > { %v2012_v47 = vpop.f32.mrf.mxu0 }
 0x7ea   : > { %2022 = vst.msk [vmem:[#allocation3 + $0x60] sm:$0xff] %vm1219_vm1, %v2012_v47 }
 0x7ef   : > { %v4400_v54 = vpop.f32.mrf.mxu0 }
 0x7f0   : > { %v2116_v55 = vadd.f32 %v4400_v54, %v5659_v49 }
 0x7f1   : > { %v2110_v56 = vpop.f32.mrf.mxu0 }
 0x7f2   : > { %v2111_v12 = vadd.f32 %v5659_v49, %v2110_v56  ;;  %v2122_v10 = vsel %vm1307_vm2, %v2116_v55, -inf }
 0x7f3   : > { %2123 = vmax.xlane.f32.xlu0 %v2122_v10 }
 0x7f4   : > { %v2119_v48 = vsel %vm1307_vm2, %v2111_v12, -inf }
 0x7f5   : > { %2120 = vmax.xlane.f32.xlu1 %v2119_v48 }
 0x806   : > { %2231 = vrot.lane.b32.xlu1 %v5629_v45, %s5071_s1 }
 0x80a   : > { %2225 = vrot.lane.b32.xlu1 %v5635_v27, %s5071_s1 }
 0x87c   : > { %v2124_v18 = vpop.xlane.xlu0 %2123 }
 0x87d   : > { %v2126_v57 = vsub.f32 %v2116_v55, %v2124_v18 }
 0x87e   : > { %v2121_v58 = vpop.xlane.xlu1 %2120 }
 0x87f   : > { %v2129_v59 = vmul.f32 1.442695, %v2126_v57  ;;  %v2125_v60 = vsub.f32 %v2111_v12, %v2121_v58 }
 0x881   : > { %4679 = vpow2.f32 %v2129_v59  ;;  %v2127_v61 = vmul.f32 1.442695, %v2125_v60 }
 0x882   : > { %v2232_v62 = vpop.permute.xlu1 %2231 }
 0x883   : > { %4681 = vpow2.f32 %v2127_v61  ;;  %4408 = vmatprep.subr.msk.mxu1 %vm1219_vm1, %v2232_v62 }
 0x886   : > { %v2226_v2 = vpop.permute.xlu1 %2225 }
 0x88e   : > { %v4680_v24 = vpop.eup %4679 }
 0x88f   : > { %v2134_v63 = vsel %vm1307_vm2, %v4680_v24, 0.0 }
 0x890   : > { %v4682_v0 = vpop.eup %4681  ;;  %2135 = vadd.xlane.f32.xlu0 %v2134_v63 }
 0x891   : > { %v2131_v1 = vsel %vm1307_vm2, %v4682_v0, 0.0 }
 0x892   : > { %2132 = vadd.xlane.f32.xlu1 %v2131_v1 }
 0x8a3   : > { %2227 = vrot.lane.b32.xlu1 %v5653_v46, %s5071_s1 }
 0x8a6   : > { %2229 = vrot.lane.b32.xlu0 %v5640_v53, %s5071_s1 }
 0x919   : > { %v2136_v3 = vpop.xlane.xlu0 %2135 }
 0x91a   : > { %4683 = vrcp.f32 %v2136_v3 }
 0x91b   : > { %v2133_v4 = vpop.xlane.xlu1 %2132 }
 0x91c   : > { %4685 = vrcp.f32 %v2133_v4 }
 0x91d   : > { %v2230_v15 = vpop.permute.xlu0 %2229 }
 0x91f   : > { %v2228_v23 = vpop.permute.xlu1 %2227 }
 0x927   : > { %v4684_v5 = vpop.eup %4683 }
 0x928   : > { %v2140_v14 = vmul.f32 %v4684_v5, %v4680_v24 }
 0x929   : > { %v4686_v9 = vpop.eup %4685 }
 0x92a   : > { %v2139_v11 = vmul.f32 %v4686_v9, %v4682_v0 }
 0x92c   : > { %4405 = vmatprep.mubr.msk.f32.mxu1 %vm1307_vm2, %v2139_v11 }
 0x92d   : > { %4406 = vmatmul.mubr.msk.f32.vlgmr.msra.gmra.mxu1 %vm1307_vm2, %v2140_v14 }
 0x92e   : > { %4409 = vmatpush3.xpose.msk.msra.mxu1 %vm1219_vm1, %v2232_v62  ;;  %4412 = vmatprep.mubr.msk.f32.mxu1 %vm1219_vm1, %v2226_v2 }
 0x92f   : > { %4410 = vmatprep.subr.msk.mxu1 %vm1219_vm1, %v2230_v15 }
 0x932   : > { %4411 = vmatpush3.xpose.msk.msra.mxu1 %vm1219_vm1, %v2230_v15 }
 0x935   : > { %4413 = vmatmul.mubr.msk.f32.vlgmr.msra.gmra.mxu1 %vm1219_vm1, %v2228_v23 }
 0x9ed   : > { %v4407_v38 = vpop.f32.mrf.mxu1 }
 0x9ee   : > { %2224 = vst.msk [vmem:[#allocation3 + $0x18] sm:$0xff] %vm1219_vm1, %v4407_v38 }
 0x9ef   : > { %v2213_v17 = vpop.f32.mrf.mxu1 }
 0x9f0   : > { %2223 = vst.msk [vmem:[#allocation3 + $0x10] sm:$0xff] %vm1219_vm1, %v2213_v17 }
 0x9f5   : > { %v4414_v20 = vpop.f32.mrf.mxu1 }
 0x9f6   : > { %v2313_v22 = vadd.f32 %v4414_v20, %v5659_v49  ;;  %v2839_v20 = vld [vmem:[%s5401_s0 + $0x18] sm:$0xff] }
 0x9f7   : > { %v2307_v25 = vpop.f32.mrf.mxu1 }
 0x9f8   : > { %v2308_v28 = vadd.f32 %v5659_v49, %v2307_v25  ;;  %v2319_v30 = vsel %vm1307_vm2, %v2313_v22, -inf  ;;  %v2838_v25 = vld [vmem:[%s5401_s0 + $0x10] sm:$0xff] }
 0x9f9   : > { %2320 = vmax.xlane.f32.xlu1 %v2319_v30  ;;  %v2837_v30 = vld [vmem:[%s5401_s0 + $0x8] sm:$0xff] }
 0x9fa   : > { %v2316_v31 = vsel %vm1307_vm2, %v2308_v28, -inf }
 0x9fb   : > { %2317 = vmax.xlane.f32.xlu0 %v2316_v31  ;;  %v2836_v31 = vld [vmem:[%s5401_s0] sm:$0xff] }
 0xa0a   : > { %2342 = vrot.lane.b32.xlu1 %v5531_v29, %s5071_s1 }
 0xa0e   : > { %2436 = vrot.lane.b32.xlu1 %v5629_v45, %s5072_s2 }
 0xa12   : > { %2434 = vrot.lane.b32.xlu1 %v5640_v53, %s5072_s2 }
 0xa16   : > { %2432 = vrot.lane.b32.xlu1 %v5653_v46, %s5072_s2 }
 0xa82   : > { %v2321_v32 = vpop.xlane.xlu1 %2320 }
 0xa83   : > { %v2323_v33 = vsub.f32 %v2313_v22, %v2321_v32  ;;  %v2851_v32 = vld [vmem:[%s5401_s0 + $0x78] sm:$0xff] }
 0xa84   : > { %v2318_v34 = vpop.xlane.xlu0 %2317 }
 0xa85   : > { %v2326_v35 = vmul.f32 1.442695, %v2323_v33  ;;  %v2322_v36 = vsub.f32 %v2308_v28, %v2318_v34  ;;  %v2852_v28 = vld [vmem:[#allocation3] sm:$0xff]  ;;  %v2853_v33 = vld [vmem:[#allocation3 + $0x8] sm:$0xff] }
 0xa86   : > { %v2343_v37 = vpop.permute.xlu1 %2342  ;;  %v2850_v34 = vld [vmem:[%s5401_s0 + $0x70] sm:$0xff] }
 0xa87   : > { %4687 = vpow2.f32 %v2326_v35  ;;  %v2324_v39 = vmul.f32 1.442695, %v2322_v36  ;;  %4415 = vmatprep.subr.mxu0 %v2343_v37  ;;  %v2854_v35 = vld [vmem:[#allocation3 + $0x10] sm:$0xff] }
 0xa88   : > { %4416 = vmatpush3.msra.mxu0 %v2343_v37  ;;  %v2849_v36 = vld [vmem:[%s5401_s0 + $0x68] sm:$0xff] }
 0xa89   : > { %4689 = vpow2.f32 %v2324_v39  ;;  %v2855_v37 = vld [vmem:[#allocation3 + $0x18] sm:$0xff]  ;;  %v2848_v39 = vld [vmem:[%s5401_s0 + $0x60] sm:$0xff] }
 0xa8a   : > { %v2437_v51 = vpop.permute.xlu1 %2436 }
 0xa8e   : > { %v2435_v55 = vpop.permute.xlu1 %2434 }
 0xa92   : > { %v2433_v56 = vpop.permute.xlu1 %2432 }
 0xa94   : > { %v4688_v40 = vpop.eup %4687 }
 0xa95   : > { %v2331_v41 = vsel %vm1307_vm2, %v4688_v40, 0.0 }
 0xa96   : > { %v4690_v42 = vpop.eup %4689  ;;  %2332 = vadd.xlane.f32.xlu0 %v2331_v41  ;;  %v3160_v41 = vld [vmem:[#allocation3 + $0x68] sm:$0xff] }
 0xa97   : > { %v2328_v26 = vsel %vm1307_vm2, %v4690_v42, 0.0 }
 0xa9a   : > { %2329 = vadd.xlane.f32.xlu0 %v2328_v26 }
 0xab0   : > { %2340 = vrot.lane.b32.xlu0 %v5605_v6, %s5071_s1 }
 0xab4   : > { %2430 = vrot.lane.b32.xlu0 %v5635_v27, %s5072_s2 }
 0xb1f   : > { %v2333_v43 = vpop.xlane.xlu0 %2332 }
 0xb20   : > { %4691 = vrcp.f32 %v2333_v43 }
 0xb23   : > { %v2330_v44 = vpop.xlane.xlu0 %2329 }
 0xb24   : > { %4693 = vrcp.f32 %v2330_v44 }
 0xb27   : > { %v2341_v50 = vpop.permute.xlu0 %2340 }
 0xb28   : > { %4417 = vmatprep.subr.mxu0 %v2341_v50 }
 0xb29   : > { %4418 = vmatpush3.msra.mxu0 %v2341_v50 }
 0xb2a   : > { %4422 = vmatprep.subr.msk.mxu0 %vm1219_vm1, %v2437_v51 }
 0xb2b   : > { %v2431_v54 = vpop.permute.xlu0 %2430 }
 0xb2d   : > { %v4692_v52 = vpop.eup %4691 }
 0xb2e   : > { %v2337_v47 = vmul.f32 %v4692_v52, %v4688_v40  ;;  %v3159_v40 = vld [vmem:[#allocation3 + $0x60] sm:$0xff] }
 0xb31   : > { %v4694_v19 = vpop.eup %4693 }
 0xb32   : > { %v2336_v16 = vmul.f32 %v4694_v19, %v4690_v42 }
 0xb34   : > { %4419 = vmatprep.mubr.msk.f32.mxu0 %vm1307_vm2, %v2336_v16 }
 0xb35   : > { %4420 = vmatmul.mubr.msk.f32.vlgmr.msra.gmra.mxu0 %vm1307_vm2, %v2337_v47 }
 0xb36   : > { %4423 = vmatpush3.xpose.msk.msra.mxu0 %vm1219_vm1, %v2437_v51  ;;  %4426 = vmatprep.mubr.msk.f32.mxu0 %vm1219_vm1, %v2431_v54 }
 0xb37   : > { %4424 = vmatprep.subr.msk.mxu0 %vm1219_vm1, %v2435_v55 }
 0xb3a   : > { %4425 = vmatpush3.xpose.msk.msra.mxu0 %vm1219_vm1, %v2435_v55 }
 0xb3d   : > { %4427 = vmatmul.mubr.msk.f32.vlgmr.msra.gmra.mxu0 %vm1219_vm1, %v2433_v56 }
 0xbf5   : > { %v4421_v12 = vpop.f32.mrf.mxu0 }
 0xbf6   : > { %2429 = vst.msk [vmem:[#allocation3 + $0x38] sm:$0xff] %vm1219_vm1, %v4421_v12 }
 0xbf7   : > { %v2418_v10 = vpop.f32.mrf.mxu0 }
 0xbf8   : > { %2428 = vst.msk [vmem:[#allocation3 + $0x30] sm:$0xff] %vm1219_vm1, %v2418_v10 }
 0xbfd   : > { %v4428_v48 = vpop.f32.mrf.mxu0 }
 0xbfe   : > { %v2518_v18 = vadd.f32 %v4428_v48, %v5659_v49 }
 0xbff   : > { %v2512_v57 = vpop.f32.mrf.mxu0 }
 0xc00   : > { %v2513_v58 = vadd.f32 %v5659_v49, %v2512_v57  ;;  %v2524_v59 = vsel %vm1307_vm2, %v2518_v18, -inf }
 0xc01   : > { %2525 = vmax.xlane.f32.xlu1 %v2524_v59 }
 0xc02   : > { %v2521_v60 = vsel %vm1307_vm2, %v2513_v58, -inf }
 0xc03   : > { %2522 = vmax.xlane.f32.xlu0 %v2521_v60  ;;  %v2843_v60 = vld [vmem:[%s5401_s0 + $0x38] sm:$0xff] }
 0xc12   : > { %2545 = vrot.lane.b32.xlu1 %v5531_v29, %s5072_s2 }
 0xc16   : > { %2639 = vrot.lane.b32.xlu1 %v5629_v45, %s5073_s3 }
 0xc1a   : > { %2637 = vrot.lane.b32.xlu1 %v5640_v53, %s5073_s3 }
 0xc1e   : > { %2635 = vrot.lane.b32.xlu1 %v5653_v46, %s5073_s3 }
 0xc8a   : > { %v2526_v61 = vpop.xlane.xlu1 %2525 }
 0xc8b   : > { %v2528_v62 = vsub.f32 %v2518_v18, %v2526_v61 }
 0xc8c   : > { %v2523_v24 = vpop.xlane.xlu0 %2522 }
 0xc8d   : > { %v2531_v63 = vmul.f32 1.442695, %v2528_v62  ;;  %v2527_v0 = vsub.f32 %v2513_v58, %v2523_v24 }
 0xc8e   : > { %v2546_v1 = vpop.permute.xlu1 %2545 }
 0xc8f   : > { %4695 = vpow2.f32 %v2531_v63  ;;  %v2529_v2 = vmul.f32 1.442695, %v2527_v0  ;;  %4429 = vmatprep.subr.mxu1 %v2546_v1  ;;  %v2856_v0 = vld [vmem:[#allocation3 + $0x20] sm:$0xff] }
 0xc90   : > { %4430 = vmatpush3.msra.mxu1 %v2546_v1  ;;  %v2841_v1 = vld [vmem:[%s5401_s0 + $0x28] sm:$0xff] }
 0xc91   : > { %4697 = vpow2.f32 %v2529_v2  ;;  %v2840_v2 = vld [vmem:[%s5401_s0 + $0x20] sm:$0xff] }
 0xc92   : > { %v2640_v11 = vpop.permute.xlu1 %2639 }
 0xc96   : > { %v2638_v17 = vpop.permute.xlu1 %2637 }
 0xc9a   : > { %v2636_v22 = vpop.permute.xlu1 %2635 }
 0xc9c   : > { %v4696_v3 = vpop.eup %4695 }
 0xc9d   : > { %v2536_v45 = vsel %vm1307_vm2, %v4696_v3, 0.0 }
 0xc9e   : > { %v4698_v4 = vpop.eup %4697  ;;  %2537 = vadd.xlane.f32.xlu0 %v2536_v45  ;;  %v2857_v45 = vld [vmem:[#allocation3 + $0x28] sm:$0xff] }
 0xc9f   : > { %v2533_v53 = vsel %vm1307_vm2, %v4698_v4, 0.0 }
 0xca2   : > { %2534 = vadd.xlane.f32.xlu0 %v2533_v53  ;;  %v2858_v53 = vld [vmem:[#allocation3 + $0x30] sm:$0xff] }
 0xcb8   : > { %2543 = vrot.lane.b32.xlu0 %v5605_v6, %s5072_s2 }
 0xcbc   : > { %2633 = vrot.lane.b32.xlu0 %v5635_v27, %s5073_s3 }
 0xd27   : > { %v2538_v46 = vpop.xlane.xlu0 %2537 }
 0xd28   : > { %4699 = vrcp.f32 %v2538_v46  ;;  %v2845_v46 = vld [vmem:[%s5401_s0 + $0x48] sm:$0xff] }
 0xd2b   : > { %v2535_v5 = vpop.xlane.xlu0 %2534 }
 0xd2c   : > { %4701 = vrcp.f32 %v2535_v5  ;;  %v2859_v5 = vld [vmem:[#allocation3 + $0x38] sm:$0xff] }
 0xd2f   : > { %v2544_v9 = vpop.permute.xlu0 %2543 }
 0xd30   : > { %4431 = vmatprep.subr.mxu1 %v2544_v9 }
 0xd31   : > { %4432 = vmatpush3.msra.mxu1 %v2544_v9  ;;  %v2844_v9 = vld [vmem:[%s5401_s0 + $0x40] sm:$0xff] }
 0xd32   : > { %4436 = vmatprep.subr.msk.mxu1 %vm1219_vm1, %v2640_v11 }
 0xd33   : > { %v2634_v27 = vpop.permute.xlu0 %2633 }
 0xd35   : > { %v4700_v14 = vpop.eup %4699 }
 0xd36   : > { %v2542_v38 = vmul.f32 %v4700_v14, %v4696_v3  ;;  %v2847_v3 = vld [vmem:[%s5401_s0 + $0x58] sm:$0xff] }
 0xd37   : > { %v3055_v14 = vld [vmem:[#allocation3 + $0x48] sm:$0xff] }
 0xd39   : > { %v4702_v15 = vpop.eup %4701 }
 0xd3a   : > { %v2541_v23 = vmul.f32 %v4702_v15, %v4698_v4  ;;  %v2846_v4 = vld [vmem:[%s5401_s0 + $0x50] sm:$0xff] }
 0xd3c   : > { %4433 = vmatprep.mubr.msk.f32.mxu1 %vm1307_vm2, %v2541_v23 }
 0xd3d   : > { %4434 = vmatmul.mubr.msk.f32.vlgmr.msra.gmra.mxu1 %vm1307_vm2, %v2542_v38 }
 0xd3e   : > { %4437 = vmatpush3.xpose.msk.msra.mxu1 %vm1219_vm1, %v2640_v11  ;;  %4440 = vmatprep.mubr.msk.f32.mxu1 %vm1219_vm1, %v2634_v27  ;;  %v3054_v11 = vld [vmem:[#allocation3 + $0x40] sm:$0xff] }
 0xd3f   : > { %4438 = vmatprep.subr.msk.mxu1 %vm1219_vm1, %v2638_v17 }
 0xd42   : > { %4439 = vmatpush3.xpose.msk.msra.mxu1 %vm1219_vm1, %v2638_v17 }
 0xd43   : > { %4464 = vmatprep.subr.mxu1 %v2839_v20 }
 0xd45   : > { %4441 = vmatmul.mubr.msk.f32.vlgmr.msra.gmra.mxu1 %vm1219_vm1, %v2636_v22 }
 0xd46   : > { %4465 = vmatpush3.msra.mxu1 %v2839_v20  ;;  %4472 = vmatprep.mubr.msk.f32.mxu1 %vm1219_vm1, %v2852_v28 }
 0xd47   : > { %4466 = vmatprep.subr.mxu1 %v2838_v25 }
 0xd48   : > { %4467 = vmatpush3.msra.mxu1 %v2838_v25 }
 0xd49   : > { %4468 = vmatprep.subr.mxu1 %v2837_v30 }
 0xd4a   : > { %4469 = vmatpush3.msra.mxu1 %v2837_v30 }
 0xd4b   : > { %4470 = vmatprep.subr.mxu1 %v2836_v31 }
 0xd4c   : > { %4471 = vmatpush3.msra.mxu1 %v2836_v31 }
 0xd4d   : > { %4473 = vmatmul.mubr.msk.f32.vlgmr.msra.gmra.mxu1 %vm1219_vm1, %v2853_v33  ;;  %4492 = vmatprep.subr.mxu1 %v2851_v32 }
 0xd4e   : > { %4475 = vmatprep.mubr.msk.f32.mxu1 %vm1219_vm1, %v2854_v35  ;;  %4493 = vmatpush3.msra.mxu1 %v2851_v32 }
 0xd4f   : > { %4494 = vmatprep.subr.mxu1 %v2850_v34 }
 0xd50   : > { %4495 = vmatpush3.msra.mxu1 %v2850_v34 }
 0xd51   : > { %4476 = vmatmul.mubr.msk.f32.gmra.mxu1 %vm1219_vm1, %v2855_v37  ;;  %4496 = vmatprep.subr.mxu1 %v2849_v36 }
 0xd52   : > { %4497 = vmatpush3.msra.mxu1 %v2849_v36  ;;  %4500 = vmatprep.mubr.msk.f32.mxu1 %vm1219_vm1, %v3159_v40 }
 0xd53   : > { %4498 = vmatprep.subr.mxu1 %v2848_v39 }
 0xd54   : > { %4499 = vmatpush3.msra.mxu1 %v2848_v39 }
 0xd55   : > { %4501 = vmatmul.mubr.msk.f32.vlgmr.msra.gmra.mxu1 %vm1219_vm1, %v3160_v41 }
 0xdfd   : > { %v4435_v42 = vpop.f32.mrf.mxu1 }
 0xdfe   : > { %2632 = vst.msk [vmem:[#allocation3 + $0x58] sm:$0xff] %vm1219_vm1, %v4435_v42  ;;  %v4107_v42 = vld [vmem:[%s829_s19] ss:$0 sm:$0xff] }
 0xdff   : > { %v2621_v26 = vpop.f32.mrf.mxu1 }
 0xe00   : > { %2631 = vst.msk [vmem:[#allocation3 + $0x50] sm:$0xff] %vm1219_vm1, %v2621_v26 }
 0xe05   : > { %v4442_v43 = vpop.f32.mrf.mxu1  ;;  %v3057_v23 = vld [vmem:[#allocation3 + $0x58] sm:$0xff] }
 0xe06   : > { %v2721_v44 = vadd.f32 %v4442_v43, %v5659_v49 }
 0xe07   : > { %v2715_v50 = vpop.f32.mrf.mxu1  ;;  %v3056_v15 = vld [vmem:[#allocation3 + $0x50] sm:$0xff] }
 0xe08   : > { %v2716_v51 = vadd.f32 %v5659_v49, %v2715_v50  ;;  %v2727_v52 = vsel %vm1307_vm2, %v2721_v44, -inf }
 0xe09   : > { %2728 = vmax.xlane.f32.xlu1 %v2727_v52  ;;  %v4743_v52 = vld [vmem:[#allocation2] sm:$0xff] }
 0xe0a   : > { %v2724_v19 = vsel %vm1307_vm2, %v2716_v51, -inf }
 0xe0b   : > { %2725 = vmax.xlane.f32.xlu0 %v2724_v19 }
 0xe0d   : > { %v4474_v38 = vpop.f32.mrf.mxu1 }
 0xe0f   : > { %v3035_v20 = vpop.f32.mrf.mxu1 }
 0xe11   : > { %v4477_v22 = vpop.f32.mrf.mxu1 }
 0xe13   : > { %v3045_v32 = vpop.f32.mrf.mxu1 }
 0xe15   : > { %v4502_v36 = vpop.f32.mrf.mxu1 }
 0xe1a   : > { %2748 = vrot.lane.b32.xlu1 %v5531_v29, %s5073_s3 }
 0xe92   : > { %v2729_v16 = vpop.xlane.xlu1 %2728 }
 0xe93   : > { %v2731_v47 = vsub.f32 %v2721_v44, %v2729_v16  ;;  %v3241_v44 = vpop.f32.mrf.mxu1 }
 0xe94   : > { %v2726_v54 = vpop.xlane.xlu0 %2725 }
 0xe95   : > { %v2734_v55 = vmul.f32 1.442695, %v2731_v47  ;;  %v2730_v56 = vsub.f32 %v2716_v51, %v2726_v54  ;;  %v4744_v47 = vld [vmem:[#allocation2 + $0x10] sm:$0xff] }
 0xe96   : > { %v2749_v12 = vpop.permute.xlu1 %2748 }
 0xe97   : > { %4703 = vpow2.f32 %v2734_v55  ;;  %v2732_v10 = vmul.f32 1.442695, %v2730_v56  ;;  %4443 = vmatprep.subr.mxu0 %v2749_v12  ;;  %v3377_v55 = vld [vmem:[%s5403_s11 + $0xf8] sm:$0xff]  ;;  %v3376_v56 = vld [vmem:[%s5403_s11 + $0xf0] sm:$0xff] }
 0xe98   : > { %4444 = vmatpush3.msra.mxu0 %v2749_v12 }
 0xe99   : > { %4705 = vpow2.f32 %v2732_v10 }
 0xea4   : > { %v4704_v49 = vpop.eup %4703 }
 0xea5   : > { %v2739_v48 = vsel %vm1307_vm2, %v4704_v49, 0.0 }
 0xea6   : > { %v4706_v18 = vpop.eup %4705  ;;  %2740 = vadd.xlane.f32.xlu0 %v2739_v48 }
 0xea7   : > { %v2736_v57 = vsel %vm1307_vm2, %v4706_v18, 0.0 }
 0xeaa   : > { %2737 = vadd.xlane.f32.xlu0 %v2736_v57 }
 0xec0   : > { %2746 = vrot.lane.b32.xlu0 %v5605_v6, %s5073_s3  ;;  %v2842_v6 = vld [vmem:[%s5401_s0 + $0x30] sm:$0xff] }
 0xf2f   : > { %v2741_v29 = vpop.xlane.xlu0 %2740 }
 0xf30   : > { %4707 = vrcp.f32 %v2741_v29 }
 0xf33   : > { %v2738_v58 = vpop.xlane.xlu0 %2737 }
 0xf34   : > { %4709 = vrcp.f32 %v2738_v58 }
 0xf37   : > { %v2747_v59 = vpop.permute.xlu0 %2746 }
 0xf38   : > { %4445 = vmatprep.subr.mxu0 %v2747_v59 }
 0xf39   : > { %4446 = vmatpush3.msra.mxu0 %v2747_v59 }
 0xf3a   : > { %4450 = vmatprep.subr.mxu0 %v2843_v60 }
 0xf3d   : > { %v4708_v61 = vpop.eup %4707 }
 0xf3e   : > { %v2745_v63 = vmul.f32 %v4708_v61, %v4704_v49 }
 0xf41   : > { %v4710_v62 = vpop.eup %4709 }
 0xf42   : > { %v2744_v24 = vmul.f32 %v4710_v62, %v4706_v18 }
 0xf44   : > { %4447 = vmatprep.mubr.msk.f32.mxu0 %vm1307_vm2, %v2744_v24 }
 0xf45   : > { %4448 = vmatmul.mubr.msk.f32.vlgmr.msra.gmra.mxu0 %vm1307_vm2, %v2745_v63 }
 0xf46   : > { %4451 = vmatpush3.msra.mxu0 %v2843_v60  ;;  %4458 = vmatprep.mubr.msk.f32.mxu0 %vm1219_vm1, %v2856_v0 }
 0xf47   : > { %4452 = vmatprep.subr.mxu0 %v2842_v6 }
 0xf48   : > { %4453 = vmatpush3.msra.mxu0 %v2842_v6 }
 0xf49   : > { %4454 = vmatprep.subr.mxu0 %v2841_v1 }
 0xf4a   : > { %4455 = vmatpush3.msra.mxu0 %v2841_v1 }
 0xf4b   : > { %4456 = vmatprep.subr.mxu0 %v2840_v2 }
 0xf4c   : > { %4457 = vmatpush3.msra.mxu0 %v2840_v2  ;;  %v4745_v2 = vld [vmem:[#allocation2 + $0x8] sm:$0xff] }
 0xf4d   : > { %4459 = vmatmul.mubr.msk.f32.vlgmr.msra.gmra.mxu0 %vm1219_vm1, %v2857_v45  ;;  %4478 = vmatprep.subr.mxu0 %v2847_v3 }
 0xf4e   : > { %4461 = vmatprep.mubr.msk.f32.mxu0 %vm1219_vm1, %v2858_v53  ;;  %4479 = vmatpush3.msra.mxu0 %v2847_v3 }
 0xf4f   : > { %4480 = vmatprep.subr.mxu0 %v2846_v4 }
 0xf50   : > { %4481 = vmatpush3.msra.mxu0 %v2846_v4  ;;  %v4746_v4 = vld [vmem:[#allocation2 + $0x18] sm:$0xff] }
 0xf51   : > { %4462 = vmatmul.mubr.msk.f32.gmra.mxu0 %vm1219_vm1, %v2859_v5  ;;  %4482 = vmatprep.subr.mxu0 %v2845_v46 }
 0xf52   : > { %4483 = vmatpush3.msra.mxu0 %v2845_v46  ;;  %4486 = vmatprep.mubr.msk.f32.mxu0 %vm1219_vm1, %v3054_v11  ;;  %v3374_v11 = vld [vmem:[%s5403_s11 + $0xe0] sm:$0xff] }
 0xf53   : > { %4484 = vmatprep.subr.mxu0 %v2844_v9 }
 0xf54   : > { %4485 = vmatpush3.msra.mxu0 %v2844_v9  ;;  %v3375_v9 = vld [vmem:[%s5403_s11 + $0xe8] sm:$0xff] }
 0xf55   : > { %4487 = vmatmul.mubr.msk.f32.vlgmr.msra.gmra.mxu0 %vm1219_vm1, %v3055_v14  ;;  %3390 = vmatprep.subr.mxu0 %v3377_v55  ;;  %v3373_v14 = vld [vmem:[%s5403_s11 + $0xd8] sm:$0xff] }
 0xf56   : > { %4489 = vmatprep.mubr.msk.f32.mxu0 %vm1219_vm1, %v3056_v15  ;;  %3391 = vmatpush1.msra.mxu0 %v3376_v56  ;;  %v3372_v15 = vld [vmem:[%s5403_s11 + $0xd0] sm:$0xff] }
 0xf57   : > { %3392 = vmatprep.subr.mxu0 %v3375_v9  ;;  %v3579_v9 = vld [vmem:[%s5405_s26 + $0xe0] sm:$0xff] }
 0xf58   : > { %3393 = vmatpush1.msra.mxu0 %v3374_v11  ;;  %v3563_v11 = vld [vmem:[%s5405_s26 + $0x60] sm:$0xff] }
 0xf59   : > { %4490 = vmatmul.mubr.msk.f32.gmra.mxu0 %vm1219_vm1, %v3057_v23  ;;  %3394 = vmatprep.subr.mxu0 %v3373_v14  ;;  %v3371_v23 = vld [vmem:[%s5403_s11 + $0xc8] sm:$0xff]  ;;  %v3578_v14 = vld [vmem:[%s5405_s26 + $0xd8] sm:$0xff] }
 0xf5a   : > { %3454 = vmatprep.mubr.f32.mxu0 %v5070_v21  ;;  %3395 = vmatpush1.msra.mxu0 %v3372_v15  ;;  %v3562_v15 = vld [vmem:[%s5405_s26 + $0x58] sm:$0xff] }
 0xf5b   : > { %3396 = vmatprep.subr.mxu0 %v3371_v23  ;;  %v3577_v23 = vld [vmem:[%s5405_s26 + $0xd0] sm:$0xff] }
0x1005   : > { %v4449_v27 = vpop.f32.mrf.mxu0 }
0x1006   : > { %2835 = vst.msk [vmem:[#allocation3 + $0x78] sm:$0xff] %vm1219_vm1, %v4449_v27  ;;  %v3369_v27 = vld [vmem:[%s5403_s11 + $0xb8] sm:$0xff] }
0x1007   : > { %v2824_v17 = vpop.f32.mrf.mxu0 }
0x1008   : > { %2834 = vst.msk [vmem:[#allocation3 + $0x70] sm:$0xff] %vm1219_vm1, %v2824_v17  ;;  %v3368_v17 = vld [vmem:[%s5403_s11 + $0xb0] sm:$0xff] }
0x100d   : > { %v4460_v25 = vpop.f32.mrf.mxu0  ;;  %v3162_v31 = vld [vmem:[#allocation3 + $0x78] sm:$0xff] }
0x100e   : > { %v3041_v35 = vadd.f32 %v4474_v38, %v4460_v25  ;;  %v3370_v38 = vld [vmem:[%s5403_s11 + $0xc0] sm:$0xff]  ;;  %v3365_v25 = vld [vmem:[%s5403_s11 + $0x98] sm:$0xff] }
0x100f   : > { %v2938_v28 = vpop.f32.mrf.mxu0  ;;  %v3161_v30 = vld [vmem:[#allocation3 + $0x70] sm:$0xff]  ;;  %3397 = vmatpush1.msra.mxu0 %v3370_v38  ;;  %v3561_v38 = vld [vmem:[%s5405_s26 + $0x50] sm:$0xff] }
0x1010   : > { %4503 = vmatprep.mubr.msk.f32.mxu1 %vm1219_vm1, %v3161_v30  ;;  %v3036_v39 = vadd.f32 %v3035_v20, %v2938_v28  ;;  %3398 = vmatprep.subr.mxu0 %v3369_v27  ;;  %v3367_v20 = vld [vmem:[%s5403_s11 + $0xa8] sm:$0xff]  ;;  %v3364_v28 = vld [vmem:[%s5403_s11 + $0x90] sm:$0xff] }
0x1011   : > { %v4463_v33 = vpop.f32.mrf.mxu0  ;;  %4504 = vmatmul.mubr.msk.f32.gmra.mxu1 %vm1219_vm1, %v3162_v31  ;;  %3399 = vmatpush1.msra.mxu0 %v3368_v17  ;;  %v3363_v30 = vld [vmem:[%s5403_s11 + $0x88] sm:$0xff]  ;;  %v3362_v31 = vld [vmem:[%s5403_s11 + $0x80] sm:$0xff] }
0x1012   : > { %v3051_v10 = vadd.f32 %v4477_v22, %v4463_v33  ;;  %3400 = vmatprep.subr.mxu0 %v3367_v20  ;;  %v3366_v22 = vld [vmem:[%s5403_s11 + $0xa0] sm:$0xff]  ;;  %v3360_v33 = vld [vmem:[%s5403_s11 + $0x70] sm:$0xff]  ;;  %v3576_v27 = vld [vmem:[%s5405_s26 + $0xc8] sm:$0xff] }
0x1013   : > { %v2948_v34 = vpop.f32.mrf.mxu0  ;;  %3401 = vmatpush1.msra.mxu0 %v3366_v22  ;;  %v3560_v17 = vld [vmem:[%s5405_s26 + $0x48] sm:$0xff]  ;;  %v3575_v20 = vld [vmem:[%s5405_s26 + $0xc0] sm:$0xff] }
0x1014   : > { %v3046_v18 = vadd.f32 %v3045_v32, %v2948_v34  ;;  %3402 = vmatprep.subr.mxu0 %v3365_v25  ;;  %v3361_v32 = vld [vmem:[%s5403_s11 + $0x78] sm:$0xff]  ;;  %v3359_v34 = vld [vmem:[%s5403_s11 + $0x68] sm:$0xff]  ;;  %v3559_v22 = vld [vmem:[%s5405_s26 + $0x40] sm:$0xff] }
0x1015   : > { %v4488_v37 = vpop.f32.mrf.mxu0  ;;  %3403 = vmatpush1.msra.mxu0 %v3364_v28  ;;  %v3574_v25 = vld [vmem:[%s5405_s26 + $0xb8] sm:$0xff] }
0x1016   : > { %v3156_v40 = vadd.f32 %v4488_v37, %v3041_v35  ;;  %3404 = vmatprep.subr.mxu0 %v3363_v30  ;;  %v3358_v35 = vld [vmem:[%s5403_s11 + $0x60] sm:$0xff]  ;;  %v3356_v37 = vld [vmem:[%s5403_s11 + $0x50] sm:$0xff]  ;;  %v3558_v28 = vld [vmem:[%s5405_s26 + $0x38] sm:$0xff] }
0x1017   : > { %v3136_v41 = vpop.f32.mrf.mxu0  ;;  %3405 = vmatpush1.msra.mxu0 %v3362_v31  ;;  %v3573_v30 = vld [vmem:[%s5405_s26 + $0xb0] sm:$0xff] }
0x1018   : > { %v3261_v26 = vadd.f32 %v4502_v36, %v3156_v40  ;;  %v3155_v43 = vadd.f32 %v3136_v41, %v3036_v39  ;;  %3406 = vmatprep.subr.mxu0 %v3361_v32  ;;  %v3357_v36 = vld [vmem:[%s5403_s11 + $0x58] sm:$0xff]  ;;  %v3355_v39 = vld [vmem:[%s5403_s11 + $0x48] sm:$0xff]  ;;  %v3354_v40 = vld [vmem:[%s5403_s11 + $0x40] sm:$0xff] }
0x1019   : > { %v4491_v12 = vpop.f32.mrf.mxu0  ;;  %3407 = vmatpush1.msra.mxu0 %v3360_v33  ;;  %v3353_v41 = vld [vmem:[%s5403_s11 + $0x38] sm:$0xff]  ;;  %v3557_v31 = vld [vmem:[%s5405_s26 + $0x30] sm:$0xff]  ;;  %v3572_v32 = vld [vmem:[%s5405_s26 + $0xa8] sm:$0xff] }
0x101a   : > { %v3260_v50 = vadd.f32 %v3241_v44, %v3155_v43  ;;  %v3272_v51 = vadd.f32 %v4107_v42, %v3261_v26  ;;  %v3158_v57 = vadd.f32 %v4491_v12, %v3051_v10  ;;  %3408 = vmatprep.subr.mxu0 %v3359_v34  ;;  %v3351_v26 = vld [vmem:[%s5403_s11 + $0x28] sm:$0xff]  ;;  %v3350_v43 = vld [vmem:[%s5403_s11 + $0x20] sm:$0xff]  ;;  %v3349_v44 = vld [vmem:[%s5403_s11 + $0x18] sm:$0xff] }
0x101b   : > { %v3146_v49 = vpop.f32.mrf.mxu0  ;;  %3409 = vmatpush1.msra.mxu0 %v3358_v35  ;;  %v3556_v33 = vld [vmem:[%s5405_s26 + $0x28] sm:$0xff]  ;;  %v3571_v34 = vld [vmem:[%s5405_s26 + $0xa0] sm:$0xff] }
0x101c   : > { %v3276_v19 = vadd.f32 %v4743_v52, %v3272_v51  ;;  %v3271_v16 = vadd.f32 %v4107_v42, %v3260_v50  ;;  %v3157_v59 = vadd.f32 %v3146_v49, %v3046_v18  ;;  %3410 = vmatprep.subr.mxu0 %v3357_v36  ;;  %v3348_v50 = vld [vmem:[%s5403_s11 + $0x10] sm:$0xff]  ;;  %v3347_v51 = vld [vmem:[%s5403_s11 + $0x8] sm:$0xff]  ;;  %v3346_v52 = vld [vmem:[%s5403_s11] sm:$0xff] }
0x101d   : > { %3411 = vmatpush1.msra.mxu0 %v3356_v37  ;;  %v3555_v35 = vld [vmem:[%s5405_s26 + $0x20] sm:$0xff]  ;;  %v3570_v36 = vld [vmem:[%s5405_s26 + $0x98] sm:$0xff] }
0x101e   : > { %3283 = vadd.xlane.f32.xlu0 %v3276_v19  ;;  %v3275_v54 = vadd.f32 %v4744_v47, %v3271_v16  ;;  %3412 = vmatprep.subr.mxu0 %v3355_v39  ;;  %v3554_v37 = vld [vmem:[%s5405_s26 + $0x18] sm:$0xff]  ;;  %v3569_v39 = vld [vmem:[%s5405_s26 + $0x90] sm:$0xff] }
0x101f   : > { %3413 = vmatpush1.msra.mxu0 %v3354_v40  ;;  %v3553_v40 = vld [vmem:[%s5405_s26 + $0x10] sm:$0xff] }
0x1020   : > { %3281 = vadd.xlane.f32.xlu1 %v3275_v54  ;;  %3414 = vmatprep.subr.mxu0 %v3353_v41  ;;  %v3568_v41 = vld [vmem:[%s5405_s26 + $0x88] sm:$0xff] }
0x10a7   : > { %v3284_v48 = vpop.xlane.xlu0 %3283 }
0x10a8   : > { %v3291_v60 = vmul.f32 0.0078125, %v3284_v48 }
0x10a9   : > { %v3282_v29 = vpop.xlane.xlu1 %3281 }
0x10aa   : > { %v3290_v24 = vmul.f32 0.0078125, %v3282_v29  ;;  %v5795_v0 = vsub.f32 %v3276_v19, %v3291_v60 }
0x10ac   : > { %v5799_v45 = vsub.f32 %v3275_v54, %v3290_v24  ;;  %v3299_v46 = vmul.f32 %v5795_v0, %v5795_v0  ;;  %v5856_v24 = vld [vmem:[%s6059_s29] ss:$0 sm:$0xff] }
0x10ae   : > { %v3298_v5 = vmul.f32 %v5799_v45, %v5799_v45 }
0x10d1   : > { %v4505_v58 = vpop.f32.mrf.mxu1 }
0x10d2   : > { %v3263_v61 = vadd.f32 %v4505_v58, %v3158_v57 }
0x10d3   : > { %v3251_v62 = vpop.f32.mrf.mxu1 }
0x10d4   : > { %v3274_v63 = vadd.f32 %v4107_v42, %v3263_v61  ;;  %v3262_v6 = vadd.f32 %v3251_v62, %v3157_v59 }
0x10d6   : > { %v3273_v1 = vadd.f32 %v4107_v42, %v3262_v6  ;;  %v5797_v3 = vadd.f32 %v4745_v2, %v3274_v63  ;;  %v3352_v42 = vld [vmem:[%s5403_s11 + $0x30] sm:$0xff] }
0x10d7   : > { %3415 = vmatpush1.msra.mxu0 %v3352_v42  ;;  %v5864_v6 = vld [vmem:[%s6061_s28] ss:$0 sm:$0xff]  ;;  %v3552_v42 = vld [vmem:[%s5405_s26 + $0x8] sm:$0xff] }
0x10d8   : > { %3287 = vadd.xlane.f32.xlu0 %v5797_v3  ;;  %v5802_v53 = vadd.f32 %v4746_v4, %v3273_v1  ;;  %3416 = vmatprep.subr.mxu0 %v3351_v26  ;;  %v3581_v4 = vld [vmem:[%s5405_s26 + $0xf0] sm:$0xff]  ;;  %v3567_v26 = vld [vmem:[%s5405_s26 + $0x80] sm:$0xff] }
0x10d9   : > { %3417 = vmatpush1.msra.mxu0 %v3350_v43  ;;  %v3551_v43 = vld [vmem:[%s5405_s26] sm:$0xff] }
0x10da   : > { %3285 = vadd.xlane.f32.xlu1 %v5802_v53  ;;  %3418 = vmatprep.subr.mxu0 %v3349_v44 }
0x10db   : > { %3419 = vmatpush1.msra.mxu0 %v3348_v50 }
0x10dc   : > { %3304 = vadd.xlane.f32.xlu0 %v3299_v46  ;;  %3420 = vmatprep.subr.mxu0 %v3347_v51  ;;  %v3580_v46 = vld [vmem:[%s5405_s26 + $0xe8] sm:$0xff] }
0x10dd   : > { %3421 = vmatpush1.msra.mxu0 %v3346_v52 }
0x10de   : > { %3302 = vadd.xlane.f32.xlu1 %v3298_v5  ;;  %v3564_v5 = vld [vmem:[%s5405_s26 + $0x68] sm:$0xff] }
0x1161   : > { %v3288_v19 = vpop.xlane.xlu0 %3287 }
0x1162   : > { %v3293_v16 = vmul.f32 0.0078125, %v3288_v19 }
0x1163   : > { %v3286_v47 = vpop.xlane.xlu1 %3285 }
0x1164   : > { %v5840_v54 = vsub.f32 %v5797_v3, %v3293_v16  ;;  %v3292_v55 = vmul.f32 0.0078125, %v3286_v47  ;;  %v3582_v3 = vld [vmem:[%s5405_s26 + $0xf8] sm:$0xff] }
0x1165   : > { %v3305_v56 = vpop.xlane.xlu0 %3304  ;;  %4244 = vmatprep.subr.mxu1 %v3582_v3 }
0x1166   : > { %v5843_v12 = vsub.f32 %v5802_v53, %v3292_v55  ;;  %v3311_v10 = vmul.f32 0.0078125, %v3305_v56  ;;  %v3301_v49 = vmul.f32 %v5840_v54, %v5840_v54  ;;  %v3565_v53 = vld [vmem:[%s5405_s26 + $0x70] sm:$0xff] }
0x1167   : > { %v3303_v48 = vpop.xlane.xlu1 %3302 }
0x1168   : > { %v3315_v18 = vadd.f32 1e-05, %v3311_v10  ;;  %v3310_v57 = vmul.f32 0.0078125, %v3303_v48  ;;  %3308 = vadd.xlane.f32.xlu0 %v3301_v49  ;;  %v3300_v29 = vmul.f32 %v5843_v12, %v5843_v12 }
0x116a   : > { %4711 = vrsqrt.f32 %v3315_v18  ;;  %v3314_v58 = vadd.f32 1e-05, %v3310_v57  ;;  %3306 = vadd.xlane.f32.xlu1 %v3300_v29  ;;  %v3378_v29 = vld [vmem:[%s5387_s10] sm:$0x3] }
0x116c   : > { %4713 = vrsqrt.f32 %v3314_v58 }
0x1177   : > { %v4712_v59 = vpop.eup %4711 }
0x1178   : > { %v3323_v62 = vmul.f32 %v4712_v59, %v5795_v0 }
0x1179   : > { %v4714_v60 = vpop.eup %4713 }
0x117a   : > { %v3322_v61 = vmul.f32 %v4714_v60, %v5799_v45  ;;  %v3333_v0 = vmul.f32 %v5856_v24, %v3323_v62  ;;  %v3566_v45 = vld [vmem:[%s5405_s26 + $0x78] sm:$0xff] }
0x117b   : > { %4245 = vmatpush3.msra.mxu1 %v3566_v45 }
0x117c   : > { %v3332_v63 = vmul.f32 %v5856_v24, %v3322_v61  ;;  %v5873_v2 = vadd.f32 %v5864_v6, %v3333_v0  ;;  %4246 = vmatprep.subr.mxu1 %v3581_v4 }
0x117d   : > { %4247 = vmatpush3.msra.mxu1 %v3565_v53 }
0x117e   : > { %v5867_v1 = vadd.f32 %v5864_v6, %v3332_v63  ;;  %4248 = vmatprep.subr.mxu1 %v3580_v46 }
0x117f   : > { %4249 = vmatpush3.msra.mxu1 %v3564_v5 }
0x1180   : > { %3455 = vmatmul.mubr.f32.vlgmr.msra.gmra.mxu0 %v5867_v1  ;;  %4250 = vmatprep.subr.mxu1 %v3579_v9 }
0x1181   : > { %3460 = vmatprep.mubr.f32.mxu0 %v5070_v21  ;;  %4251 = vmatpush3.msra.mxu1 %v3563_v11 }
0x1182   : > { %4252 = vmatprep.subr.mxu1 %v3578_v14 }
0x1183   : > { %4253 = vmatpush3.msra.mxu1 %v3562_v15 }
0x1184   : > { %3461 = vmatmul.mubr.f32.gmra.mxu0 %v5873_v2  ;;  %4254 = vmatprep.subr.mxu1 %v3577_v23 }
0x1185   : > { %3466 = vmatprep.mubr.f32.mxu0 %v5070_v21  ;;  %4255 = vmatpush3.msra.mxu1 %v3561_v38 }
0x1186   : > { %4256 = vmatprep.subr.mxu1 %v3576_v27 }
0x1187   : > { %4257 = vmatpush3.msra.mxu1 %v3560_v17 }
0x1188   : > { %4258 = vmatprep.subr.mxu1 %v3575_v20 }
0x1189   : > { %4259 = vmatpush3.msra.mxu1 %v3559_v22 }
0x118a   : > { %4260 = vmatprep.subr.mxu1 %v3574_v25 }
0x118b   : > { %4261 = vmatpush3.msra.mxu1 %v3558_v28 }
0x118c   : > { %4262 = vmatprep.subr.mxu1 %v3573_v30 }
0x118d   : > { %4263 = vmatpush3.msra.mxu1 %v3557_v31 }
0x118e   : > { %4264 = vmatprep.subr.mxu1 %v3572_v32 }
0x118f   : > { %4265 = vmatpush3.msra.mxu1 %v3556_v33 }
0x1190   : > { %4266 = vmatprep.subr.mxu1 %v3571_v34 }
0x1191   : > { %4267 = vmatpush3.msra.mxu1 %v3555_v35 }
0x1192   : > { %4268 = vmatprep.subr.mxu1 %v3570_v36 }
0x1193   : > { %4269 = vmatpush3.msra.mxu1 %v3554_v37 }
0x1194   : > { %4270 = vmatprep.subr.mxu1 %v3569_v39 }
0x1195   : > { %4271 = vmatpush3.msra.mxu1 %v3553_v40 }
0x1196   : > { %4272 = vmatprep.subr.mxu1 %v3568_v41 }
0x1197   : > { %4273 = vmatpush3.msra.mxu1 %v3552_v42 }
0x1198   : > { %4274 = vmatprep.subr.mxu1 %v3567_v26 }
0x1199   : > { %4275 = vmatpush3.msra.mxu1 %v3551_v43 }
0x11f1   : > { %v3309_v44 = vpop.xlane.xlu0 %3308 }
0x11f2   : > { %v3313_v50 = vmul.f32 0.0078125, %v3309_v44 }
0x11f3   : > { %v3307_v51 = vpop.xlane.xlu1 %3306 }
0x11f4   : > { %v3317_v52 = vadd.f32 1e-05, %v3313_v50  ;;  %v3312_v19 = vmul.f32 0.0078125, %v3307_v51 }
0x11f6   : > { %4715 = vrsqrt.f32 %v3317_v52  ;;  %v3316_v16 = vadd.f32 1e-05, %v3312_v19 }
0x11f8   : > { %4717 = vrsqrt.f32 %v3316_v16 }
0x1203   : > { %v4716_v47 = vpop.eup %4715 }
0x1204   : > { %v3325_v10 = vmul.f32 %v4716_v47, %v5840_v54  ;;  %v3383_v54 = vrot.slane %v3378_v29, %v1025_v8 }
0x1205   : > { %v4718_v55 = vpop.eup %4717 }
0x1206   : > { %v3324_v56 = vmul.f32 %v4718_v55, %v5843_v12  ;;  %v3335_v18 = vmul.f32 %v5856_v24, %v3325_v10  ;;  %v5927_v12 = vrot.slane %v3378_v29, %v1029_v13 }
0x1208   : > { %v3334_v49 = vmul.f32 %v5856_v24, %v3324_v56  ;;  %v5919_v57 = vadd.f32 %v5864_v6, %v3335_v18 }
0x120a   : > { %v5913_v48 = vadd.f32 %v5864_v6, %v3334_v49 }
0x120c   : > { %3467 = vmatmul.mubr.f32.gmra.mxu0 %v5913_v48 }
0x120d   : > { %3472 = vmatprep.mubr.f32.mxu0 %v5070_v21 }
0x1210   : > { %3473 = vmatmul.mubr.f32.gmra.mxu0 %v5919_v57 }
0x1240   : > { %v3456_v58 = vpop.f32.mrf.mxu0 }
0x1241   : > { %v3457_v59 = vadd.f32 %v3456_v58, %v3383_v54 }
0x1242   : > { %v3458_v60 = vpop.f32.mrf.mxu0 }
0x1243   : > { %v3487_v61 = vmul.f32 0.044715, %v3457_v59  ;;  %v3459_v62 = vadd.f32 %v3458_v60, %v5927_v12  ;;  %v3479_v33 = vmul.f32 0.5, %v3457_v59 }
0x1244   : > { %v3462_v21 = vpop.f32.mrf.mxu0 }
0x1245   : > { %v3495_v24 = vmul.f32 %v3487_v61, %v3457_v59  ;;  %v3488_v63 = vmul.f32 0.044715, %v3459_v62  ;;  %v3463_v6 = vadd.f32 %v3462_v21, %v3383_v54  ;;  %v3480_v30 = vmul.f32 0.5, %v3459_v62 }
0x1246   : > { %v3464_v0 = vpop.f32.mrf.mxu0 }
0x1247   : > { %v3503_v3 = vmul.f32 %v3495_v24, %v3457_v59  ;;  %v3496_v45 = vmul.f32 %v3488_v63, %v3459_v62  ;;  %v3489_v4 = vmul.f32 0.044715, %v3463_v6  ;;  %v3465_v8 = vadd.f32 %v3464_v0, %v5927_v12 }
0x1248   : > { %v3481_v41 = vmul.f32 0.5, %v3463_v6 }
0x1249   : > { %v3511_v53 = vadd.f32 %v3503_v3, %v3457_v59  ;;  %v3497_v7 = vmul.f32 %v3489_v4, %v3463_v6  ;;  %v3490_v13 = vmul.f32 0.044715, %v3465_v8  ;;  %v3504_v46 = vmul.f32 %v3496_v45, %v3459_v62 }
0x124a   : > { %v3482_v39 = vmul.f32 0.5, %v3465_v8 }
0x124b   : > { %v3519_v5 = vmul.f32 0.7978846, %v3511_v53  ;;  %v3498_v9 = vmul.f32 %v3490_v13, %v3465_v8  ;;  %v3512_v11 = vadd.f32 %v3504_v46, %v3459_v62  ;;  %v3505_v14 = vmul.f32 %v3497_v7, %v3463_v6 }
0x124d   : > { %4719 = vtanh.f32 %v3519_v5  ;;  %v3520_v15 = vmul.f32 0.7978846, %v3512_v11  ;;  %v3506_v23 = vmul.f32 %v3498_v9, %v3465_v8  ;;  %v3513_v38 = vadd.f32 %v3505_v14, %v3463_v6 }
0x124f   : > { %4721 = vtanh.f32 %v3520_v15  ;;  %v3514_v27 = vadd.f32 %v3506_v23, %v3465_v8  ;;  %v3521_v17 = vmul.f32 0.7978846, %v3513_v38 }
0x1251   : > { %v3522_v20 = vmul.f32 0.7978846, %v3514_v27  ;;  %4723 = vtanh.f32 %v3521_v17 }
0x1253   : > { %4725 = vtanh.f32 %v3522_v20 }
0x125a   : > { %v4720_v22 = vpop.eup %4719 }
0x125b   : > { %v3535_v28 = vadd.f32 1.0, %v4720_v22 }
0x125c   : > { %v4722_v25 = vpop.eup %4721 }
0x125d   : > { %v3536_v31 = vadd.f32 1.0, %v4722_v25  ;;  %v3543_v36 = vmul.f32 %v3535_v28, %v3479_v33  ;;  %v4110_v25 = vld [vmem:[%s842_s14] ss:$0 sm:$0xff] }
0x125e   : > { %v4724_v32 = vpop.eup %4723 }
0x125f   : > { %v3544_v34 = vmul.f32 %v3536_v31, %v3480_v30  ;;  %v3537_v37 = vadd.f32 1.0, %v4724_v32 }
0x1260   : > { %v4726_v35 = vpop.eup %4725 }
0x1261   : > { %3654 = vmatprep.mubr.f32.mxu1 %v3544_v34  ;;  %v3538_v40 = vadd.f32 1.0, %v4726_v35  ;;  %v3545_v26 = vmul.f32 %v3537_v37, %v3481_v41 }
0x1262   : > { %3655 = vmatmul.mubr.f32.vlgmr.msra.gmra.mxu1 %v3543_v36 }
0x1263   : > { %v3546_v42 = vmul.f32 %v3538_v40, %v3482_v39 }
0x1265   : > { %3659 = vmatprep.mubr.f32.mxu1 %v3546_v42 }
0x1266   : > { %3660 = vmatmul.mubr.f32.gmra.mxu1 %v3545_v26 }
0x12cc   : > { %v3468_v43 = vpop.f32.mrf.mxu0 }
0x12cd   : > { %v3469_v44 = vadd.f32 %v3468_v43, %v3383_v54 }
0x12ce   : > { %v3470_v50 = vpop.f32.mrf.mxu0 }
0x12cf   : > { %v3491_v51 = vmul.f32 0.044715, %v3469_v44  ;;  %v3471_v52 = vadd.f32 %v3470_v50, %v5927_v12  ;;  %v3483_v5 = vmul.f32 0.5, %v3469_v44 }
0x12d0   : > { %v3474_v19 = vpop.f32.mrf.mxu0 }
0x12d1   : > { %v3499_v16 = vmul.f32 %v3491_v51, %v3469_v44  ;;  %v3492_v47 = vmul.f32 0.044715, %v3471_v52  ;;  %v3475_v55 = vadd.f32 %v3474_v19, %v3383_v54  ;;  %v3484_v7 = vmul.f32 0.5, %v3471_v52 }
0x12d2   : > { %v3476_v56 = vpop.f32.mrf.mxu0 }
0x12d3   : > { %v3500_v10 = vmul.f32 %v3492_v47, %v3471_v52  ;;  %v3493_v49 = vmul.f32 0.044715, %v3475_v55  ;;  %v3477_v18 = vadd.f32 %v3476_v56, %v5927_v12  ;;  %v3507_v29 = vmul.f32 %v3499_v16, %v3469_v44 }
0x12d4   : > { %v3485_v27 = vmul.f32 0.5, %v3475_v55 }
0x12d5   : > { %v3501_v58 = vmul.f32 %v3493_v49, %v3475_v55  ;;  %v3494_v59 = vmul.f32 0.044715, %v3477_v18  ;;  %v3508_v60 = vmul.f32 %v3500_v10, %v3471_v52  ;;  %v3515_v61 = vadd.f32 %v3507_v29, %v3469_v44 }
0x12d6   : > { %v3486_v23 = vmul.f32 0.5, %v3477_v18 }
0x12d7   : > { %v3502_v62 = vmul.f32 %v3494_v59, %v3477_v18  ;;  %v3516_v21 = vadd.f32 %v3508_v60, %v3471_v52  ;;  %v3523_v24 = vmul.f32 0.7978846, %v3515_v61  ;;  %v3509_v63 = vmul.f32 %v3501_v58, %v3475_v55 }
0x12d9   : > { %v3524_v6 = vmul.f32 0.7978846, %v3516_v21  ;;  %4727 = vtanh.f32 %v3523_v24  ;;  %v3510_v0 = vmul.f32 %v3502_v62, %v3477_v18  ;;  %v3517_v3 = vadd.f32 %v3509_v63, %v3475_v55 }
0x12db   : > { %4729 = vtanh.f32 %v3524_v6  ;;  %v3518_v54 = vadd.f32 %v3510_v0, %v3477_v18  ;;  %v3525_v45 = vmul.f32 0.7978846, %v3517_v3  ;;  %v4111_v3 = vld [vmem:[%s845_s5] ss:$0 sm:$0xff] }
0x12dd   : > { %v3526_v4 = vmul.f32 0.7978846, %v3518_v54  ;;  %4731 = vtanh.f32 %v3525_v45  ;;  %v4112_v45 = vld [vmem:[%s848_s7] ss:$0 sm:$0xff] }
0x12df   : > { %4733 = vtanh.f32 %v3526_v4 }
0x12e6   : > { %v4728_v12 = vpop.eup %4727 }
0x12e7   : > { %v3539_v53 = vadd.f32 1.0, %v4728_v12 }
0x12e8   : > { %v4730_v8 = vpop.eup %4729 }
0x12e9   : > { %v3540_v13 = vadd.f32 1.0, %v4730_v8  ;;  %v3547_v14 = vmul.f32 %v3539_v53, %v3483_v5 }
0x12ea   : > { %v4732_v46 = vpop.eup %4731 }
0x12eb   : > { %v3548_v9 = vmul.f32 %v3540_v13, %v3484_v7  ;;  %v3541_v15 = vadd.f32 1.0, %v4732_v46 }
0x12ec   : > { %v4734_v11 = vpop.eup %4733 }
0x12ed   : > { %3664 = vmatprep.mubr.f32.mxu1 %v3548_v9  ;;  %v3542_v38 = vadd.f32 1.0, %v4734_v11  ;;  %v3549_v20 = vmul.f32 %v3541_v15, %v3485_v27 }
0x12ee   : > { %3665 = vmatmul.mubr.f32.gmra.mxu1 %v3547_v14 }
0x12ef   : > { %v3550_v17 = vmul.f32 %v3542_v38, %v3486_v23 }
0x12f1   : > { %3669 = vmatprep.mubr.f32.mxu1 %v3550_v17 }
0x12f2   : > { %3670 = vmatmul.mubr.f32.gmra.mxu1 %v3549_v20 }
0x1322   : > { %v4276_v22 = vpop.f32.mrf.mxu1 }
0x1324   : > { %v4277_v28 = vpop.f32.mrf.mxu1 }
0x1325   : > { %v4278_v30 = vadd.f32 %v4277_v28, %v4276_v22 }
0x1326   : > { %v4279_v31 = vpop.f32.mrf.mxu1 }
0x1327   : > { %v3657_v32 = vadd.f32 %v4278_v30, %v4110_v25 }
0x1328   : > { %v4280_v33 = vpop.f32.mrf.mxu1 }
0x1329   : > { %v4281_v34 = vadd.f32 %v4280_v33, %v4279_v31  ;;  %v3675_v35 = vadd.f32 %v3657_v32, %v5867_v1 }
0x132b   : > { %v3662_v36 = vadd.f32 %v4281_v34, %v4110_v25  ;;  %3681 = vadd.xlane.f32.xlu1 %v3675_v35 }
0x132d   : > { %v3676_v37 = vadd.f32 %v3662_v36, %v5873_v2 }
0x132f   : > { %3683 = vadd.xlane.f32.xlu0 %v3676_v37 }
0x13ae   : > { %v4282_v39 = vpop.f32.mrf.mxu1 }
0x13b0   : > { %v4283_v40 = vpop.f32.mrf.mxu1 }
0x13b1   : > { %v4284_v41 = vadd.f32 %v4283_v40, %v4282_v39 }
0x13b2   : > { %v4285_v42 = vpop.f32.mrf.mxu1 }
0x13b3   : > { %v3667_v26 = vadd.f32 %v4284_v41, %v4110_v25 }
0x13b4   : > { %v4286_v43 = vpop.f32.mrf.mxu1  ;;  %v3682_v44 = vpop.xlane.xlu1 %3681 }
0x13b5   : > { %v4287_v50 = vadd.f32 %v4286_v43, %v4285_v42  ;;  %v3689_v51 = vmul.f32 0.0078125, %v3682_v44  ;;  %v3677_v52 = vadd.f32 %v3667_v26, %v5913_v48 }
0x13b7   : > { %v3672_v19 = vadd.f32 %v4287_v50, %v4110_v25  ;;  %v3693_v16 = vsub.f32 %v3675_v35, %v3689_v51  ;;  %3685 = vadd.xlane.f32.xlu1 %v3677_v52 }
0x13b8   : > { %v3684_v1 = vpop.xlane.xlu0 %3683 }
0x13b9   : > { %v3690_v47 = vmul.f32 0.0078125, %v3684_v1  ;;  %v3678_v55 = vadd.f32 %v3672_v19, %v5919_v57  ;;  %v3697_v2 = vmul.f32 %v3693_v16, %v3693_v16 }
0x13bb   : > { %v3694_v56 = vsub.f32 %v3676_v37, %v3690_v47  ;;  %3687 = vadd.xlane.f32.xlu0 %v3678_v55  ;;  %3701 = vadd.xlane.f32.xlu1 %v3697_v2 }
0x13bd   : > { %v3698_v10 = vmul.f32 %v3694_v56, %v3694_v56 }
0x13bf   : > { %3703 = vadd.xlane.f32.xlu0 %v3698_v10 }
0x1440   : > { %v3686_v49 = vpop.xlane.xlu1 %3685 }
0x1441   : > { %v3691_v18 = vmul.f32 0.0078125, %v3686_v49 }
0x1443   : > { %v3695_v29 = vsub.f32 %v3677_v52, %v3691_v18 }
0x1444   : > { %v3688_v58 = vpop.xlane.xlu0 %3687  ;;  %v3702_v59 = vpop.xlane.xlu1 %3701 }
0x1445   : > { %v3692_v48 = vmul.f32 0.0078125, %v3688_v58  ;;  %v3709_v60 = vmul.f32 0.0078125, %v3702_v59  ;;  %v3699_v61 = vmul.f32 %v3695_v29, %v3695_v29 }
0x1447   : > { %v3696_v62 = vsub.f32 %v3678_v55, %v3692_v48  ;;  %v3713_v21 = vadd.f32 1e-05, %v3709_v60  ;;  %3705 = vadd.xlane.f32.xlu1 %v3699_v61 }
0x1448   : > { %v3704_v57 = vpop.xlane.xlu0 %3703 }
0x1449   : > { %4735 = vrsqrt.f32 %v3713_v21  ;;  %v3710_v24 = vmul.f32 0.0078125, %v3704_v57  ;;  %v3700_v63 = vmul.f32 %v3696_v62, %v3696_v62 }
0x144b   : > { %v3714_v6 = vadd.f32 1e-05, %v3710_v24  ;;  %3707 = vadd.xlane.f32.xlu0 %v3700_v63 }
0x144d   : > { %4737 = vrsqrt.f32 %v3714_v6 }
0x1456   : > { %v4736_v0 = vpop.eup %4735 }
0x1457   : > { %v3721_v54 = vmul.f32 %v4736_v0, %v3693_v16 }
0x1459   : > { %v3731_v4 = vmul.f32 %v4111_v3, %v3721_v54 }
0x145a   : > { %v4738_v12 = vpop.eup %4737 }
0x145b   : > { %v3741_v8 = vadd.f32 %v4112_v45, %v3731_v4  ;;  %v3722_v53 = vmul.f32 %v4738_v12, %v3694_v56 }
0x145d   : > { %3745 = vst [vmem:[#allocation2 + $0x10] sm:$0xff] %v3741_v8  ;;  %v3732_v7 = vmul.f32 %v4111_v3, %v3722_v53 }
0x145f   : > { %v3742_v13 = vadd.f32 %v4112_v45, %v3732_v7 }
0x1461   : > { %3746 = vst [vmem:[#allocation2] sm:$0xff] %v3742_v13 }
0x14d0   : > { %v3706_v46 = vpop.xlane.xlu1 %3705 }
0x14d1   : > { %v3711_v5 = vmul.f32 0.0078125, %v3706_v46 }
0x14d3   : > { %v3715_v9 = vadd.f32 1e-05, %v3711_v5 }
0x14d4   : > { %v3708_v11 = vpop.xlane.xlu0 %3707 }
0x14d5   : > { %4739 = vrsqrt.f32 %v3715_v9  ;;  %v3712_v14 = vmul.f32 0.0078125, %v3708_v11 }
0x14d7   : > { %v3716_v15 = vadd.f32 1e-05, %v3712_v14 }
0x14d9   : > { %4741 = vrsqrt.f32 %v3716_v15 }
0x14e2   : > { %v4740_v23 = vpop.eup %4739 }
0x14e3   : > { %v3723_v38 = vmul.f32 %v4740_v23, %v3695_v29 }
0x14e5   : > { %v3733_v27 = vmul.f32 %v4111_v3, %v3723_v38 }
0x14e6   : > { %v4742_v17 = vpop.eup %4741 }
0x14e7   : > { %v3743_v20 = vadd.f32 %v4112_v45, %v3733_v27  ;;  %v3724_v22 = vmul.f32 %v4742_v17, %v3696_v62 }
0x14e9   : > { %3747 = vst [vmem:[#allocation2 + $0x18] sm:$0xff] %v3743_v20  ;;  %v3734_v25 = vmul.f32 %v4111_v3, %v3724_v22  ;;  %3752 = sbr.rel (%p4113_p6) target bundleno = 5362 (0x14f2), region = 124 }
0x14eb   : > { %v3744_v28 = vadd.f32 %v4112_v45, %v3734_v25 }
0x14ed   : > { %3748 = vst [vmem:[#allocation2 + $0x8] sm:$0xff] %v3744_v28 }
0x14ee   : > { %v3753_v30 = vld [vmem:[#allocation2 + $0x10] sm:$0x1] }
0x14ef   : > { %3755 = vst [vmem:[#allocation16] sm:$0x1] %v3753_v30 }
0x14f0   : > { %v3754_v31 = vld [vmem:[#allocation2 + $0x18] sm:$0x1] }
0x14f1   : > { %3756 = vst [vmem:[#allocation16 + $0x1] sm:$0x1] %v3754_v31 }
0x14f2 PF: > { %p4579_p10 = scmp.eq.s32.totalorder %s5191_s27, 1  ;;  %s5074_s30 = smov [#allocation16]  }
0x14f3   : > { %s3766_s5 = sshll.u32 %s5074_s30, 4  ;;  %s3767_s5 = int_to_ptr.vmem [resolvable:$true] %s3766_s5 }
0x14f4   : > { %s4963_s7 = scalar_lea.vmem %s3767_s5, 32  ;;  %p4970_p3 = scmp.lt.s32.totalorder %s3767_s5, %s3767_s5 }
0x14f5   : > { %p4964_p7 = scmp.ne.s32.totalorder %s3767_s5, %s4963_s7  ;;  %p4971_p0 = scmp.lt.s32.totalorder %s4963_s7, %s4963_s7 }
0x14f7   : > { %p4965_p11 = pnand %p4964_p7, %p4579_p10  ;;  %p4972_p12 = por %p4971_p0, %p4970_p3 }
0x14f9   : > { %p4966_p1 = pneg %p4965_p11 }
0x14fb   : > { %p4973_p2 = pnand %p4972_p12, %p4966_p1 }
0x14fd   : > { %4976 = shalt.err (!%p4973_p2)
}
0x14fe   : > { %s5075_s24 = smov 16   ;;  %s5076_s1 = smov 1  }
0x14ff   : > { %s6065_s4 = sld [smem:[#allocation41_spill]] }
0x1505   : > { %4541 = dma.vmem_to_hbm [thread:$0]  (%p4579_p10), %s3767_s5, 32, %s6065_s4, [#allocation6], %s5075_s24, %s5075_s24, %s5076_s1  }
0x1506   : > { %5028 = dma.done.wait (%p4579_p10), [#allocation6], 32  }
0x1507   : > { %5030 = vsyncadd (%p4579_p10), [#allocation6], 4294967264 }
0x1508 PF: > { %s6066_s9 = sld [smem:[#allocation23_spill]]  ;;  %s6070_s21 = smov %s5037_s22 }
0x1509   : > { %s6067_s16 = sld [smem:[#allocation22_spill]]  ;;  %s6072_s24 = smov %s5049_s25 }
0x150a   : > { %s6068_s23 = sld [smem:[#allocation25_spill]] }
0x150b   : > { %s6069_s19 = sld [smem:[#allocation24_spill]] }
0x150e   : > { %s30_s26 = sadd.s32 1, %s6066_s9  }
0x150f   : > { %p27_p9 = scmp.ge.s32.totalorder %s30_s26, 4   ;;  %s6071_s22 = smov %s6067_s16 }
0x1511   : > { %s6073_s25 = smov %s6069_s19  ;;  %29 = sbr.rel (!%p27_p9) target bundleno = 23 (0x17), region = 212 }
0x1516   :  { %3782 = vsyncpa [#allocation5], 1 }
0x1517   :  { %3784 = vsyncpa [#allocation5 + $0x1], 1 }
0x1518   :  { %3785 = vsyncpa [#allocation8], 1 }
0x1519   :  { %3786 = vsyncpa [#allocation11], 1 }
0x151a   :  { %3787 = vsyncpa [#allocation6], 1 }
0x151b   :  { %3789 = vsyncpa [#allocation6 + $0x1], 1 }

</bundles_post_ra>
